<compile_context>
chip_gen: v5e
topology: v5e:2x2
jax: 0.10.0
libtpu: 0.0.40
codegen_flags: <defaults>
</compile_context>

<pallas_src>
import functools
import math

import jax
import jax.numpy as jnp
from jax.experimental import pallas as pl
from jax.experimental.pallas import tpu as pltpu


def _tpu_generation():
    """Best-effort TPU generation (5, 6, 7, ...); defaults to 6 if unknown."""
    try:
        kind = jax.devices()[0].device_kind.lower()
    except Exception:
        return 6
    for g in (7, 6, 5, 4):
        if f"v{g}" in kind:
            return g
    return 6


# ---------------------------------------------------------------------------
# Pallas kernel 1: fused implicit-GEMM conv2d + bias (folded KH*KW contraction)
# ---------------------------------------------------------------------------
def _conv_kernel(x_ref, w_ref, b_ref, o_ref, patch_ref, *,
                 KH, KW, C, Ws, HsWs, TR, s, n_r):
    """One grid step: TR output rows x Ws columns x one OC tile.

    x_ref     : (1, s*s*Hs*Ws, C) f32   zero-padded phase images, spatially flat
    w_ref     : (KH*KW*C, TOC)    bf16  folded weight tile, rows ordered (kh,kw,c)
    b_ref     : (1, TOC)          f32
    o_ref     : (1, TR*Ws, TOC)   f32   flat output slab (junk rows/cols sliced later)
    patch_ref : (TR*Ws, KH*KW*C)  bf16  VMEM staging patch (implicit im2col tile)
    """
    m = TR * Ws
    row0 = 0 if n_r == 1 else pl.program_id(2) * TR      # static when n_r == 1

    # Stage all KH*KW shifted windows into one bf16 patch so a single MXU dot
    # contracts the full KH*KW*C depth instead of KH*KW shallow dots + acc +=.
    for kh in range(KH):                                  # static, small (e.g. 3x3)
        for kw in range(KW):
            tap = kh * KW + kw
            ph = (kh % s) * s + (kw % s)                  # phase-image index
            base = ph * HsWs + (row0 + kh // s) * Ws + (kw // s)
            patch_ref[:, tap * C:(tap + 1) * C] = (
                x_ref[0, pl.ds(base, m), :].astype(jnp.bfloat16))

    o_ref[0] = (jnp.dot(patch_ref[...], w_ref[...],
                        preferred_element_type=jnp.float32)
                + b_ref[...])                             # bias once, f32 store


def _conv2d_pallas(x, weight, bias, *, stride=1, padding=1):
    """x: [N,C,H,W] f32, weight: [OC,C,KH,KW] f32, bias: [OC] -> NHWC [N,OH,OW,OC] f32."""
    N, C, H, W = x.shape
    OC, _, KH, KW = weight.shape
    s, p = int(stride), int(padding)
    OH = (H + 2 * p - KH) // s + 1
    OW = (W + 2 * p - KW) // s + 1

    gen = _tpu_generation()

    # Lane-dense OC tile: 256 fills the v6e/v7x MXU columns, 128 on v5e (and for
    # small OC where padding to 256 would be pure waste).
    toc_hw = 256 if gen >= 6 else 128
    TOC = min(toc_hw, pl.cdiv(OC, 128) * 128)
    OCp = pl.cdiv(OC, TOC) * TOC
    noc = OCp // TOC

    # Space-to-batch ("phase image") geometry: tap (kh,kw) reads phase (kh%s,kw%s)
    # with a contiguous slice -> exact stride handling, no strided loads, no s^2
    # junk FLOPs.  For s == 1 this degenerates to the plain padded image.
    Ws = pl.cdiv(W + 2 * p, s)                 # phase-image width (incl. small junk)
    qh_max = (KH - 1) // s
    qc_max = (KW - 1) // s
    assert OW + qc_max <= Ws                   # valid columns never wrap rows

    # Row-block sizing (generation-aware): m = TR*Ws MXU rows per grid step.
    target_m = 1024 if gen >= 7 else 2048      # v7x: 64 MiB VMEM; v5e/v6e: 128 MiB
    TR = max(1, min(OH, pl.cdiv(target_m, Ws)))
    g8 = 8 // math.gcd(Ws, 8)
    TR = pl.cdiv(TR, g8) * g8                  # keep m a multiple of 8 sublanes
    n_r = pl.cdiv(OH, TR)
    m = TR * Ws

    # Phase-image height: covers every (possibly junk) output row of every block
    # plus the largest tap shift, so all flat windows stay in-bounds.
    Hs = max(pl.cdiv(H + 2 * p, s), n_r * TR + qh_max + 1)
    Hp, Wp = Hs * s, Ws * s

    # NCHW -> zero-padded NHWC -> s*s phase images, spatially flattened.
    # TODO(synk): keep activations NHWC across layers (drop this and the final
    # NHWC->NCHW transpose) and emit bf16 output if the consumer accepts it.
    x_nhwc = jnp.transpose(x, (0, 2, 3, 1)).astype(jnp.float32)
    x_pad = jnp.pad(x_nhwc, ((0, 0), (p, Hp - H - p), (p, Wp - W - p), (0, 0)))
    x_ph = x_pad.reshape(N, Hs, s, Ws, s, C).transpose(0, 2, 4, 1, 3, 5)
    x_flat = x_ph.reshape(N, s * s * Hs * Ws, C)
    # TODO(synk): store the resident image as bf16 (halves its VMEM/DMA) once
    # packed-dtype windows at arbitrary sublane offsets are verified on this
    # Mosaic build; the in-kernel cast keeps MXU operands bf16 either way.
    # TODO(synk): on v7x, consider pipeline_mode=pl.Buffered(1) or halo
    # row-blocking / manual DMA for the image to cut its buffer count.

    # Weight -> (KH*KW*C, OCp) bf16, rows ordered (kh, kw, c); bias -> (1, OCp) f32.
    Kc = KH * KW * C
    w_r = jnp.transpose(weight, (2, 3, 1, 0)).reshape(Kc, OC)
    w_r = jnp.pad(w_r, ((0, 0), (0, OCp - OC))).astype(jnp.bfloat16)
    b_r = jnp.pad(bias.astype(jnp.float32), (0, OCp - OC)).reshape(1, OCp)

    flops = 2 * N * n_r * m * Kc * OCp
    bytes_accessed = (N * x_flat.shape[1] * C * 4
                      + N * noc * Kc * TOC * 2
                      + N * n_r * m * OCp * 4)
    vmem_limit = (48 if gen >= 7 else 100) * 1024 * 1024

    out_flat = pl.pallas_call(
        functools.partial(_conv_kernel, KH=KH, KW=KW, C=C, Ws=Ws,
                          HsWs=Hs * Ws, TR=TR, s=s, n_r=n_r),
        out_shape=jax.ShapeDtypeStruct((N, n_r * m, OCp), jnp.float32),
        grid=(N, noc, n_r),
        in_specs=[
            # whole phase-image set: resident across the oc-tile / row-block axes
            pl.BlockSpec((1, s * s * Hs * Ws, C), lambda n, j, r: (n, 0, 0)),
            pl.BlockSpec((Kc, TOC), lambda n, j, r: (0, j)),
            pl.BlockSpec((1, TOC), lambda n, j, r: (0, j)),
        ],
        out_specs=pl.BlockSpec((1, m, TOC), lambda n, j, r: (n, r, j)),
        scratch_shapes=[pltpu.VMEM((m, Kc), jnp.bfloat16)],
        compiler_params=pltpu.CompilerParams(
            # every (n, j, r) writes its own output block -> all axes parallel
            dimension_semantics=("parallel", "parallel", "parallel"),
            vmem_limit_bytes=vmem_limit),
        cost_estimate=pl.CostEstimate(flops=flops, transcendentals=0,
                                      bytes_accessed=bytes_accessed),
    )(x_flat, w_r, b_r)

    out = out_flat.reshape(N, n_r * TR, Ws, OCp)[:, :OH, :OW, :OC]
    return out                                            # NHWC


# ---------------------------------------------------------------------------
# Pallas kernel 2: cascading group-lasso (compute_group_lasso_v2)
#   gl = sum_{c} sum_j || W[c*chunk_size :, j] ||_2
#   (the scaling_factor in the PyTorch code is computed but never applied)
# ---------------------------------------------------------------------------
def _group_lasso_kernel(w_ref, out_ref, *, n_chunks, chunk_size):
    @pl.when(pl.program_id(0) == 0)
    def _():
        out_ref[0] = jnp.float32(0.0)

    sq = w_ref[...] * w_ref[...]                          # (OCp, TK) f32, zero-padded
    # One pass: reverse running per-column sums-of-squares -> cascaded L2 norms.
    # Accumulate sqrt(csum) as a (1, TK) vector; single lane reduction at the end.
    csum = jnp.zeros((1, sq.shape[1]), jnp.float32)
    acc = jnp.zeros((1, sq.shape[1]), jnp.float32)
    for c in range(n_chunks - 1, -1, -1):                 # static, small
        lo = c * chunk_size
        csum = csum + jnp.sum(sq[lo:lo + chunk_size, :], axis=0, keepdims=True)
        acc = acc + jnp.sqrt(csum)
    out_ref[0] = out_ref[0] + jnp.sum(acc)                # accumulate across K tiles


def _group_lasso_v2(w_mat, chunk_size=32, tile_k=512):
    """w_mat: [OC, K] f32 -> scalar f32 (matches PrunedConv.compute_group_lasso_v2)."""
    OC, K = w_mat.shape
    last_chunk = OC % chunk_size
    n_chunks = OC // chunk_size + (last_chunk != 0)

    # Zero-padded rows don't change column norms; zero-padded columns add sqrt(0)=0.
    OCp = pl.cdiv(n_chunks * chunk_size, 8) * 8
    tile_k = min(tile_k, pl.cdiv(K, 128) * 128)
    Kp = pl.cdiv(K, tile_k) * tile_k
    w_p = jnp.pad(w_mat.astype(jnp.float32), ((0, OCp - OC), (0, Kp - K)))

    out = pl.pallas_call(
        functools.partial(_group_lasso_kernel,
                          n_chunks=n_chunks, chunk_size=chunk_size),
        out_shape=jax.ShapeDtypeStruct((1,), jnp.float32),
        grid=(Kp // tile_k,),
        in_specs=[pl.BlockSpec((OCp, tile_k), lambda k: (0, k))],
        out_specs=pl.BlockSpec(memory_space=pltpu.SMEM),
        compiler_params=pltpu.CompilerParams(dimension_semantics=("arbitrary",)),
    )(w_p)
    return out[0]


# ---------------------------------------------------------------------------
# Wrapper mirroring PrunedConv.forward
# ---------------------------------------------------------------------------
def pruned_conv_forward(x, weight, bias, *, stride=1, padding=1, chunk_size=32):
    """x: [N,C,H,W], weight: [OC,C,KH,KW], bias: [OC] -> (out NCHW, gl_loss scalar)."""
    OC = weight.shape[0]
    # gl_loss side value (computed when not finetuning, like the reference module).
    gl_loss = _group_lasso_v2(weight.reshape(OC, -1).astype(jnp.float32),
                              chunk_size=chunk_size)
    # TODO(synk): dilation != 1 / groups != 1 of the wrapped Conv2d are not implemented.
    out_nhwc = _conv2d_pallas(x, weight, bias, stride=stride, padding=padding)
    # TODO(synk): keep NHWC if downstream accepts it -- this permute is an extra HBM pass.
    out = jnp.transpose(out_nhwc, (0, 3, 1, 2))
    return out, gl_loss


if __name__ == "__main__":
    key = jax.random.PRNGKey(0)
    kx, kw_, kb, kx2, kw2, kb2 = jax.random.split(key, 6)

    def conv_ref(x_, w_, b_, s_, p_):
        # Compare against the same bf16-rounded operands the MXU path uses.
        xq = x_.astype(jnp.bfloat16).astype(jnp.float32)
        wq = w_.astype(jnp.bfloat16).astype(jnp.float32)
        r = jax.lax.conv_general_dilated(
            xq, wq, window_strides=(s_, s_), padding=((p_, p_), (p_, p_)),
            dimension_numbers=("NCHW", "OIHW", "NCHW"),
            precision=jax.lax.Precision.HIGHEST)
        return r + b_.reshape(1, -1, 1, 1)

    def gl_ref(wm, cs):
        ocs = wm.shape[0]
        nch = ocs // cs + (ocs % cs != 0)
        t = jnp.float32(0.0)
        for c in range(nch):
            t = t + jnp.sum(jnp.sqrt(jnp.sum(wm[c * cs:, :] ** 2, axis=0)))
        return t

    # ---- case 1: standard 3x3 / stride 1 / padding 1 ----
    N, C, H, W = 2, 4, 16, 16
    OC, KH, KW = 8, 3, 3
    x = jax.random.normal(kx, (N, C, H, W), dtype=jnp.float32)
    fan_in = C * KH * KW
    bound = 1.0 / (fan_in ** 0.5)
    weight = jax.random.uniform(kw_, (OC, C, KH, KW), jnp.float32, -bound, bound)
    bias = jax.random.uniform(kb, (OC,), jnp.float32, -bound, bound)

    fwd = jax.jit(functools.partial(pruned_conv_forward,
                                    stride=1, padding=1, chunk_size=32))
    out, gl_loss = fwd(x, weight, bias)
    jax.block_until_ready((out, gl_loss))

    ref = conv_ref(x, weight, bias, 1, 1)
    assert out.shape == (N, OC, H, W)
    assert jnp.allclose(out, ref, atol=1e-3, rtol=1e-3), "conv mismatch (stride 1)"
    w_mat = weight.reshape(OC, -1)
    assert jnp.allclose(gl_loss, gl_ref(w_mat, 32), atol=1e-3, rtol=1e-4), \
        "group lasso mismatch"
    gl3 = _group_lasso_v2(w_mat, chunk_size=3)
    assert jnp.allclose(gl3, gl_ref(w_mat, 3), atol=1e-3, rtol=1e-4), \
        "group lasso (ragged chunks) mismatch"

    # ---- case 2: stride 2, non-square spatial (exercises the phase-image path) ----
    N2, C2, H2, W2 = 2, 3, 9, 8
    OC2 = 5
    x2 = jax.random.normal(kx2, (N2, C2, H2, W2), dtype=jnp.float32)
    w2 = jax.random.uniform(kw2, (OC2, C2, KH, KW), jnp.float32, -0.3, 0.3)
    b2 = jax.random.uniform(kb2, (OC2,), jnp.float32, -0.3, 0.3)
    fwd2 = jax.jit(functools.partial(pruned_conv_forward,
                                     stride=2, padding=1, chunk_size=32))
    out2, gl2 = fwd2(x2, w2, b2)
    jax.block_until_ready((out2, gl2))
    ref2 = conv_ref(x2, w2, b2, 2, 1)
    OH2 = (H2 + 2 - KH) // 2 + 1
    OW2 = (W2 + 2 - KW) // 2 + 1
    assert out2.shape == (N2, OC2, OH2, OW2)
    assert jnp.allclose(out2, ref2, atol=1e-3, rtol=1e-3), "conv mismatch (stride 2)"
    assert jnp.allclose(gl2, gl_ref(w2.reshape(OC2, -1), 32), atol=1e-3, rtol=1e-4), \
        "group lasso mismatch (case 2)"

    print("KERNEL_OK")
</pallas_src>

<mosaic_0001>
module attributes {stable_mosaic.version = 11 : i64} {
  func.func @_conv_kernel(%arg0: i32, %arg1: i32, %arg2: i32, %arg3: memref<1x342x4xf32, #tpu.memory_space<vmem>>, %arg4: memref<36x128xbf16, #tpu.memory_space<vmem>>, %arg5: memref<1x128xf32, #tpu.memory_space<vmem>>, %arg6: memref<1x288x128xf32, #tpu.memory_space<vmem>>, %arg7: memref<288x36xbf16, #tpu.memory_space<vmem>>) attributes {dimension_semantics = [#tpu.dimension_semantics<parallel>, #tpu.dimension_semantics<parallel>, #tpu.dimension_semantics<parallel>], iteration_bounds = array<i64: 2, 1, 1>, scalar_prefetch = 0 : i64, scratch_operands = 1 : i64, tpu.core_type = #tpu.core_type<tc>, window_params = [{transform_indices = @transform_0, window_bounds = array<i64: 1, 342, 4>}, {transform_indices = @transform_1, window_bounds = array<i64: 36, 128>}, {transform_indices = @transform_2, window_bounds = array<i64: 1, 128>}, {transform_indices = @transform_3, window_bounds = array<i64: 1, 288, 128>}]} {
    %c0 = arith.constant 0 : index
    %c0_0 = arith.constant 0 : index
    %c0_1 = arith.constant 0 : index
    %0 = vector.load %arg3[%c0, %c0_0, %c0_1] : memref<1x342x4xf32, #tpu.memory_space<vmem>>, vector<1x288x4xf32>
    %1 = vector.shape_cast %0 : vector<1x288x4xf32> to vector<288x4xf32>
    %2 = arith.truncf %1 : vector<288x4xf32> to vector<288x4xbf16>
    %c0_2 = arith.constant 0 : index
    %c0_3 = arith.constant 0 : index
    %3 = vector.load %arg7[%c0_2, %c0_3] : memref<288x36xbf16, #tpu.memory_space<vmem>>, vector<288x4xbf16>
    tpu.vector_store %arg7[%c0_2, %c0_3], %2 {strides = array<i32>} : memref<288x36xbf16, #tpu.memory_space<vmem>>, vector<288x4xbf16>,
    %c0_4 = arith.constant 0 : index
    %c1 = arith.constant 1 : index
    %c0_5 = arith.constant 0 : index
    %4 = vector.load %arg3[%c0_4, %c1, %c0_5] : memref<1x342x4xf32, #tpu.memory_space<vmem>>, vector<1x288x4xf32>
    %5 = vector.shape_cast %4 : vector<1x288x4xf32> to vector<288x4xf32>
    %6 = arith.truncf %5 : vector<288x4xf32> to vector<288x4xbf16>
    %c0_6 = arith.constant 0 : index
    %c4 = arith.constant 4 : index
    %7 = vector.load %arg7[%c0_6, %c4] : memref<288x36xbf16, #tpu.memory_space<vmem>>, vector<288x4xbf16>
    tpu.vector_store %arg7[%c0_6, %c4], %6 {strides = array<i32>} : memref<288x36xbf16, #tpu.memory_space<vmem>>, vector<288x4xbf16>,
    %c0_7 = arith.constant 0 : index
    %c2 = arith.constant 2 : index
    %c0_8 = arith.constant 0 : index
    %8 = vector.load %arg3[%c0_7, %c2, %c0_8] : memref<1x342x4xf32, #tpu.memory_space<vmem>>, vector<1x288x4xf32>
    %9 = vector.shape_cast %8 : vector<1x288x4xf32> to vector<288x4xf32>
    %10 = arith.truncf %9 : vector<288x4xf32> to vector<288x4xbf16>
    %c0_9 = arith.constant 0 : index
    %c8 = arith.constant 8 : index
    %11 = vector.load %arg7[%c0_9, %c8] : memref<288x36xbf16, #tpu.memory_space<vmem>>, vector<288x4xbf16>
    tpu.vector_store %arg7[%c0_9, %c8], %10 {strides = array<i32>} : memref<288x36xbf16, #tpu.memory_space<vmem>>, vector<288x4xbf16>,
    %c0_10 = arith.constant 0 : index
    %c18 = arith.constant 18 : index
    %c0_11 = arith.constant 0 : index
    %12 = vector.load %arg3[%c0_10, %c18, %c0_11] : memref<1x342x4xf32, #tpu.memory_space<vmem>>, vector<1x288x4xf32>
    %13 = vector.shape_cast %12 : vector<1x288x4xf32> to vector<288x4xf32>
    %14 = arith.truncf %13 : vector<288x4xf32> to vector<288x4xbf16>
    %c0_12 = arith.constant 0 : index
    %c12 = arith.constant 12 : index
    %15 = vector.load %arg7[%c0_12, %c12] : memref<288x36xbf16, #tpu.memory_space<vmem>>, vector<288x4xbf16>
    tpu.vector_store %arg7[%c0_12, %c12], %14 {strides = array<i32>} : memref<288x36xbf16, #tpu.memory_space<vmem>>, vector<288x4xbf16>,
    %c0_13 = arith.constant 0 : index
    %c19 = arith.constant 19 : index
    %c0_14 = arith.constant 0 : index
    %16 = vector.load %arg3[%c0_13, %c19, %c0_14] : memref<1x342x4xf32, #tpu.memory_space<vmem>>, vector<1x288x4xf32>
    %17 = vector.shape_cast %16 : vector<1x288x4xf32> to vector<288x4xf32>
    %18 = arith.truncf %17 : vector<288x4xf32> to vector<288x4xbf16>
    %c0_15 = arith.constant 0 : index
    %c16 = arith.constant 16 : index
    %19 = vector.load %arg7[%c0_15, %c16] : memref<288x36xbf16, #tpu.memory_space<vmem>>, vector<288x4xbf16>
    tpu.vector_store %arg7[%c0_15, %c16], %18 {strides = array<i32>} : memref<288x36xbf16, #tpu.memory_space<vmem>>, vector<288x4xbf16>,
    %c0_16 = arith.constant 0 : index
    %c20 = arith.constant 20 : index
    %c0_17 = arith.constant 0 : index
    %20 = vector.load %arg3[%c0_16, %c20, %c0_17] : memref<1x342x4xf32, #tpu.memory_space<vmem>>, vector<1x288x4xf32>
    %21 = vector.shape_cast %20 : vector<1x288x4xf32> to vector<288x4xf32>
    %22 = arith.truncf %21 : vector<288x4xf32> to vector<288x4xbf16>
    %c0_18 = arith.constant 0 : index
    %c20_19 = arith.constant 20 : index
    %23 = vector.load %arg7[%c0_18, %c20_19] : memref<288x36xbf16, #tpu.memory_space<vmem>>, vector<288x4xbf16>
    tpu.vector_store %arg7[%c0_18, %c20_19], %22 {strides = array<i32>} : memref<288x36xbf16, #tpu.memory_space<vmem>>, vector<288x4xbf16>,
    %c0_20 = arith.constant 0 : index
    %c36 = arith.constant 36 : index
    %c0_21 = arith.constant 0 : index
    %24 = vector.load %arg3[%c0_20, %c36, %c0_21] : memref<1x342x4xf32, #tpu.memory_space<vmem>>, vector<1x288x4xf32>
    %25 = vector.shape_cast %24 : vector<1x288x4xf32> to vector<288x4xf32>
    %26 = arith.truncf %25 : vector<288x4xf32> to vector<288x4xbf16>
    %c0_22 = arith.constant 0 : index
    %c24 = arith.constant 24 : index
    %27 = vector.load %arg7[%c0_22, %c24] : memref<288x36xbf16, #tpu.memory_space<vmem>>, vector<288x4xbf16>
    tpu.vector_store %arg7[%c0_22, %c24], %26 {strides = array<i32>} : memref<288x36xbf16, #tpu.memory_space<vmem>>, vector<288x4xbf16>,
    %c0_23 = arith.constant 0 : index
    %c37 = arith.constant 37 : index
    %c0_24 = arith.constant 0 : index
    %28 = vector.load %arg3[%c0_23, %c37, %c0_24] : memref<1x342x4xf32, #tpu.memory_space<vmem>>, vector<1x288x4xf32>
    %29 = vector.shape_cast %28 : vector<1x288x4xf32> to vector<288x4xf32>
    %30 = arith.truncf %29 : vector<288x4xf32> to vector<288x4xbf16>
    %c0_25 = arith.constant 0 : index
    %c28 = arith.constant 28 : index
    %31 = vector.load %arg7[%c0_25, %c28] : memref<288x36xbf16, #tpu.memory_space<vmem>>, vector<288x4xbf16>
    tpu.vector_store %arg7[%c0_25, %c28], %30 {strides = array<i32>} : memref<288x36xbf16, #tpu.memory_space<vmem>>, vector<288x4xbf16>,
    %c0_26 = arith.constant 0 : index
    %c38 = arith.constant 38 : index
    %c0_27 = arith.constant 0 : index
    %32 = vector.load %arg3[%c0_26, %c38, %c0_27] : memref<1x342x4xf32, #tpu.memory_space<vmem>>, vector<1x288x4xf32>
    %33 = vector.shape_cast %32 : vector<1x288x4xf32> to vector<288x4xf32>
    %34 = arith.truncf %33 : vector<288x4xf32> to vector<288x4xbf16>
    %c0_28 = arith.constant 0 : index
    %c32 = arith.constant 32 : index
    %35 = vector.load %arg7[%c0_28, %c32] : memref<288x36xbf16, #tpu.memory_space<vmem>>, vector<288x4xbf16>
    tpu.vector_store %arg7[%c0_28, %c32], %34 {strides = array<i32>} : memref<288x36xbf16, #tpu.memory_space<vmem>>, vector<288x4xbf16>,
    %c0_29 = arith.constant 0 : index
    %c0_30 = arith.constant 0 : index
    %36 = vector.load %arg7[%c0_29, %c0_30] : memref<288x36xbf16, #tpu.memory_space<vmem>>, vector<288x36xbf16>
    %c0_31 = arith.constant 0 : index
    %c0_32 = arith.constant 0 : index
    %37 = vector.load %arg4[%c0_31, %c0_32] : memref<36x128xbf16, #tpu.memory_space<vmem>>, vector<36x128xbf16>
    %cst = arith.constant dense<0.000000e+00> : vector<288x128xf32>
    %38 = tpu.matmul %36, %37, %cst {dimension_numbers = #tpu.dot_dimension_numbers<[1], [0], [0], [1], [0, 0, 1, 1], [], []>} : vector<288x36xbf16>, vector<36x128xbf16>, vector<288x128xf32> -> vector<288x128xf32>
    %c0_33 = arith.constant 0 : index
    %c0_34 = arith.constant 0 : index
    %39 = vector.load %arg5[%c0_33, %c0_34] : memref<1x128xf32, #tpu.memory_space<vmem>>, vector<1x128xf32>
    %40 = vector.broadcast %39 : vector<1x128xf32> to vector<288x128xf32>
    %41 = arith.addf %38, %40 : vector<288x128xf32>
    %c0_35 = arith.constant 0 : index
    %c0_36 = arith.constant 0 : index
    %c0_37 = arith.constant 0 : index
    %42 = vector.load %arg6[%c0_35, %c0_36, %c0_37] : memref<1x288x128xf32, #tpu.memory_space<vmem>>, vector<1x288x128xf32>
    %43 = vector.shape_cast %42 : vector<1x288x128xf32> to vector<288x128xf32>
    %44 = vector.shape_cast %41 : vector<288x128xf32> to vector<1x288x128xf32>
    tpu.vector_store %arg6[%c0_35, %c0_36, %c0_37], %44 {strides = array<i32>} : memref<1x288x128xf32, #tpu.memory_space<vmem>>, vector<1x288x128xf32>,
    return
  }
  func.func @transform_0(%arg0: i32, %arg1: i32, %arg2: i32) -> (i32, i32, i32) {
    %c0_i32 = arith.constant 0 : i32
    %c0_i32_0 = arith.constant 0 : i32
    %c0_i32_1 = arith.constant 0 : i32
    return %arg0, %c0_i32, %c0_i32_0 : i32, i32, i32
  }
  func.func @transform_1(%arg0: i32, %arg1: i32, %arg2: i32) -> (i32, i32) {
    %c0_i32 = arith.constant 0 : i32
    %c0_i32_0 = arith.constant 0 : i32
    return %c0_i32, %arg1 : i32, i32
  }
  func.func @transform_2(%arg0: i32, %arg1: i32, %arg2: i32) -> (i32, i32) {
    %c0_i32 = arith.constant 0 : i32
    %c0_i32_0 = arith.constant 0 : i32
    return %c0_i32, %arg1 : i32, i32
  }
  func.func @transform_3(%arg0: i32, %arg1: i32, %arg2: i32) -> (i32, i32, i32) {
    %c0_i32 = arith.constant 0 : i32
    return %arg0, %arg2, %arg1 : i32, i32, i32
  }
}

module attributes {stable_mosaic.version = 11 : i64} {
  func.func @_group_lasso_kernel(%arg0: i32, %arg1: memref<32x128xf32, #tpu.memory_space<vmem>>, %arg2: memref<1xf32, #tpu.memory_space<smem>>) attributes {dimension_semantics = [#tpu.dimension_semantics<arbitrary>], iteration_bounds = array<i64: 1>, scalar_prefetch = 0 : i64, scratch_operands = 0 : i64, tpu.core_type = #tpu.core_type<tc>, window_params = [{transform_indices = @transform_0, window_bounds = array<i64: 32, 128>}, {transform_indices = @transform_1, window_bounds = array<i64: 1>}]} {
    %c0_i32 = arith.constant 0 : i32
    %0 = arith.cmpi eq, %arg0, %c0_i32 : i32
    %1 = arith.extui %0 : i1 to i32
    %c0_i32_0 = arith.constant 0 : i32
    %2 = arith.cmpi ne, %1, %c0_i32_0 : i32
    scf.if %2 {
      %cst_9 = arith.constant 0.000000e+00 : f32
      %c0_10 = arith.constant 0 : index
      %20 = memref.load %arg2[%c0_10] : memref<1xf32, #tpu.memory_space<smem>>
      memref.store %cst_9, %arg2[%c0_10] : memref<1xf32, #tpu.memory_space<smem>>
    } else {
    }
    %c0 = arith.constant 0 : index
    %c0_1 = arith.constant 0 : index
    %3 = vector.load %arg1[%c0, %c0_1] : memref<32x128xf32, #tpu.memory_space<vmem>>, vector<32x128xf32>
    %c0_2 = arith.constant 0 : index
    %c0_3 = arith.constant 0 : index
    %4 = vector.load %arg1[%c0_2, %c0_3] : memref<32x128xf32, #tpu.memory_space<vmem>>, vector<32x128xf32>
    %5 = arith.mulf %3, %4 : vector<32x128xf32>
    %cst = arith.constant 0.000000e+00 : f32
    %6 = vector.broadcast %cst : f32 to vector<1x128xf32>
    %cst_4 = arith.constant 0.000000e+00 : f32
    %7 = vector.broadcast %cst_4 : f32 to vector<1x128xf32>
    %cst_5 = arith.constant dense<0.000000e+00> : vector<128xf32>
    %8 = vector.multi_reduction <add>, %5, %cst_5 [0] : vector<32x128xf32> to vector<128xf32>
    %9 = vector.shape_cast %8 : vector<128xf32> to vector<1x128xf32>
    %10 = arith.addf %6, %9 : vector<1x128xf32>
    %11 = math.sqrt %10 : vector<1x128xf32>
    %12 = arith.addf %7, %11 : vector<1x128xf32>
    %c0_6 = arith.constant 0 : index
    %13 = memref.load %arg2[%c0_6] : memref<1xf32, #tpu.memory_space<smem>>
    %14 = vector.shape_cast %12 : vector<1x128xf32> to vector<1x1x128xf32>
    %cst_7 = arith.constant dense<0.000000e+00> : vector<1xf32>
    %15 = vector.multi_reduction <add>, %14, %cst_7 [1, 2] : vector<1x1x128xf32> to vector<1xf32>
    %16 = vector.shape_cast %15 : vector<1xf32> to vector<1x1x1xf32>
    %17 = vector.extract %16[0, 0, 0] : f32 from vector<1x1x1xf32>
    %18 = arith.addf %13, %17 : f32
    %c0_8 = arith.constant 0 : index
    %19 = memref.load %arg2[%c0_8] : memref<1xf32, #tpu.memory_space<smem>>
    memref.store %18, %arg2[%c0_8] : memref<1xf32, #tpu.memory_space<smem>>
    return
  }
  func.func @transform_0(%arg0: i32) -> (i32, i32) {
    %c0_i32 = arith.constant 0 : i32
    %c0_i32_0 = arith.constant 0 : i32
    return %c0_i32, %arg0 : i32, i32
  }
  func.func @transform_1(%arg0: i32) -> i32 {
    %c0_i32 = arith.constant 0 : i32
    %c0_i32_0 = arith.constant 0 : i32
    return %c0_i32 : i32
  }
}

</mosaic_0001>

<bundles_post_ra>
// kernel: pruned_conv_forward.2
= control target key start
LH: loop header
LB: loop body
LE: loop exit
PB: predicated region body
PF: predicated region fallthrough
CT: control target
= control target key end

     0   :  { %s122_s0 = inlined_call_operand.vmem [shape: f32[32,128], index: 0, kind: input, shape index: {}]   ;;  %s123_s1 = inlined_call_operand.hbm [shape: f32[1], index: 1, kind: output, shape index: {}]  }
   0x1   :  { %v15_v0 = vld [vmem:[%s122_s0] sm:$0xff]  ;;  %v16_v1 = vld [vmem:[%s122_s0 + $0x8] sm:$0xff]  ;;  %v17_v2 = vld [vmem:[%s122_s0 + $0x10] sm:$0xff] }
   0x2   :  { %v18_v3 = vld [vmem:[%s122_s0 + $0x18] sm:$0xff]  ;;  %v19_v4 = vmul.f32 %v15_v0, %v15_v0  ;;  %v20_v5 = vmul.f32 %v16_v1, %v16_v1  ;;  %v21_v6 = vmul.f32 %v17_v2, %v17_v2 }
   0x3   :  { %6 = vsyncpa [#allocation3], 0  ;;  %v22_v7 = vmul.f32 %v18_v3, %v18_v3  ;;  %vm47_vm2 = vcmask 1040384   ;;  %s66_s15 = sshll.u32 %s123_s1, 4  ;;  %s96_s17 = smov [#allocation2]   ;;  %s67_s15 = int_to_ptr.hbm [resolvable:$true] %s66_s15 }
   0x4   :  { %v23_v8 = vadd.f32 %v20_v5, %v19_v4 }
   0x6   :  { %v24_v9 = vadd.f32 %v23_v8, %v21_v6 }
   0x8   :  { %v25_v10 = vadd.f32 %v24_v9, %v22_v7 }
   0xa   :  { %v26_v11 = vrot.slane %v25_v10, 4 }
   0xc   :  { %v27_v12 = vadd.f32 %v26_v11, %v25_v10 }
   0xe   :  { %v28_v13 = vrot.slane %v27_v12, 2 }
  0x10   :  { %v29_v14 = vadd.f32 %v28_v13, %v27_v12 }
  0x12   :  { %v30_v15 = vrot.slane %v29_v14, 1 }
  0x14   :  { %v31_v16 = vadd.f32 %v30_v15, %v29_v14 }
  0x16   :  { %80 = vrsqrt.f32 %v31_v16  ;;  %vm40_vm0 = vcmp.eq.f32.partialorder %v31_v16, inf  ;;  %v43_v23 = vand.u32 2147483648, %v31_v16  ;;  %vm42_vm1 = vcmp.eq.f32.partialorder %v31_v16, 0.0 }
  0x1c   :  { %v81_v17 = vpop.eup %80 }
  0x1d   :  { %v34_v18 = vmul.f32 %v81_v17, %v31_v16 }
  0x1f   :  { %v35_v19 = vmul.f32 %v81_v17, %v34_v18 }
  0x21   :  { %v36_v20 = vmul.f32 0.5, %v35_v19 }
  0x23   :  { %v37_v21 = vsub.f32 1.5, %v36_v20 }
  0x25   :  { %v38_v22 = vmul.f32 %v81_v17, %v37_v21 }
  0x27   :  { %v39_v24 = vmul.f32 %v38_v22, %v31_v16 }
  0x29   :  { %v41_v25 = vsel %vm40_vm0, %v31_v16, %v39_v24 }
  0x2a   :  { %v44_v26 = vsel %vm42_vm1, %v43_v23, %v41_v25 }
  0x2b   :  { %v48_v27 = vsel %vm47_vm2, %v44_v26, 0.0 }
  0x2c   :  { %49 = vadd.xlane.f32.xlu0 %v48_v27 }
  0x9f   :  { %v50_v28 = vpop.xlane.xlu0 %49 }
  0xa0   :  { %v51_v29 = vrot.slane %v50_v28, 4 }
  0xa2   :  { %v52_v30 = vadd.f32 %v51_v29, %v50_v28 }
  0xa4   :  { %v53_v31 = vrot.slane %v52_v30, 2 }
  0xa6   :  { %v54_v32 = vadd.f32 %v53_v31, %v52_v30 }
  0xa8   :  { %v55_v33 = vrot.slane %v54_v32, 1 }
  0xaa   :  { %v56_v34 = vadd.f32 %v55_v33, %v54_v32 }
  0xac   :  { %76 = vpush %v56_v34 }
  0xdd   :  { %s77_s16 = spop %76 }
  0xde   :  { %60 = sst [smem:[#allocation2]] %s77_s16 }
  0xdf   :  { %69 = dma.smem_to_hbm %s96_s17, 16, %s67_s15, [#allocation3]  }
  0xe0   :  { %94 = dma.done.wait [#allocation3], 16  }
  0xe1   :  { %95 = vsyncadd [#allocation3], 4294967280 }
  0xe2   :  { %74 = sfence }
  0xe3   :  { %75 = vsyncpa [#allocation3], 1 }

// kernel: pruned_conv_forward.3
= control target key start
LH: loop header
LB: loop body
LE: loop exit
PB: predicated region body
PF: predicated region fallthrough
CT: control target
= control target key end

     0   :  { %s3064_s12 = smov 0   ;;  %s3066_s13 = smov 0   ;;  %s4346_s0 = inlined_call_operand.vmem [shape: f32[2,342,4], index: 0, kind: input, shape index: {}]   ;;  %s4347_s1 = inlined_call_operand.vmem [shape: bf16[36,128], index: 1, kind: input, shape index: {}]   ;;  %s4348_s2 = inlined_call_operand.vmem [shape: f32[1,128], index: 2, kind: input, shape index: {}]   ;;  %s4349_s3 = inlined_call_operand.vmem [shape: f32[2,288,128], index: 3, kind: output, shape index: {}]  }
   0x1   :  { %s3068_s14 = smov 0  }
   0x2 LB: > { %s32_s15 = sadd.s32 1, %s3030_s13  ;;  %p2845_p0 = scmp.ge.s32.totalorder %s3034_s14, 1  ;;  %s3034_s14 = sphi %s3068_s14, %s13_s14   ;;  %s3030_s13 = sphi %s3066_s13, %s4351_s13   ;;  %s3026_s12 = sphi %s3064_s12, %s4350_s12  }
   0x3   : > { %p34_p1 = scmp.ge.s32.totalorder %s32_s15, 2  ;;  %p177_p2 = scmp.lt.s32.totalorder %s3034_s14, 3 }
   0x5   : > { %s4353_s15 = smov (%p34_p1, %s32_s15), 0  ;;  %p178_p3 = pnand %p2845_p0, %p177_p2 }
   0x6   : > { %p215_p4 = scmp.lt.s32.totalorder (!%p178_p3), %s3026_s12, 1  ;;  %s3036_s20 = smov (!%p178_p3), 4  }
   0x7   : > { %181 = sbr.rel (%p178_p3) target bundleno = 1040 (0x410), region = 32  ;;  %s3037_s21 = smov (!%p178_p3), 8  }
   0x8   : > { %s3038_s22 = smov (!%p178_p3), 12   ;;  %s3039_s23 = smov (!%p178_p3), 16  }
   0x9   : > { %s3040_s24 = smov (!%p178_p3), 20   ;;  %s3041_s25 = smov (!%p178_p3), 24  }
   0xa   : > { %s3042_s26 = smov (!%p178_p3), 28   ;;  %s3043_s27 = smov (!%p178_p3), 32  }
   0xc   : > { %s4355_s12 = smov (!%p215_p4, %s3026_s12), 1  ;;  %vm313_vm0 = vcmask 27648   ;;  %vm566_vm1 = vcmask 60448   ;;  %vm819_vm2 = vcmask 93248   ;;  %vm1072_vm3 = vcmask 126048  }
   0xd   : > { %s2977_s16 = smul.u32 344, %s4355_s12  ;;  %vm1325_vm4 = vcmask 158848   ;;  %vm1578_vm5 = vcmask 191648   ;;  %vm1831_vm6 = vcmask 224448   ;;  %vm2579_vm7 = vcmask 1041408  }
   0xe   : > { %vm2084_vm8 = vcmask 257248   ;;  %vm2337_vm9 = vcmask 290048   ;;  %vm2524_vm10 = vcmask 293888   ;;  %s2978_s7 = smul.u32 288, %s4355_s12 }
   0xf   : > { %s3088_s19 = scalar_lea.vmem %s4346_s0, %s2977_s16 }
  0x10   : > { %v352_v0 = vld [vmem:[%s3088_s19 + $0x11] sm:$0xff]  ;;  %v350_v1 = vld [vmem:[%s3088_s19 + $0x1] sm:$0xff]  ;;  %v353_v6 = vld [vmem:[%s3088_s19 + $0x19] sm:$0xff]  ;;  %s4227_s16 = scalar_lea.vmem %s4349_s3, %s2978_s7 }
  0x11   : > { %v388_v2 = vpack.c.bf16 %v352_v0, %v352_v0  ;;  %v386_v3 = vpack.c.bf16 %v350_v1, %v350_v1  ;;  %v354_v4 = vld [vmem:[%s3088_s19 + $0x21] sm:$0xff]  ;;  %v351_v7 = vld [vmem:[%s3088_s19 + $0x9] sm:$0xff]  ;;  %v389_v9 = vpack.c.bf16 %v353_v6, %v353_v6  ;;  %v357_v12 = vld [vmem:[%s3088_s19 + $0x39] sm:$0xff] }
  0x12   : > { %v390_v5 = vpack.c.bf16 %v354_v4, %v354_v4  ;;  %v355_v8 = vld [vmem:[%s3088_s19 + $0x29] sm:$0xff]  ;;  %v387_v10 = vpack.c.bf16 %v351_v7, %v351_v7  ;;  %v356_v13 = vld [vmem:[%s3088_s19 + $0x31] sm:$0xff]  ;;  %v358_v14 = vld [vmem:[%s3088_s19 + $0x41] sm:$0xff]  ;;  %v393_v15 = vpack.c.bf16 %v357_v12, %v357_v12 }
  0x13   : > { %462 = vrot.lane.b32.xlu1 %v388_v2, %s3036_s20  ;;  %458 = vrot.lane.b32.xlu0 %v386_v3, %s3036_s20  ;;  %v391_v11 = vpack.c.bf16 %v355_v8, %v355_v8  ;;  %v392_v16 = vpack.c.bf16 %v356_v13, %v356_v13  ;;  %v394_v17 = vpack.c.bf16 %v358_v14, %v358_v14  ;;  %v360_v18 = vld [vmem:[%s3088_s19 + $0x51] sm:$0xff]  ;;  %v359_v19 = vld [vmem:[%s3088_s19 + $0x49] sm:$0xff] }
  0x14   : > { %466 = vrot.lane.b32.xlu2 %v390_v5, %s3036_s20  ;;  %v361_v20 = vld [vmem:[%s3088_s19 + $0x59] sm:$0xff]  ;;  %v396_v21 = vpack.c.bf16 %v360_v18, %v360_v18  ;;  %v395_v22 = vpack.c.bf16 %v359_v19, %v359_v19  ;;  %v363_v24 = vld [vmem:[%s3088_s19 + $0x69] sm:$0xff]  ;;  %v362_v25 = vld [vmem:[%s3088_s19 + $0x61] sm:$0xff] }
  0x15   : > { %v397_v23 = vpack.c.bf16 %v361_v20, %v361_v20  ;;  %v364_v26 = vld [vmem:[%s3088_s19 + $0x71] sm:$0xff]  ;;  %v399_v27 = vpack.c.bf16 %v363_v24, %v363_v24  ;;  %v398_v28 = vpack.c.bf16 %v362_v25, %v362_v25  ;;  %v366_v30 = vld [vmem:[%s3088_s19 + $0x81] sm:$0xff]  ;;  %v365_v31 = vld [vmem:[%s3088_s19 + $0x79] sm:$0xff] }
  0x16   : > { %v400_v29 = vpack.c.bf16 %v364_v26, %v364_v26  ;;  %v367_v32 = vld [vmem:[%s3088_s19 + $0x89] sm:$0xff]  ;;  %v402_v33 = vpack.c.bf16 %v366_v30, %v366_v30  ;;  %v401_v34 = vpack.c.bf16 %v365_v31, %v365_v31  ;;  %v369_v36 = vld [vmem:[%s3088_s19 + $0x99] sm:$0xff]  ;;  %v368_v37 = vld [vmem:[%s3088_s19 + $0x91] sm:$0xff] }
  0x17   : > { %v403_v35 = vpack.c.bf16 %v367_v32, %v367_v32  ;;  %v370_v38 = vld [vmem:[%s3088_s19 + $0xa1] sm:$0xff]  ;;  %v405_v39 = vpack.c.bf16 %v369_v36, %v369_v36  ;;  %v404_v40 = vpack.c.bf16 %v368_v37, %v368_v37  ;;  %v372_v42 = vld [vmem:[%s3088_s19 + $0xb1] sm:$0xff]  ;;  %v371_v43 = vld [vmem:[%s3088_s19 + $0xa9] sm:$0xff] }
  0x18   : > { %v406_v41 = vpack.c.bf16 %v370_v38, %v370_v38  ;;  %v373_v44 = vld [vmem:[%s3088_s19 + $0xb9] sm:$0xff]  ;;  %v408_v45 = vpack.c.bf16 %v372_v42, %v372_v42  ;;  %v407_v46 = vpack.c.bf16 %v371_v43, %v371_v43  ;;  %v375_v48 = vld [vmem:[%s3088_s19 + $0xc9] sm:$0xff]  ;;  %v374_v49 = vld [vmem:[%s3088_s19 + $0xc1] sm:$0xff] }
  0x19   : > { %v409_v47 = vpack.c.bf16 %v373_v44, %v373_v44  ;;  %v376_v50 = vld [vmem:[%s3088_s19 + $0xd1] sm:$0xff]  ;;  %v411_v51 = vpack.c.bf16 %v375_v48, %v375_v48  ;;  %v410_v52 = vpack.c.bf16 %v374_v49, %v374_v49  ;;  %v378_v54 = vld [vmem:[%s3088_s19 + $0xe1] sm:$0xff]  ;;  %v377_v55 = vld [vmem:[%s3088_s19 + $0xd9] sm:$0xff] }
  0x1a   : > { %v412_v53 = vpack.c.bf16 %v376_v50, %v376_v50  ;;  %v379_v56 = vld [vmem:[%s3088_s19 + $0xe9] sm:$0xff]  ;;  %v414_v57 = vpack.c.bf16 %v378_v54, %v378_v54  ;;  %v413_v58 = vpack.c.bf16 %v377_v55, %v377_v55  ;;  %v381_v60 = vld [vmem:[%s3088_s19 + $0xf9] sm:$0xff]  ;;  %v380_v61 = vld [vmem:[%s3088_s19 + $0xf1] sm:$0xff] }
  0x1b   : > { %464 = vrot.lane.b32.xlu1 %v389_v9, %s3036_s20  ;;  %460 = vrot.lane.b32.xlu0 %v387_v10, %s3036_s20  ;;  %v415_v59 = vpack.c.bf16 %v379_v56, %v379_v56  ;;  %v382_v62 = vld [vmem:[%s3088_s19 + $0x101] sm:$0xff]  ;;  %v417_v63 = vpack.c.bf16 %v381_v60, %v381_v60  ;;  %v416_v0 = vpack.c.bf16 %v380_v61, %v380_v61  ;;  %v243_v3 = vld [vmem:[%s3088_s19 + $0x10] sm:$0xff] }
  0x1c   : > { %468 = vrot.lane.b32.xlu2 %v391_v11, %s3036_s20  ;;  %v418_v1 = vpack.c.bf16 %v382_v62, %v382_v62  ;;  %v245_v2 = vld [vmem:[%s3088_s19 + $0x20] sm:$0xff]  ;;  %v279_v6 = vpack.c.bf16 %v243_v3, %v243_v3  ;;  %v384_v7 = vld [vmem:[%s3088_s19 + $0x111] sm:$0xff]  ;;  %v383_v8 = vld [vmem:[%s3088_s19 + $0x109] sm:$0xff] }
  0x1d   : > { %v241_v4 = vld [vmem:[%s3088_s19] sm:$0xff]  ;;  %v281_v5 = vpack.c.bf16 %v245_v2, %v245_v2  ;;  %v420_v11 = vpack.c.bf16 %v384_v7, %v384_v7  ;;  %v419_v12 = vpack.c.bf16 %v383_v8, %v383_v8  ;;  %v246_v14 = vld [vmem:[%s3088_s19 + $0x28] sm:$0xff]  ;;  %v609_v43 = vld [vmem:[%s3088_s19 + $0x32] sm:$0xff] }
  0x1e   : > { %v277_v9 = vpack.c.bf16 %v241_v4, %v241_v4  ;;  %v385_v10 = vld [vmem:[%s3088_s19 + $0x119] sm:$0xff]  ;;  %316 = vst.msk [vmem:[#allocation2 + $0x8] sm:$0xf] %vm313_vm0, %v279_v6  ;;  %v282_v18 = vpack.c.bf16 %v246_v14, %v246_v14  ;;  %v242_v20 = vld [vmem:[%s3088_s19 + $0x8] sm:$0xff]  ;;  %v3215_v50 = vpack.c.bf16 %v609_v43, %v609_v43 }
  0x1f   : > { %318 = vst.msk [vmem:[#allocation2 + $0x10] sm:$0xf] %vm313_vm0, %v281_v5  ;;  %v421_v13 = vpack.c.bf16 %v385_v10, %v385_v10  ;;  %v606_v30 = vld [vmem:[%s3088_s19 + $0x1a] sm:$0xff]  ;;  %v611_v48 = vld [vmem:[%s3088_s19 + $0x42] sm:$0xff]  ;;  %v613_v55 = vld [vmem:[%s3088_s19 + $0x52] sm:$0xff] }
  0x20   : > { %314 = vst.msk [vmem:[#allocation2] sm:$0xf] %vm313_vm0, %v277_v9  ;;  %v3193_v37 = vpack.c.bf16 %v606_v30, %v606_v30  ;;  %v610_v42 = vld [vmem:[%s3088_s19 + $0x3a] sm:$0xff]  ;;  %v254_v54 = vld [vmem:[%s3088_s19 + $0x68] sm:$0xff] }
  0x21   : > { %319 = vst.msk [vmem:[#allocation2 + $0x14] sm:$0xf] %vm313_vm0, %v282_v18  ;;  %v3213_v49 = vpack.c.bf16 %v610_v42, %v610_v42  ;;  %v612_v56 = vld [vmem:[%s3088_s19 + $0x4a] sm:$0xff]  ;;  %v614_v61 = vld [vmem:[%s3088_s19 + $0x5a] sm:$0xff]  ;;  %v290_v62 = vpack.c.bf16 %v254_v54, %v254_v54  ;;  %v615_v7 = vld [vmem:[%s3088_s19 + $0x62] sm:$0xff] }
  0x22   : > { %v3241_v3 = vpack.c.bf16 %v614_v61, %v614_v61  ;;  %v258_v4 = vld [vmem:[%s3088_s19 + $0x88] sm:$0xff]  ;;  %v257_v5 = vld [vmem:[%s3088_s19 + $0x80] sm:$0xff]  ;;  %v256_v8 = vld [vmem:[%s3088_s19 + $0x78] sm:$0xff] }
  0x23   : > { %472 = vrot.lane.b32.xlu1 %v393_v15, %s3036_s20  ;;  %470 = vrot.lane.b32.xlu0 %v392_v16, %s3036_s20  ;;  %v244_v15 = vld [vmem:[%s3088_s19 + $0x18] sm:$0xff]  ;;  %v604_v16 = vld [vmem:[%s3088_s19 + $0xa] sm:$0xff]  ;;  %327 = vst.msk [vmem:[#allocation2 + $0x34] sm:$0xf] %vm313_vm0, %v290_v62 }
  0x24   : > { %474 = vrot.lane.b32.xlu2 %v394_v17, %s3036_s20  ;;  %v603_v17 = vld [vmem:[%s3088_s19 + $0x2] sm:$0xff]  ;;  %v280_v19 = vpack.c.bf16 %v244_v15, %v244_v15  ;;  %v616_v6 = vld [vmem:[%s3088_s19 + $0x6a] sm:$0xff]  ;;  %v3262_v15 = vpack.c.bf16 %v615_v7, %v615_v7 }
  0x25   : > { %v639_v24 = vpack.c.bf16 %v603_v17, %v603_v17  ;;  %v3260_v14 = vpack.c.bf16 %v616_v6, %v616_v6  ;;  %v292_v17 = vpack.c.bf16 %v256_v8, %v256_v8  ;;  %v262_v42 = vld [vmem:[%s3088_s19 + $0xa8] sm:$0xff] }
  0x26   : > { %317 = vst.msk [vmem:[#allocation2 + $0xc] sm:$0xf] %vm313_vm0, %v280_v19  ;;  %v261_v19 = vld [vmem:[%s3088_s19 + $0xa0] sm:$0xff]  ;;  %v298_v54 = vpack.c.bf16 %v262_v42, %v262_v42 }
  0x27   : > { %329 = vst.msk [vmem:[#allocation2 + $0x3c] sm:$0xf] %vm313_vm0, %v292_v17 }
  0x28   : > { %335 = vst.msk [vmem:[#allocation2 + $0x54] sm:$0xf] %vm313_vm0, %v298_v54 }
  0x2b   : > { %478 = vrot.lane.b32.xlu1 %v396_v21, %s3036_s20  ;;  %476 = vrot.lane.b32.xlu0 %v395_v22, %s3036_s20  ;;  %v278_v21 = vpack.c.bf16 %v242_v20, %v242_v20  ;;  %v605_v22 = vld [vmem:[%s3088_s19 + $0x12] sm:$0xff] }
  0x2c   : > { %480 = vrot.lane.b32.xlu2 %v397_v23, %s3036_s20  ;;  %v640_v23 = vpack.c.bf16 %v604_v16, %v604_v16  ;;  %v3177_v26 = vpack.c.bf16 %v605_v22, %v605_v22  ;;  %v260_v20 = vld [vmem:[%s3088_s19 + $0x98] sm:$0xff] }
  0x2d   : > { %315 = vst.msk [vmem:[#allocation2 + $0x4] sm:$0xf] %vm313_vm0, %v278_v21  ;;  %v619_v21 = vld [vmem:[%s3088_s19 + $0x82] sm:$0xff]  ;;  %v618_v22 = vld [vmem:[%s3088_s19 + $0x7a] sm:$0xff] }
  0x2e   : > { %v3284_v30 = vpack.c.bf16 %v619_v21, %v619_v21  ;;  %v629_v21 = vld [vmem:[%s3088_s19 + $0xd2] sm:$0xff] }
  0x33   : > { %484 = vrot.lane.b32.xlu1 %v399_v27, %s3036_s20  ;;  %482 = vrot.lane.b32.xlu0 %v398_v28, %s3036_s20  ;;  %v249_v27 = vld [vmem:[%s3088_s19 + $0x40] sm:$0xff]  ;;  %v248_v28 = vld [vmem:[%s3088_s19 + $0x38] sm:$0xff] }
  0x34   : > { %486 = vrot.lane.b32.xlu2 %v400_v29, %s3036_s20  ;;  %v607_v29 = vld [vmem:[%s3088_s19 + $0x22] sm:$0xff]  ;;  %v285_v31 = vpack.c.bf16 %v249_v27, %v249_v27  ;;  %v284_v32 = vpack.c.bf16 %v248_v28, %v248_v28  ;;  %v297_v27 = vpack.c.bf16 %v261_v19, %v261_v19  ;;  %v620_v28 = vld [vmem:[%s3088_s19 + $0x8a] sm:$0xff] }
  0x35   : > { %v3191_v36 = vpack.c.bf16 %v607_v29, %v607_v29  ;;  %v296_v29 = vpack.c.bf16 %v260_v20, %v260_v20 }
  0x36   : > { %322 = vst.msk [vmem:[#allocation2 + $0x20] sm:$0xf] %vm313_vm0, %v285_v31  ;;  %v3286_v31 = vpack.c.bf16 %v618_v22, %v618_v22 }
  0x37   : > { %321 = vst.msk [vmem:[#allocation2 + $0x1c] sm:$0xf] %vm313_vm0, %v284_v32 }
  0x38   : > { %334 = vst.msk [vmem:[#allocation2 + $0x50] sm:$0xf] %vm313_vm0, %v297_v27 }
  0x39   : > { %333 = vst.msk [vmem:[#allocation2 + $0x4c] sm:$0xf] %vm313_vm0, %v296_v29  ;;  %v273_v29 = vld [vmem:[%s3088_s19 + $0x100] sm:$0xff] }
  0x3a   : > { %v309_v42 = vpack.c.bf16 %v273_v29, %v273_v29 }
  0x3b   : > { %490 = vrot.lane.b32.xlu1 %v402_v33, %s3036_s20  ;;  %488 = vrot.lane.b32.xlu0 %v401_v34, %s3036_s20  ;;  %v247_v33 = vld [vmem:[%s3088_s19 + $0x30] sm:$0xff] }
  0x3c   : > { %492 = vrot.lane.b32.xlu2 %v403_v35, %s3036_s20  ;;  %v283_v34 = vpack.c.bf16 %v247_v33, %v247_v33  ;;  %v608_v35 = vld [vmem:[%s3088_s19 + $0x2a] sm:$0xff]  ;;  %346 = vst.msk [vmem:[#allocation2 + $0x80] sm:$0xf] %vm313_vm0, %v309_v42 }
  0x3e   : > { %320 = vst.msk [vmem:[#allocation2 + $0x18] sm:$0xf] %vm313_vm0, %v283_v34  ;;  %v3289_v34 = vpack.c.bf16 %v620_v28, %v620_v28  ;;  %v3361_v28 = vpack.c.bf16 %v629_v21, %v629_v21 }
  0x43   : > { %496 = vrot.lane.b32.xlu1 %v405_v39, %s3036_s20  ;;  %494 = vrot.lane.b32.xlu0 %v404_v40, %s3036_s20  ;;  %v3197_v39 = vpack.c.bf16 %v608_v35, %v608_v35  ;;  %v252_v40 = vld [vmem:[%s3088_s19 + $0x58] sm:$0xff] }
  0x44   : > { %498 = vrot.lane.b32.xlu2 %v406_v41, %s3036_s20  ;;  %v251_v41 = vld [vmem:[%s3088_s19 + $0x50] sm:$0xff]  ;;  %v288_v44 = vpack.c.bf16 %v252_v40, %v252_v40  ;;  %v264_v35 = vld [vmem:[%s3088_s19 + $0xb8] sm:$0xff] }
  0x45   : > { %v622_v40 = vld [vmem:[%s3088_s19 + $0x9a] sm:$0xff] }
  0x46   : > { %325 = vst.msk [vmem:[#allocation2 + $0x2c] sm:$0xf] %vm313_vm0, %v288_v44 }
  0x4b   : > { %502 = vrot.lane.b32.xlu1 %v408_v45, %s3036_s20  ;;  %500 = vrot.lane.b32.xlu0 %v407_v46, %s3036_s20  ;;  %v287_v45 = vpack.c.bf16 %v251_v41, %v251_v41  ;;  %v250_v46 = vld [vmem:[%s3088_s19 + $0x48] sm:$0xff]  ;;  %v621_v41 = vld [vmem:[%s3088_s19 + $0x92] sm:$0xff] }
  0x4c   : > { %504 = vrot.lane.b32.xlu2 %v409_v47, %s3036_s20  ;;  %v286_v47 = vpack.c.bf16 %v250_v46, %v250_v46  ;;  %v623_v46 = vld [vmem:[%s3088_s19 + $0xa2] sm:$0xff] }
  0x4d   : > { %324 = vst.msk [vmem:[#allocation2 + $0x28] sm:$0xf] %vm313_vm0, %v287_v45  ;;  %v300_v45 = vpack.c.bf16 %v264_v35, %v264_v35  ;;  %v630_v35 = vld [vmem:[%s3088_s19 + $0xda] sm:$0xff] }
  0x4e   : > { %323 = vst.msk [vmem:[#allocation2 + $0x24] sm:$0xf] %vm313_vm0, %v286_v47 }
  0x4f   : > { %337 = vst.msk [vmem:[#allocation2 + $0x5c] sm:$0xf] %vm313_vm0, %v300_v45 }
  0x53   : > { %508 = vrot.lane.b32.xlu1 %v411_v51, %s3036_s20  ;;  %506 = vrot.lane.b32.xlu0 %v410_v52, %s3036_s20  ;;  %v3219_v52 = vpack.c.bf16 %v611_v48, %v611_v48  ;;  %v3308_v48 = vpack.c.bf16 %v622_v40, %v622_v40 }
  0x54   : > { %510 = vrot.lane.b32.xlu2 %v412_v53, %s3036_s20  ;;  %v255_v53 = vld [vmem:[%s3088_s19 + $0x70] sm:$0xff] }
  0x55   : > { %v291_v60 = vpack.c.bf16 %v255_v53, %v255_v53 }
  0x57   : > { %328 = vst.msk [vmem:[#allocation2 + $0x38] sm:$0xf] %vm313_vm0, %v291_v60  ;;  %v265_v60 = vld [vmem:[%s3088_s19 + $0xc0] sm:$0xff] }
  0x58   : > { %v301_v8 = vpack.c.bf16 %v265_v60, %v265_v60  ;;  %v274_v60 = vld [vmem:[%s3088_s19 + $0x108] sm:$0xff] }
  0x5a   : > { %338 = vst.msk [vmem:[#allocation2 + $0x60] sm:$0xf] %vm313_vm0, %v301_v8 }
  0x5b   : > { %514 = vrot.lane.b32.xlu1 %v414_v57, %s3036_s20  ;;  %512 = vrot.lane.b32.xlu0 %v413_v58, %s3036_s20  ;;  %v253_v57 = vld [vmem:[%s3088_s19 + $0x60] sm:$0xff] }
  0x5c   : > { %516 = vrot.lane.b32.xlu2 %v415_v59, %s3036_s20  ;;  %v289_v2 = vpack.c.bf16 %v253_v57, %v253_v57  ;;  %v266_v57 = vld [vmem:[%s3088_s19 + $0xc8] sm:$0xff] }
  0x5e   : > { %326 = vst.msk [vmem:[#allocation2 + $0x30] sm:$0xf] %vm313_vm0, %v289_v2  ;;  %v626_v2 = vld [vmem:[%s3088_s19 + $0xba] sm:$0xff] }
  0x63   : > { %520 = vrot.lane.b32.xlu1 %v417_v63, %s3036_s20  ;;  %518 = vrot.lane.b32.xlu0 %v416_v0, %s3036_s20  ;;  %v3236_v63 = vpack.c.bf16 %v613_v55, %v613_v55  ;;  %v3238_v0 = vpack.c.bf16 %v612_v56, %v612_v56  ;;  %v3313_v55 = vpack.c.bf16 %v623_v46, %v623_v46  ;;  %v267_v56 = vld [vmem:[%s3088_s19 + $0xd0] sm:$0xff] }
  0x64   : > { %522 = vrot.lane.b32.xlu2 %v418_v1, %s3036_s20  ;;  %v3382_v46 = vpack.c.bf16 %v630_v35, %v630_v35 }
  0x6b   : > { %526 = vrot.lane.b32.xlu1 %v420_v11, %s3036_s20  ;;  %524 = vrot.lane.b32.xlu0 %v419_v12, %s3036_s20  ;;  %v294_v11 = vpack.c.bf16 %v258_v4, %v258_v4  ;;  %v617_v12 = vld [vmem:[%s3088_s19 + $0x72] sm:$0xff]  ;;  %v302_v4 = vpack.c.bf16 %v266_v57, %v266_v57 }
  0x6c   : > { %528 = vrot.lane.b32.xlu2 %v421_v13, %s3036_s20  ;;  %v293_v13 = vpack.c.bf16 %v257_v5, %v257_v5  ;;  %v3265_v18 = vpack.c.bf16 %v617_v12, %v617_v12  ;;  %v628_v12 = vld [vmem:[%s3088_s19 + $0xca] sm:$0xff] }
  0x6d   : > { %331 = vst.msk [vmem:[#allocation2 + $0x44] sm:$0xf] %vm313_vm0, %v294_v11  ;;  %v269_v11 = vld [vmem:[%s3088_s19 + $0xe0] sm:$0xff]  ;;  %v275_v57 = vld [vmem:[%s3088_s19 + $0x110] sm:$0xff] }
  0x6e   : > { %v467_v25 = vpop.permute.xlu2 %466  ;;  %330 = vst.msk [vmem:[#allocation2 + $0x40] sm:$0xf] %vm313_vm0, %v293_v13  ;;  %v627_v13 = vld [vmem:[%s3088_s19 + $0xc2] sm:$0xff]  ;;  %v305_v22 = vpack.c.bf16 %v269_v11, %v269_v11  ;;  %v310_v11 = vpack.c.bf16 %v274_v60, %v274_v60 }
  0x6f   : > { %571 = vst.msk [vmem:[#allocation2 + $0x10] sm:$0xf] %vm566_vm1, %v467_v25  ;;  %v1111_v60 = vld [vmem:[%s3088_s19 + $0x23] sm:$0xff] }
  0x70   : > { %339 = vst.msk [vmem:[#allocation2 + $0x64] sm:$0xf] %vm313_vm0, %v302_v4  ;;  %v311_v4 = vpack.c.bf16 %v275_v57, %v275_v57  ;;  %v1109_v57 = vld [vmem:[%s3088_s19 + $0x13] sm:$0xff] }
  0x71   : > { %342 = vst.msk [vmem:[#allocation2 + $0x70] sm:$0xf] %vm313_vm0, %v305_v22 }
  0x72   : > { %348 = vst.msk [vmem:[#allocation2 + $0x88] sm:$0xf] %vm313_vm0, %v311_v4  ;;  %v1113_v4 = vld [vmem:[%s3088_s19 + $0x33] sm:$0xff] }
  0x73   : > { %713 = vrot.lane.b32.xlu1 %v640_v23, %s3037_s21  ;;  %711 = vrot.lane.b32.xlu0 %v639_v24, %s3037_s21  ;;  %v259_v23 = vld [vmem:[%s3088_s19 + $0x90] sm:$0xff]  ;;  %347 = vst.msk [vmem:[#allocation2 + $0x84] sm:$0xf] %vm313_vm0, %v310_v11  ;;  %v1114_v11 = vld [vmem:[%s3088_s19 + $0x3b] sm:$0xff] }
  0x74   : > { %715 = vrot.lane.b32.xlu2 %v3177_v26, %s3037_s21  ;;  %v295_v33 = vpack.c.bf16 %v259_v23, %v259_v23  ;;  %v3356_v23 = vpack.c.bf16 %v628_v12, %v628_v12 }
  0x76   : > { %v469_v38 = vpop.permute.xlu2 %468  ;;  %332 = vst.msk [vmem:[#allocation2 + $0x48] sm:$0xf] %vm313_vm0, %v295_v33  ;;  %v631_v33 = vld [vmem:[%s3088_s19 + $0xe2] sm:$0xff] }
  0x77   : > { %572 = vst.msk [vmem:[#allocation2 + $0x14] sm:$0xf] %vm566_vm1, %v469_v38  ;;  %v263_v38 = vld [vmem:[%s3088_s19 + $0xb0] sm:$0xff]  ;;  %v3380_v45 = vpack.c.bf16 %v631_v33, %v631_v33 }
  0x78   : > { %v299_v47 = vpack.c.bf16 %v263_v38, %v263_v38  ;;  %v271_v38 = vld [vmem:[%s3088_s19 + $0xf0] sm:$0xff] }
  0x7a   : > { %336 = vst.msk [vmem:[#allocation2 + $0x58] sm:$0xf] %vm313_vm0, %v299_v47 }
  0x7b   : > { %719 = vrot.lane.b32.xlu1 %v3191_v36, %s3037_s21  ;;  %717 = vrot.lane.b32.xlu0 %v3193_v37, %s3037_s21 }
  0x7c   : > { %721 = vrot.lane.b32.xlu2 %v3197_v39, %s3037_s21 }
  0x7e   : > { %v475_v51 = vpop.permute.xlu2 %474 }
  0x7f   : > { %575 = vst.msk [vmem:[#allocation2 + $0x20] sm:$0xf] %vm566_vm1, %v475_v51  ;;  %v3310_v51 = vpack.c.bf16 %v621_v41, %v621_v41 }
  0x83   : > { %725 = vrot.lane.b32.xlu1 %v3213_v49, %s3037_s21  ;;  %723 = vrot.lane.b32.xlu0 %v3215_v50, %s3037_s21 }
  0x84   : > { %727 = vrot.lane.b32.xlu2 %v3219_v52, %s3037_s21 }
  0x85   : > { %v463_v58 = vpop.permute.xlu1 %462  ;;  %v459_v59 = vpop.permute.xlu0 %458 }
  0x86   : > { %569 = vst.msk [vmem:[#allocation2 + $0x8] sm:$0xf] %vm566_vm1, %v463_v58  ;;  %v481_v1 = vpop.permute.xlu2 %480  ;;  %v625_v58 = vld [vmem:[%s3088_s19 + $0xb2] sm:$0xff] }
  0x87   : > { %567 = vst.msk [vmem:[#allocation2] sm:$0xf] %vm566_vm1, %v459_v59  ;;  %v624_v59 = vld [vmem:[%s3088_s19 + $0xaa] sm:$0xff]  ;;  %v3332_v5 = vpack.c.bf16 %v625_v58, %v625_v58  ;;  %v634_v58 = vld [vmem:[%s3088_s19 + $0xfa] sm:$0xff] }
  0x88   : > { %578 = vst.msk [vmem:[#allocation2 + $0x2c] sm:$0xf] %vm566_vm1, %v481_v1  ;;  %v303_v1 = vpack.c.bf16 %v267_v56, %v267_v56  ;;  %v3334_v6 = vpack.c.bf16 %v624_v59, %v624_v59  ;;  %v276_v56 = vld [vmem:[%s3088_s19 + $0x118] sm:$0xff] }
  0x89   : > { %v633_v59 = vld [vmem:[%s3088_s19 + $0xf2] sm:$0xff] }
  0x8a   : > { %340 = vst.msk [vmem:[#allocation2 + $0x68] sm:$0xf] %vm313_vm0, %v303_v1  ;;  %v312_v1 = vpack.c.bf16 %v276_v56, %v276_v56  ;;  %v3406_v8 = vpack.c.bf16 %v633_v59, %v633_v59  ;;  %v1110_v56 = vld [vmem:[%s3088_s19 + $0x1b] sm:$0xff] }
  0x8b   : > { %731 = vrot.lane.b32.xlu1 %v3236_v63, %s3037_s21  ;;  %729 = vrot.lane.b32.xlu0 %v3238_v0, %s3037_s21 }
  0x8c   : > { %733 = vrot.lane.b32.xlu2 %v3241_v3, %s3037_s21  ;;  %349 = vst.msk [vmem:[#allocation2 + $0x8c] sm:$0xf] %vm313_vm0, %v312_v1 }
  0x8d   : > { %v465_v9 = vpop.permute.xlu1 %464  ;;  %v461_v10 = vpop.permute.xlu0 %460 }
  0x8e   : > { %570 = vst.msk [vmem:[#allocation2 + $0xc] sm:$0xf] %vm566_vm1, %v465_v9  ;;  %v487_v16 = vpop.permute.xlu2 %486  ;;  %v3337_v9 = vpack.c.bf16 %v626_v2, %v626_v2  ;;  %v635_v2 = vld [vmem:[%s3088_s19 + $0x102] sm:$0xff] }
  0x8f   : > { %568 = vst.msk [vmem:[#allocation2 + $0x4] sm:$0xf] %vm566_vm1, %v461_v10  ;;  %v270_v10 = vld [vmem:[%s3088_s19 + $0xe8] sm:$0xff]  ;;  %v3409_v12 = vpack.c.bf16 %v635_v2, %v635_v2  ;;  %v1147_v2 = vpack.c.bf16 %v1111_v60, %v1111_v60 }
  0x90   : > { %581 = vst.msk [vmem:[#allocation2 + $0x38] sm:$0xf] %vm566_vm1, %v487_v16  ;;  %v268_v16 = vld [vmem:[%s3088_s19 + $0xd8] sm:$0xff]  ;;  %v306_v20 = vpack.c.bf16 %v270_v10, %v270_v10 }
  0x91   : > { %v304_v27 = vpack.c.bf16 %v268_v16, %v268_v16  ;;  %v636_v16 = vld [vmem:[%s3088_s19 + $0x10a] sm:$0xff] }
  0x92   : > { %343 = vst.msk [vmem:[#allocation2 + $0x74] sm:$0xf] %vm313_vm0, %v306_v20  ;;  %v638_v20 = vld [vmem:[%s3088_s19 + $0x11a] sm:$0xff]  ;;  %v3427_v22 = vpack.c.bf16 %v636_v16, %v636_v16 }
  0x93   : > { %737 = vrot.lane.b32.xlu1 %v3260_v14, %s3037_s21  ;;  %735 = vrot.lane.b32.xlu0 %v3262_v15, %s3037_s21  ;;  %341 = vst.msk [vmem:[#allocation2 + $0x6c] sm:$0xf] %vm313_vm0, %v304_v27  ;;  %v3430_v27 = vpack.c.bf16 %v638_v20, %v638_v20  ;;  %v1115_v20 = vld [vmem:[%s3088_s19 + $0x43] sm:$0xff] }
  0x94   : > { %739 = vrot.lane.b32.xlu2 %v3265_v18, %s3037_s21 }
  0x95   : > { %v473_v24 = vpop.permute.xlu1 %472  ;;  %v471_v25 = vpop.permute.xlu0 %470 }
  0x96   : > { %574 = vst.msk [vmem:[#allocation2 + $0x1c] sm:$0xf] %vm566_vm1, %v473_v24  ;;  %v493_v32 = vpop.permute.xlu2 %492  ;;  %v3358_v24 = vpack.c.bf16 %v627_v13, %v627_v13  ;;  %v637_v13 = vld [vmem:[%s3088_s19 + $0x112] sm:$0xff] }
  0x97   : > { %573 = vst.msk [vmem:[#allocation2 + $0x18] sm:$0xf] %vm566_vm1, %v471_v25  ;;  %v3425_v21 = vpack.c.bf16 %v637_v13, %v637_v13 }
  0x98   : > { %584 = vst.msk [vmem:[#allocation2 + $0x44] sm:$0xf] %vm566_vm1, %v493_v32  ;;  %v272_v32 = vld [vmem:[%s3088_s19 + $0xf8] sm:$0xff] }
  0x9b   : > { %743 = vrot.lane.b32.xlu1 %v3284_v30, %s3037_s21  ;;  %741 = vrot.lane.b32.xlu0 %v3286_v31, %s3037_s21 }
  0x9c   : > { %745 = vrot.lane.b32.xlu2 %v3289_v34, %s3037_s21 }
  0x9d   : > { %v479_v43 = vpop.permute.xlu1 %478  ;;  %v477_v44 = vpop.permute.xlu0 %476 }
  0x9e   : > { %577 = vst.msk [vmem:[#allocation2 + $0x28] sm:$0xf] %vm566_vm1, %v479_v43  ;;  %v499_v53 = vpop.permute.xlu2 %498  ;;  %v632_v43 = vld [vmem:[%s3088_s19 + $0xea] sm:$0xff] }
  0x9f   : > { %576 = vst.msk [vmem:[#allocation2 + $0x24] sm:$0xf] %vm566_vm1, %v477_v44  ;;  %v308_v44 = vpack.c.bf16 %v272_v32, %v272_v32  ;;  %v3385_v54 = vpack.c.bf16 %v632_v43, %v632_v43  ;;  %v890_v43 = vld [vmem:[%s3088_s19 + $0x122] sm:$0xff] }
  0xa0   : > { %587 = vst.msk [vmem:[#allocation2 + $0x50] sm:$0xf] %vm566_vm1, %v499_v53  ;;  %v307_v53 = vpack.c.bf16 %v271_v38, %v271_v38 }
  0xa1   : > { %345 = vst.msk [vmem:[#allocation2 + $0x7c] sm:$0xf] %vm313_vm0, %v308_v44 }
  0xa2   : > { %344 = vst.msk [vmem:[#allocation2 + $0x78] sm:$0xf] %vm313_vm0, %v307_v53 }
  0xa3   : > { %749 = vrot.lane.b32.xlu1 %v3308_v48, %s3037_s21  ;;  %747 = vrot.lane.b32.xlu0 %v3310_v51, %s3037_s21 }
  0xa4   : > { %751 = vrot.lane.b32.xlu2 %v3313_v55, %s3037_s21 }
  0xa5   : > { %v485_v61 = vpop.permute.xlu1 %484  ;;  %v483_v62 = vpop.permute.xlu0 %482 }
  0xa6   : > { %580 = vst.msk [vmem:[#allocation2 + $0x34] sm:$0xf] %vm566_vm1, %v485_v61  ;;  %v505_v7 = vpop.permute.xlu2 %504 }
  0xa7   : > { %579 = vst.msk [vmem:[#allocation2 + $0x30] sm:$0xf] %vm566_vm1, %v483_v62 }
  0xa8   : > { %590 = vst.msk [vmem:[#allocation2 + $0x5c] sm:$0xf] %vm566_vm1, %v505_v7  ;;  %v3404_v7 = vpack.c.bf16 %v634_v58, %v634_v58 }
  0xab   : > { %755 = vrot.lane.b32.xlu1 %v3332_v5, %s3037_s21  ;;  %753 = vrot.lane.b32.xlu0 %v3334_v6, %s3037_s21 }
  0xac   : > { %757 = vrot.lane.b32.xlu2 %v3337_v9, %s3037_s21 }
  0xad   : > { %v491_v17 = vpop.permute.xlu1 %490  ;;  %v489_v19 = vpop.permute.xlu0 %488 }
  0xae   : > { %583 = vst.msk [vmem:[#allocation2 + $0x40] sm:$0xf] %vm566_vm1, %v491_v17  ;;  %v511_v25 = vpop.permute.xlu2 %510 }
  0xaf   : > { %582 = vst.msk [vmem:[#allocation2 + $0x3c] sm:$0xf] %vm566_vm1, %v489_v19 }
  0xb0   : > { %593 = vst.msk [vmem:[#allocation2 + $0x68] sm:$0xf] %vm566_vm1, %v511_v25 }
  0xb3   : > { %761 = vrot.lane.b32.xlu1 %v3356_v23, %s3037_s21  ;;  %759 = vrot.lane.b32.xlu0 %v3358_v24, %s3037_s21 }
  0xb4   : > { %763 = vrot.lane.b32.xlu2 %v3361_v28, %s3037_s21 }
  0xb5   : > { %v497_v40 = vpop.permute.xlu1 %496  ;;  %v495_v41 = vpop.permute.xlu0 %494 }
  0xb6   : > { %586 = vst.msk [vmem:[#allocation2 + $0x4c] sm:$0xf] %vm566_vm1, %v497_v40  ;;  %v517_v47 = vpop.permute.xlu2 %516 }
  0xb7   : > { %585 = vst.msk [vmem:[#allocation2 + $0x48] sm:$0xf] %vm566_vm1, %v495_v41 }
  0xb8   : > { %596 = vst.msk [vmem:[#allocation2 + $0x74] sm:$0xf] %vm566_vm1, %v517_v47  ;;  %v926_v47 = vpack.c.bf16 %v890_v43, %v890_v43 }
  0xbb   : > { %767 = vrot.lane.b32.xlu1 %v3380_v45, %s3037_s21  ;;  %765 = vrot.lane.b32.xlu0 %v3382_v46, %s3037_s21 }
  0xbc   : > { %769 = vrot.lane.b32.xlu2 %v3385_v54, %s3037_s21 }
  0xbd   : > { %v503_v61 = vpop.permute.xlu1 %502  ;;  %v501_v62 = vpop.permute.xlu0 %500 }
  0xbe   : > { %589 = vst.msk [vmem:[#allocation2 + $0x58] sm:$0xf] %vm566_vm1, %v503_v61  ;;  %v523_v10 = vpop.permute.xlu2 %522  ;;  %v1146_v61 = vpack.c.bf16 %v1110_v56, %v1110_v56  ;;  %v1130_v56 = vld [vmem:[%s3088_s19 + $0xbb] sm:$0xff] }
  0xbf   : > { %588 = vst.msk [vmem:[#allocation2 + $0x54] sm:$0xf] %vm566_vm1, %v501_v62  ;;  %v1145_v62 = vpack.c.bf16 %v1109_v57, %v1109_v57 }
  0xc0   : > { %599 = vst.msk [vmem:[#allocation2 + $0x80] sm:$0xf] %vm566_vm1, %v523_v10 }
  0xc3   : > { %773 = vrot.lane.b32.xlu1 %v3404_v7, %s3037_s21  ;;  %771 = vrot.lane.b32.xlu0 %v3406_v8, %s3037_s21 }
  0xc4   : > { %775 = vrot.lane.b32.xlu2 %v3409_v12, %s3037_s21 }
  0xc5   : > { %v509_v17 = vpop.permute.xlu1 %508  ;;  %v507_v19 = vpop.permute.xlu0 %506 }
  0xc6   : > { %592 = vst.msk [vmem:[#allocation2 + $0x64] sm:$0xf] %vm566_vm1, %v509_v17  ;;  %v529_v25 = vpop.permute.xlu2 %528  ;;  %v1150_v17 = vpack.c.bf16 %v1114_v11, %v1114_v11 }
  0xc7   : > { %591 = vst.msk [vmem:[#allocation2 + $0x60] sm:$0xf] %vm566_vm1, %v507_v19  ;;  %v1116_v19 = vld [vmem:[%s3088_s19 + $0x4b] sm:$0xff] }
  0xc8   : > { %602 = vst.msk [vmem:[#allocation2 + $0x8c] sm:$0xf] %vm566_vm1, %v529_v25  ;;  %v1117_v25 = vld [vmem:[%s3088_s19 + $0x53] sm:$0xff] }
  0xcb   : > { %779 = vrot.lane.b32.xlu1 %v3425_v21, %s3037_s21  ;;  %777 = vrot.lane.b32.xlu0 %v3427_v22, %s3037_s21 }
  0xcc   : > { %781 = vrot.lane.b32.xlu2 %v3430_v27, %s3037_s21 }
  0xcd   : > { %v515_v29 = vpop.permute.xlu1 %514  ;;  %v513_v32 = vpop.permute.xlu0 %512 }
  0xce   : > { %595 = vst.msk [vmem:[#allocation2 + $0x70] sm:$0xf] %vm566_vm1, %v515_v29  ;;  %v716_v33 = vpop.permute.xlu2 %715  ;;  %v1151_v29 = vpack.c.bf16 %v1115_v20, %v1115_v20 }
  0xcf   : > { %594 = vst.msk [vmem:[#allocation2 + $0x6c] sm:$0xf] %vm566_vm1, %v513_v32 }
  0xd0   : > { %822 = vst.msk [vmem:[#allocation2 + $0x8] sm:$0xf] %vm819_vm2, %v716_v33  ;;  %v1153_v33 = vpack.c.bf16 %v1117_v25, %v1117_v25 }
  0xd3   : > { %966 = vrot.lane.b32.xlu1 %v3193_v37, %s3038_s22  ;;  %964 = vrot.lane.b32.xlu0 %v3177_v26, %s3038_s22 }
  0xd4   : > { %968 = vrot.lane.b32.xlu2 %v3191_v36, %s3038_s22 }
  0xd5   : > { %v521_v35 = vpop.permute.xlu1 %520  ;;  %v519_v38 = vpop.permute.xlu0 %518 }
  0xd6   : > { %598 = vst.msk [vmem:[#allocation2 + $0x7c] sm:$0xf] %vm566_vm1, %v521_v35  ;;  %v722_v40 = vpop.permute.xlu2 %721  ;;  %v1119_v35 = vld [vmem:[%s3088_s19 + $0x63] sm:$0xff] }
  0xd7   : > { %597 = vst.msk [vmem:[#allocation2 + $0x78] sm:$0xf] %vm566_vm1, %v519_v38  ;;  %v1118_v38 = vld [vmem:[%s3088_s19 + $0x5b] sm:$0xff] }
  0xd8   : > { %825 = vst.msk [vmem:[#allocation2 + $0x14] sm:$0xf] %vm819_vm2, %v722_v40 }
  0xdb   : > { %972 = vrot.lane.b32.xlu1 %v3215_v50, %s3038_s22  ;;  %970 = vrot.lane.b32.xlu0 %v3197_v39, %s3038_s22 }
  0xdc   : > { %974 = vrot.lane.b32.xlu2 %v3213_v49, %s3038_s22 }
  0xdd   : > { %v527_v37 = vpop.permute.xlu1 %526  ;;  %v525_v26 = vpop.permute.xlu0 %524 }
  0xde   : > { %601 = vst.msk [vmem:[#allocation2 + $0x88] sm:$0xf] %vm566_vm1, %v527_v37  ;;  %v728_v36 = vpop.permute.xlu2 %727 }
  0xdf   : > { %600 = vst.msk [vmem:[#allocation2 + $0x84] sm:$0xf] %vm566_vm1, %v525_v26  ;;  %v1120_v26 = vld [vmem:[%s3088_s19 + $0x6b] sm:$0xff] }
  0xe0   : > { %828 = vst.msk [vmem:[#allocation2 + $0x20] sm:$0xf] %vm819_vm2, %v728_v36  ;;  %v1155_v36 = vpack.c.bf16 %v1119_v35, %v1119_v35  ;;  %v1139_v35 = vld [vmem:[%s3088_s19 + $0x103] sm:$0xff] }
  0xe3   : > { %978 = vrot.lane.b32.xlu1 %v3238_v0, %s3038_s22  ;;  %976 = vrot.lane.b32.xlu0 %v3219_v52, %s3038_s22 }
  0xe4   : > { %980 = vrot.lane.b32.xlu2 %v3236_v63, %s3038_s22 }
  0xe5   : > { %v714_v50 = vpop.permute.xlu1 %713  ;;  %v712_v39 = vpop.permute.xlu0 %711 }
  0xe6   : > { %821 = vst.msk [vmem:[#allocation2 + $0x4] sm:$0xf] %vm819_vm2, %v714_v50  ;;  %v734_v49 = vpop.permute.xlu2 %733  ;;  %v1154_v50 = vpack.c.bf16 %v1118_v38, %v1118_v38 }
  0xe7   : > { %820 = vst.msk [vmem:[#allocation2] sm:$0xf] %vm819_vm2, %v712_v39 }
  0xe8   : > { %831 = vst.msk [vmem:[#allocation2 + $0x2c] sm:$0xf] %vm819_vm2, %v734_v49  ;;  %v1156_v49 = vpack.c.bf16 %v1120_v26, %v1120_v26 }
  0xeb   : > { %984 = vrot.lane.b32.xlu1 %v3262_v15, %s3038_s22  ;;  %982 = vrot.lane.b32.xlu0 %v3241_v3, %s3038_s22 }
  0xec   : > { %986 = vrot.lane.b32.xlu2 %v3260_v14, %s3038_s22 }
  0xed   : > { %v720_v0 = vpop.permute.xlu1 %719  ;;  %v718_v52 = vpop.permute.xlu0 %717 }
  0xee   : > { %824 = vst.msk [vmem:[#allocation2 + $0x10] sm:$0xf] %vm819_vm2, %v720_v0  ;;  %v740_v63 = vpop.permute.xlu2 %739  ;;  %v1122_v0 = vld [vmem:[%s3088_s19 + $0x7b] sm:$0xff] }
  0xef   : > { %823 = vst.msk [vmem:[#allocation2 + $0xc] sm:$0xf] %vm819_vm2, %v718_v52  ;;  %v1121_v52 = vld [vmem:[%s3088_s19 + $0x73] sm:$0xff] }
  0xf0   : > { %834 = vst.msk [vmem:[#allocation2 + $0x38] sm:$0xf] %vm819_vm2, %v740_v63 }
  0xf3   : > { %990 = vrot.lane.b32.xlu1 %v3286_v31, %s3038_s22  ;;  %988 = vrot.lane.b32.xlu0 %v3265_v18, %s3038_s22 }
  0xf4   : > { %992 = vrot.lane.b32.xlu2 %v3284_v30, %s3038_s22 }
  0xf5   : > { %v726_v15 = vpop.permute.xlu1 %725  ;;  %v724_v3 = vpop.permute.xlu0 %723 }
  0xf6   : > { %827 = vst.msk [vmem:[#allocation2 + $0x1c] sm:$0xf] %vm819_vm2, %v726_v15  ;;  %v746_v14 = vpop.permute.xlu2 %745 }
  0xf7   : > { %826 = vst.msk [vmem:[#allocation2 + $0x18] sm:$0xf] %vm819_vm2, %v724_v3  ;;  %v1123_v3 = vld [vmem:[%s3088_s19 + $0x83] sm:$0xff] }
  0xf8   : > { %837 = vst.msk [vmem:[#allocation2 + $0x44] sm:$0xf] %vm819_vm2, %v746_v14  ;;  %v1158_v14 = vpack.c.bf16 %v1122_v0, %v1122_v0  ;;  %v1142_v0 = vld [vmem:[%s3088_s19 + $0x11b] sm:$0xff] }
  0xfb   : > { %996 = vrot.lane.b32.xlu1 %v3310_v51, %s3038_s22  ;;  %994 = vrot.lane.b32.xlu0 %v3289_v34, %s3038_s22 }
  0xfc   : > { %998 = vrot.lane.b32.xlu2 %v3308_v48, %s3038_s22 }
  0xfd   : > { %v732_v31 = vpop.permute.xlu1 %731  ;;  %v730_v18 = vpop.permute.xlu0 %729 }
  0xfe   : > { %830 = vst.msk [vmem:[#allocation2 + $0x28] sm:$0xf] %vm819_vm2, %v732_v31  ;;  %v752_v30 = vpop.permute.xlu2 %751  ;;  %v1157_v31 = vpack.c.bf16 %v1121_v52, %v1121_v52 }
  0xff   : > { %829 = vst.msk [vmem:[#allocation2 + $0x24] sm:$0xf] %vm819_vm2, %v730_v18 }
 0x100   : > { %840 = vst.msk [vmem:[#allocation2 + $0x50] sm:$0xf] %vm819_vm2, %v752_v30  ;;  %v1159_v30 = vpack.c.bf16 %v1123_v3, %v1123_v3 }
 0x103   : > { %1002 = vrot.lane.b32.xlu1 %v3334_v6, %s3038_s22  ;;  %1000 = vrot.lane.b32.xlu0 %v3313_v55, %s3038_s22 }
 0x104   : > { %1004 = vrot.lane.b32.xlu2 %v3332_v5, %s3038_s22 }
 0x105   : > { %v738_v51 = vpop.permute.xlu1 %737  ;;  %v736_v34 = vpop.permute.xlu0 %735 }
 0x106   : > { %833 = vst.msk [vmem:[#allocation2 + $0x34] sm:$0xf] %vm819_vm2, %v738_v51  ;;  %v758_v48 = vpop.permute.xlu2 %757  ;;  %v1125_v51 = vld [vmem:[%s3088_s19 + $0x93] sm:$0xff] }
 0x107   : > { %832 = vst.msk [vmem:[#allocation2 + $0x30] sm:$0xf] %vm819_vm2, %v736_v34  ;;  %v1124_v34 = vld [vmem:[%s3088_s19 + $0x8b] sm:$0xff] }
 0x108   : > { %843 = vst.msk [vmem:[#allocation2 + $0x5c] sm:$0xf] %vm819_vm2, %v758_v48 }
 0x10b   : > { %1008 = vrot.lane.b32.xlu1 %v3358_v24, %s3038_s22  ;;  %1006 = vrot.lane.b32.xlu0 %v3337_v9, %s3038_s22 }
 0x10c   : > { %1010 = vrot.lane.b32.xlu2 %v3356_v23, %s3038_s22 }
 0x10d   : > { %v744_v6 = vpop.permute.xlu1 %743  ;;  %v742_v55 = vpop.permute.xlu0 %741 }
 0x10e   : > { %836 = vst.msk [vmem:[#allocation2 + $0x40] sm:$0xf] %vm819_vm2, %v744_v6  ;;  %v764_v5 = vpop.permute.xlu2 %763 }
 0x10f   : > { %835 = vst.msk [vmem:[#allocation2 + $0x3c] sm:$0xf] %vm819_vm2, %v742_v55  ;;  %v1126_v55 = vld [vmem:[%s3088_s19 + $0x9b] sm:$0xff] }
 0x110   : > { %846 = vst.msk [vmem:[#allocation2 + $0x68] sm:$0xf] %vm819_vm2, %v764_v5  ;;  %v1161_v5 = vpack.c.bf16 %v1125_v51, %v1125_v51  ;;  %v1362_v51 = vld [vmem:[%s3088_s19 + $0x14] sm:$0xff] }
 0x113   : > { %1014 = vrot.lane.b32.xlu1 %v3382_v46, %s3038_s22  ;;  %1012 = vrot.lane.b32.xlu0 %v3361_v28, %s3038_s22  ;;  %v891_v46 = vld [vmem:[%s3088_s19 + $0x12a] sm:$0xff] }
 0x114   : > { %1016 = vrot.lane.b32.xlu2 %v3380_v45, %s3038_s22 }
 0x115   : > { %v750_v24 = vpop.permute.xlu1 %749  ;;  %v748_v9 = vpop.permute.xlu0 %747 }
 0x116   : > { %839 = vst.msk [vmem:[#allocation2 + $0x4c] sm:$0xf] %vm819_vm2, %v750_v24  ;;  %v770_v23 = vpop.permute.xlu2 %769  ;;  %v1160_v24 = vpack.c.bf16 %v1124_v34, %v1124_v34 }
 0x117   : > { %838 = vst.msk [vmem:[#allocation2 + $0x48] sm:$0xf] %vm819_vm2, %v748_v9 }
 0x118   : > { %849 = vst.msk [vmem:[#allocation2 + $0x74] sm:$0xf] %vm819_vm2, %v770_v23  ;;  %v1162_v23 = vpack.c.bf16 %v1126_v55, %v1126_v55 }
 0x11b   : > { %1020 = vrot.lane.b32.xlu1 %v3406_v8, %s3038_s22  ;;  %1018 = vrot.lane.b32.xlu0 %v3385_v54, %s3038_s22  ;;  %v927_v54 = vpack.c.bf16 %v891_v46, %v891_v46 }
 0x11c   : > { %1022 = vrot.lane.b32.xlu2 %v3404_v7, %s3038_s22  ;;  %v1112_v7 = vld [vmem:[%s3088_s19 + $0x2b] sm:$0xff] }
 0x11d   : > { %v756_v28 = vpop.permute.xlu1 %755  ;;  %v754_v41 = vpop.permute.xlu0 %753  ;;  %v1148_v13 = vpack.c.bf16 %v1112_v7, %v1112_v7 }
 0x11e   : > { %842 = vst.msk [vmem:[#allocation2 + $0x58] sm:$0xf] %vm819_vm2, %v756_v28  ;;  %v776_v42 = vpop.permute.xlu2 %775  ;;  %v1128_v28 = vld [vmem:[%s3088_s19 + $0xab] sm:$0xff] }
 0x11f   : > { %841 = vst.msk [vmem:[#allocation2 + $0x54] sm:$0xf] %vm819_vm2, %v754_v41  ;;  %v1127_v41 = vld [vmem:[%s3088_s19 + $0xa3] sm:$0xff] }
 0x120   : > { %852 = vst.msk [vmem:[#allocation2 + $0x80] sm:$0xf] %vm819_vm2, %v776_v42  ;;  %v1163_v46 = vpack.c.bf16 %v1127_v41, %v1127_v41 }
 0x123   : > { %1026 = vrot.lane.b32.xlu1 %v3427_v22, %s3038_s22  ;;  %1024 = vrot.lane.b32.xlu0 %v3409_v12, %s3038_s22  ;;  %v1149_v12 = vpack.c.bf16 %v1113_v4, %v1113_v4  ;;  %v1133_v4 = vld [vmem:[%s3088_s19 + $0xd3] sm:$0xff] }
 0x124   : > { %1028 = vrot.lane.b32.xlu2 %v3425_v21, %s3038_s22 }
 0x125   : > { %v762_v44 = vpop.permute.xlu1 %761  ;;  %v760_v45 = vpop.permute.xlu0 %759 }
 0x126   : > { %845 = vst.msk [vmem:[#allocation2 + $0x64] sm:$0xf] %vm819_vm2, %v762_v44  ;;  %v782_v53 = vpop.permute.xlu2 %781  ;;  %v1129_v44 = vld [vmem:[%s3088_s19 + $0xb3] sm:$0xff] }
 0x127   : > { %844 = vst.msk [vmem:[#allocation2 + $0x60] sm:$0xf] %vm819_vm2, %v760_v45  ;;  %v1164_v45 = vpack.c.bf16 %v1128_v28, %v1128_v28  ;;  %v1365_v28 = vld [vmem:[%s3088_s19 + $0x2c] sm:$0xff] }
 0x128   : > { %855 = vst.msk [vmem:[#allocation2 + $0x8c] sm:$0xf] %vm819_vm2, %v782_v53  ;;  %v1165_v53 = vpack.c.bf16 %v1129_v44, %v1129_v44 }
 0x12b   : > { %1032 = vrot.lane.b32.xlu1 %v926_v47, %s3038_s22  ;;  %1030 = vrot.lane.b32.xlu0 %v3430_v27, %s3038_s22  ;;  %v1152_v27 = vpack.c.bf16 %v1116_v19, %v1116_v19  ;;  %v1136_v19 = vld [vmem:[%s3088_s19 + $0xeb] sm:$0xff] }
 0x12c   : > { %1034 = vrot.lane.b32.xlu2 %v927_v54, %s3038_s22  ;;  %v1131_v54 = vld [vmem:[%s3088_s19 + $0xc3] sm:$0xff] }
 0x12d   : > { %v768_v58 = vpop.permute.xlu1 %767  ;;  %v766_v59 = vpop.permute.xlu0 %765  ;;  %v1167_v60 = vpack.c.bf16 %v1131_v54, %v1131_v54  ;;  %v1368_v54 = vld [vmem:[%s3088_s19 + $0x44] sm:$0xff] }
 0x12e   : > { %848 = vst.msk [vmem:[#allocation2 + $0x70] sm:$0xf] %vm819_vm2, %v768_v58  ;;  %v969_v1 = vpop.permute.xlu2 %968 }
 0x12f   : > { %847 = vst.msk [vmem:[#allocation2 + $0x6c] sm:$0xf] %vm819_vm2, %v766_v59  ;;  %v1132_v59 = vld [vmem:[%s3088_s19 + $0xcb] sm:$0xff] }
 0x130   : > { %1075 = vst.msk [vmem:[#allocation2 + $0x8] sm:$0xf] %vm1072_vm3, %v969_v1  ;;  %v1168_v1 = vpack.c.bf16 %v1132_v59, %v1132_v59 }
 0x133   : > { %1219 = vrot.lane.b32.xlu1 %v1146_v61, %s3039_s23  ;;  %1217 = vrot.lane.b32.xlu0 %v1145_v62, %s3039_s23  ;;  %v1166_v61 = vpack.c.bf16 %v1130_v56, %v1130_v56 }
 0x134   : > { %1221 = vrot.lane.b32.xlu2 %v1147_v2, %s3039_s23  ;;  %v1134_v2 = vld [vmem:[%s3088_s19 + $0xdb] sm:$0xff] }
 0x135   : > { %v774_v8 = vpop.permute.xlu1 %773  ;;  %v772_v10 = vpop.permute.xlu0 %771  ;;  %v1170_v11 = vpack.c.bf16 %v1134_v2, %v1134_v2  ;;  %v1371_v2 = vld [vmem:[%s3088_s19 + $0x5c] sm:$0xff] }
 0x136   : > { %851 = vst.msk [vmem:[#allocation2 + $0x7c] sm:$0xf] %vm819_vm2, %v774_v8  ;;  %v975_v16 = vpop.permute.xlu2 %974 }
 0x137   : > { %850 = vst.msk [vmem:[#allocation2 + $0x78] sm:$0xf] %vm819_vm2, %v772_v10  ;;  %v1135_v10 = vld [vmem:[%s3088_s19 + $0xe3] sm:$0xff] }
 0x138   : > { %1078 = vst.msk [vmem:[#allocation2 + $0x14] sm:$0xf] %vm1072_vm3, %v975_v16  ;;  %v1171_v16 = vpack.c.bf16 %v1135_v10, %v1135_v10 }
 0x13b   : > { %1225 = vrot.lane.b32.xlu1 %v1149_v12, %s3039_s23  ;;  %1223 = vrot.lane.b32.xlu0 %v1148_v13, %s3039_s23  ;;  %v1169_v12 = vpack.c.bf16 %v1133_v4, %v1133_v4 }
 0x13c   : > { %1227 = vrot.lane.b32.xlu2 %v1150_v17, %s3039_s23  ;;  %v1137_v17 = vld [vmem:[%s3088_s19 + $0xf3] sm:$0xff] }
 0x13d   : > { %v780_v21 = vpop.permute.xlu1 %779  ;;  %v778_v22 = vpop.permute.xlu0 %777  ;;  %v1173_v25 = vpack.c.bf16 %v1137_v17, %v1137_v17  ;;  %v1374_v17 = vld [vmem:[%s3088_s19 + $0x74] sm:$0xff] }
 0x13e   : > { %854 = vst.msk [vmem:[#allocation2 + $0x88] sm:$0xf] %vm819_vm2, %v780_v21  ;;  %v981_v32 = vpop.permute.xlu2 %980 }
 0x13f   : > { %853 = vst.msk [vmem:[#allocation2 + $0x84] sm:$0xf] %vm819_vm2, %v778_v22  ;;  %v1138_v22 = vld [vmem:[%s3088_s19 + $0xfb] sm:$0xff] }
 0x140   : > { %1081 = vst.msk [vmem:[#allocation2 + $0x20] sm:$0xf] %vm1072_vm3, %v981_v32  ;;  %v1174_v32 = vpack.c.bf16 %v1138_v22, %v1138_v22 }
 0x143   : > { %1231 = vrot.lane.b32.xlu1 %v1152_v27, %s3039_s23  ;;  %1229 = vrot.lane.b32.xlu0 %v1151_v29, %s3039_s23  ;;  %v1172_v27 = vpack.c.bf16 %v1136_v19, %v1136_v19 }
 0x144   : > { %1233 = vrot.lane.b32.xlu2 %v1153_v33, %s3039_s23  ;;  %v1140_v33 = vld [vmem:[%s3088_s19 + $0x10b] sm:$0xff] }
 0x145   : > { %v967_v40 = vpop.permute.xlu1 %966  ;;  %v965_v37 = vpop.permute.xlu0 %964  ;;  %v1176_v26 = vpack.c.bf16 %v1140_v33, %v1140_v33  ;;  %v1377_v33 = vld [vmem:[%s3088_s19 + $0x8c] sm:$0xff] }
 0x146   : > { %1074 = vst.msk [vmem:[#allocation2 + $0x4] sm:$0xf] %vm1072_vm3, %v967_v40  ;;  %v987_v39 = vpop.permute.xlu2 %986 }
 0x147   : > { %1073 = vst.msk [vmem:[#allocation2] sm:$0xf] %vm1072_vm3, %v965_v37  ;;  %v1141_v37 = vld [vmem:[%s3088_s19 + $0x113] sm:$0xff] }
 0x148   : > { %1084 = vst.msk [vmem:[#allocation2 + $0x2c] sm:$0xf] %vm1072_vm3, %v987_v39  ;;  %v1177_v39 = vpack.c.bf16 %v1141_v37, %v1141_v37 }
 0x14b   : > { %1237 = vrot.lane.b32.xlu1 %v1155_v36, %s3039_s23  ;;  %1235 = vrot.lane.b32.xlu0 %v1154_v50, %s3039_s23  ;;  %v1175_v36 = vpack.c.bf16 %v1139_v35, %v1139_v35 }
 0x14c   : > { %1239 = vrot.lane.b32.xlu2 %v1156_v49, %s3039_s23  ;;  %v1143_v49 = vld [vmem:[%s3088_s19 + $0x123] sm:$0xff] }
 0x14d   : > { %v973_v63 = vpop.permute.xlu1 %972  ;;  %v971_v15 = vpop.permute.xlu0 %970  ;;  %v1179_v3 = vpack.c.bf16 %v1143_v49, %v1143_v49  ;;  %v1380_v49 = vld [vmem:[%s3088_s19 + $0xa4] sm:$0xff] }
 0x14e   : > { %1077 = vst.msk [vmem:[#allocation2 + $0x10] sm:$0xf] %vm1072_vm3, %v973_v63  ;;  %v993_v18 = vpop.permute.xlu2 %992 }
 0x14f   : > { %1076 = vst.msk [vmem:[#allocation2 + $0xc] sm:$0xf] %vm1072_vm3, %v971_v15  ;;  %v1144_v15 = vld [vmem:[%s3088_s19 + $0x12b] sm:$0xff] }
 0x150   : > { %1087 = vst.msk [vmem:[#allocation2 + $0x38] sm:$0xf] %vm1072_vm3, %v993_v18  ;;  %v1180_v18 = vpack.c.bf16 %v1144_v15, %v1144_v15 }
 0x153   : > { %1243 = vrot.lane.b32.xlu1 %v1158_v14, %s3039_s23  ;;  %1241 = vrot.lane.b32.xlu0 %v1157_v31, %s3039_s23  ;;  %v1178_v14 = vpack.c.bf16 %v1142_v0, %v1142_v0 }
 0x154   : > { %1245 = vrot.lane.b32.xlu2 %v1159_v30, %s3039_s23  ;;  %v1363_v30 = vld [vmem:[%s3088_s19 + $0x1c] sm:$0xff] }
 0x155   : > { %v979_v48 = vpop.permute.xlu1 %978  ;;  %v977_v6 = vpop.permute.xlu0 %976  ;;  %v1399_v55 = vpack.c.bf16 %v1363_v30, %v1363_v30  ;;  %v1383_v30 = vld [vmem:[%s3088_s19 + $0xbc] sm:$0xff] }
 0x156   : > { %1080 = vst.msk [vmem:[#allocation2 + $0x1c] sm:$0xf] %vm1072_vm3, %v979_v48  ;;  %v999_v9 = vpop.permute.xlu2 %998 }
 0x157   : > { %1079 = vst.msk [vmem:[#allocation2 + $0x18] sm:$0xf] %vm1072_vm3, %v977_v6  ;;  %v1364_v6 = vld [vmem:[%s3088_s19 + $0x24] sm:$0xff] }
 0x158   : > { %1090 = vst.msk [vmem:[#allocation2 + $0x44] sm:$0xf] %vm1072_vm3, %v999_v9  ;;  %v3660_v9 = vpack.c.bf16 %v1364_v6, %v1364_v6 }
 0x15b   : > { %1249 = vrot.lane.b32.xlu1 %v1161_v5, %s3039_s23  ;;  %1247 = vrot.lane.b32.xlu0 %v1160_v24, %s3039_s23  ;;  %v1398_v5 = vpack.c.bf16 %v1362_v51, %v1362_v51 }
 0x15c   : > { %1251 = vrot.lane.b32.xlu2 %v1162_v23, %s3039_s23  ;;  %v1366_v23 = vld [vmem:[%s3088_s19 + $0x34] sm:$0xff] }
 0x15d   : > { %v985_v42 = vpop.permute.xlu1 %984  ;;  %v983_v43 = vpop.permute.xlu0 %982  ;;  %v3671_v44 = vpack.c.bf16 %v1366_v23, %v1366_v23  ;;  %v1387_v23 = vld [vmem:[%s3088_s19 + $0xdc] sm:$0xff] }
 0x15e   : > { %1083 = vst.msk [vmem:[#allocation2 + $0x28] sm:$0xf] %vm1072_vm3, %v985_v42  ;;  %v1005_v47 = vpop.permute.xlu2 %1004 }
 0x15f   : > { %1082 = vst.msk [vmem:[#allocation2 + $0x24] sm:$0xf] %vm1072_vm3, %v983_v43  ;;  %v1367_v43 = vld [vmem:[%s3088_s19 + $0x3c] sm:$0xff] }
 0x160   : > { %1093 = vst.msk [vmem:[#allocation2 + $0x50] sm:$0xf] %vm1072_vm3, %v1005_v47  ;;  %v3676_v47 = vpack.c.bf16 %v1367_v43, %v1367_v43  ;;  %v1388_v43 = vld [vmem:[%s3088_s19 + $0xe4] sm:$0xff] }
 0x163   : > { %1255 = vrot.lane.b32.xlu1 %v1164_v45, %s3039_s23  ;;  %1253 = vrot.lane.b32.xlu0 %v1163_v46, %s3039_s23  ;;  %v3673_v45 = vpack.c.bf16 %v1365_v28, %v1365_v28  ;;  %v1386_v28 = vld [vmem:[%s3088_s19 + $0xd4] sm:$0xff] }
 0x164   : > { %1257 = vrot.lane.b32.xlu2 %v1165_v53, %s3039_s23  ;;  %v1369_v53 = vld [vmem:[%s3088_s19 + $0x4c] sm:$0xff] }
 0x165   : > { %v991_v57 = vpop.permute.xlu1 %990  ;;  %v989_v58 = vpop.permute.xlu0 %988  ;;  %v3689_v59 = vpack.c.bf16 %v1369_v53, %v1369_v53  ;;  %v3799_v53 = vpack.c.bf16 %v1386_v28, %v1386_v28 }
 0x166   : > { %1086 = vst.msk [vmem:[#allocation2 + $0x34] sm:$0xf] %vm1072_vm3, %v991_v57  ;;  %v1011_v62 = vpop.permute.xlu2 %1010 }
 0x167   : > { %1085 = vst.msk [vmem:[#allocation2 + $0x30] sm:$0xf] %vm1072_vm3, %v989_v58  ;;  %v1370_v58 = vld [vmem:[%s3088_s19 + $0x54] sm:$0xff] }
 0x168   : > { %1096 = vst.msk [vmem:[#allocation2 + $0x5c] sm:$0xf] %vm1072_vm3, %v1011_v62  ;;  %v3694_v62 = vpack.c.bf16 %v1370_v58, %v1370_v58  ;;  %v1389_v58 = vld [vmem:[%s3088_s19 + $0xec] sm:$0xff] }
 0x16b   : > { %1261 = vrot.lane.b32.xlu1 %v1167_v60, %s3039_s23  ;;  %1259 = vrot.lane.b32.xlu0 %v1166_v61, %s3039_s23  ;;  %v3691_v60 = vpack.c.bf16 %v1368_v54, %v1368_v54 }
 0x16c   : > { %1263 = vrot.lane.b32.xlu2 %v1168_v1, %s3039_s23  ;;  %v1372_v1 = vld [vmem:[%s3088_s19 + $0x64] sm:$0xff] }
 0x16d   : > { %v997_v7 = vpop.permute.xlu1 %996  ;;  %v995_v8 = vpop.permute.xlu0 %994  ;;  %v3707_v10 = vpack.c.bf16 %v1372_v1, %v1372_v1 }
 0x16e   : > { %1089 = vst.msk [vmem:[#allocation2 + $0x40] sm:$0xf] %vm1072_vm3, %v997_v7  ;;  %v1017_v13 = vpop.permute.xlu2 %1016 }
 0x16f   : > { %1088 = vst.msk [vmem:[#allocation2 + $0x3c] sm:$0xf] %vm1072_vm3, %v995_v8  ;;  %v1373_v8 = vld [vmem:[%s3088_s19 + $0x6c] sm:$0xff] }
 0x170   : > { %1099 = vst.msk [vmem:[#allocation2 + $0x68] sm:$0xf] %vm1072_vm3, %v1017_v13  ;;  %v3712_v13 = vpack.c.bf16 %v1373_v8, %v1373_v8 }
 0x173   : > { %1267 = vrot.lane.b32.xlu1 %v1170_v11, %s3039_s23  ;;  %1265 = vrot.lane.b32.xlu0 %v1169_v12, %s3039_s23  ;;  %v3709_v11 = vpack.c.bf16 %v1371_v2, %v1371_v2  ;;  %v1391_v2 = vld [vmem:[%s3088_s19 + $0xfc] sm:$0xff] }
 0x174   : > { %1269 = vrot.lane.b32.xlu2 %v1171_v16, %s3039_s23  ;;  %v1375_v16 = vld [vmem:[%s3088_s19 + $0x7c] sm:$0xff] }
 0x175   : > { %v1003_v20 = vpop.permute.xlu1 %1002  ;;  %v1001_v21 = vpop.permute.xlu0 %1000  ;;  %v3725_v22 = vpack.c.bf16 %v1375_v16, %v1375_v16  ;;  %v1393_v16 = vld [vmem:[%s3088_s19 + $0x10c] sm:$0xff] }
 0x176   : > { %1092 = vst.msk [vmem:[#allocation2 + $0x4c] sm:$0xf] %vm1072_vm3, %v1003_v20  ;;  %v1023_v29 = vpop.permute.xlu2 %1022 }
 0x177   : > { %1091 = vst.msk [vmem:[#allocation2 + $0x48] sm:$0xf] %vm1072_vm3, %v1001_v21  ;;  %v1376_v21 = vld [vmem:[%s3088_s19 + $0x84] sm:$0xff] }
 0x178   : > { %1102 = vst.msk [vmem:[#allocation2 + $0x74] sm:$0xf] %vm1072_vm3, %v1023_v29  ;;  %v3730_v29 = vpack.c.bf16 %v1376_v21, %v1376_v21  ;;  %v1394_v21 = vld [vmem:[%s3088_s19 + $0x114] sm:$0xff] }
 0x17b   : > { %1273 = vrot.lane.b32.xlu1 %v1173_v25, %s3039_s23  ;;  %1271 = vrot.lane.b32.xlu0 %v1172_v27, %s3039_s23  ;;  %v3727_v25 = vpack.c.bf16 %v1374_v17, %v1374_v17  ;;  %v1392_v17 = vld [vmem:[%s3088_s19 + $0x104] sm:$0xff] }
 0x17c   : > { %1275 = vrot.lane.b32.xlu2 %v1174_v32, %s3039_s23  ;;  %v1378_v32 = vld [vmem:[%s3088_s19 + $0x94] sm:$0xff] }
 0x17d   : > { %v1009_v38 = vpop.permute.xlu1 %1008  ;;  %v1007_v40 = vpop.permute.xlu0 %1006  ;;  %v3743_v37 = vpack.c.bf16 %v1378_v32, %v1378_v32  ;;  %v3833_v32 = vpack.c.bf16 %v1392_v17, %v1392_v17 }
 0x17e   : > { %1095 = vst.msk [vmem:[#allocation2 + $0x58] sm:$0xf] %vm1072_vm3, %v1009_v38  ;;  %v1029_v50 = vpop.permute.xlu2 %1028 }
 0x17f   : > { %1094 = vst.msk [vmem:[#allocation2 + $0x54] sm:$0xf] %vm1072_vm3, %v1007_v40  ;;  %v1379_v40 = vld [vmem:[%s3088_s19 + $0x9c] sm:$0xff] }
 0x180   : > { %1105 = vst.msk [vmem:[#allocation2 + $0x80] sm:$0xf] %vm1072_vm3, %v1029_v50  ;;  %v3748_v50 = vpack.c.bf16 %v1379_v40, %v1379_v40  ;;  %v1395_v40 = vld [vmem:[%s3088_s19 + $0x11c] sm:$0xff] }
 0x183   : > { %1279 = vrot.lane.b32.xlu1 %v1176_v26, %s3039_s23  ;;  %1277 = vrot.lane.b32.xlu0 %v1175_v36, %s3039_s23  ;;  %v3745_v26 = vpack.c.bf16 %v1377_v33, %v1377_v33 }
 0x184   : > { %1281 = vrot.lane.b32.xlu2 %v1177_v39, %s3039_s23  ;;  %v1381_v39 = vld [vmem:[%s3088_s19 + $0xac] sm:$0xff] }
 0x185   : > { %v1015_v52 = vpop.permute.xlu1 %1014  ;;  %v1013_v63 = vpop.permute.xlu0 %1012  ;;  %v3761_v15 = vpack.c.bf16 %v1381_v39, %v1381_v39 }
 0x186   : > { %1098 = vst.msk [vmem:[#allocation2 + $0x64] sm:$0xf] %vm1072_vm3, %v1015_v52  ;;  %v1035_v31 = vpop.permute.xlu2 %1034 }
 0x187   : > { %1097 = vst.msk [vmem:[#allocation2 + $0x60] sm:$0xf] %vm1072_vm3, %v1013_v63  ;;  %v1382_v63 = vld [vmem:[%s3088_s19 + $0xb4] sm:$0xff] }
 0x188   : > { %1108 = vst.msk [vmem:[#allocation2 + $0x8c] sm:$0xf] %vm1072_vm3, %v1035_v31  ;;  %v3766_v31 = vpack.c.bf16 %v1382_v63, %v1382_v63 }
 0x18b   : > { %1285 = vrot.lane.b32.xlu1 %v1179_v3, %s3039_s23  ;;  %1283 = vrot.lane.b32.xlu0 %v1178_v14, %s3039_s23  ;;  %v3763_v3 = vpack.c.bf16 %v1380_v49, %v1380_v49  ;;  %v1397_v49 = vld [vmem:[%s3088_s19 + $0x12c] sm:$0xff] }
 0x18c   : > { %1287 = vrot.lane.b32.xlu2 %v1180_v18, %s3039_s23  ;;  %v1384_v18 = vld [vmem:[%s3088_s19 + $0xc4] sm:$0xff] }
 0x18d   : > { %v1021_v34 = vpop.permute.xlu1 %1020  ;;  %v1019_v48 = vpop.permute.xlu0 %1018  ;;  %v3779_v6 = vpack.c.bf16 %v1384_v18, %v1384_v18 }
 0x18e   : > { %1101 = vst.msk [vmem:[#allocation2 + $0x70] sm:$0xf] %vm1072_vm3, %v1021_v34  ;;  %v1222_v24 = vpop.permute.xlu2 %1221 }
 0x18f   : > { %1100 = vst.msk [vmem:[#allocation2 + $0x6c] sm:$0xf] %vm1072_vm3, %v1019_v48  ;;  %v1385_v48 = vld [vmem:[%s3088_s19 + $0xcc] sm:$0xff] }
 0x190   : > { %1328 = vst.msk [vmem:[#allocation2 + $0x8] sm:$0xf] %vm1325_vm4, %v1222_v24  ;;  %v3784_v24 = vpack.c.bf16 %v1385_v48, %v1385_v48 }
 0x193   : > { %1472 = vrot.lane.b32.xlu1 %v1399_v55, %s3040_s24  ;;  %1470 = vrot.lane.b32.xlu0 %v1398_v5, %s3040_s24  ;;  %v3781_v55 = vpack.c.bf16 %v1383_v30, %v1383_v30 }
 0x194   : > { %1474 = vrot.lane.b32.xlu2 %v3660_v9, %s3040_s24 }
 0x195   : > { %v1027_v41 = vpop.permute.xlu1 %1026  ;;  %v1025_v42 = vpop.permute.xlu0 %1024 }
 0x196   : > { %1104 = vst.msk [vmem:[#allocation2 + $0x7c] sm:$0xf] %vm1072_vm3, %v1027_v41  ;;  %v1228_v46 = vpop.permute.xlu2 %1227 }
 0x197   : > { %1103 = vst.msk [vmem:[#allocation2 + $0x78] sm:$0xf] %vm1072_vm3, %v1025_v42 }
 0x198   : > { %1331 = vst.msk [vmem:[#allocation2 + $0x14] sm:$0xf] %vm1325_vm4, %v1228_v46  ;;  %v3797_v46 = vpack.c.bf16 %v1387_v23, %v1387_v23 }
 0x19b   : > { %1478 = vrot.lane.b32.xlu1 %v3671_v44, %s3040_s24  ;;  %1476 = vrot.lane.b32.xlu0 %v3673_v45, %s3040_s24 }
 0x19c   : > { %1480 = vrot.lane.b32.xlu2 %v3676_v47, %s3040_s24 }
 0x19d   : > { %v1033_v56 = vpop.permute.xlu1 %1032  ;;  %v1031_v57 = vpop.permute.xlu0 %1030 }
 0x19e   : > { %1107 = vst.msk [vmem:[#allocation2 + $0x88] sm:$0xf] %vm1072_vm3, %v1033_v56  ;;  %v1234_v61 = vpop.permute.xlu2 %1233  ;;  %v3802_v56 = vpack.c.bf16 %v1388_v43, %v1388_v43 }
 0x19f   : > { %1106 = vst.msk [vmem:[#allocation2 + $0x84] sm:$0xf] %vm1072_vm3, %v1031_v57  ;;  %v1390_v57 = vld [vmem:[%s3088_s19 + $0xf4] sm:$0xff] }
 0x1a0   : > { %1334 = vst.msk [vmem:[#allocation2 + $0x20] sm:$0xf] %vm1325_vm4, %v1234_v61 }
 0x1a3   : > { %1484 = vrot.lane.b32.xlu1 %v3689_v59, %s3040_s24  ;;  %1482 = vrot.lane.b32.xlu0 %v3691_v60, %s3040_s24 }
 0x1a4   : > { %1486 = vrot.lane.b32.xlu2 %v3694_v62, %s3040_s24 }
 0x1a5   : > { %v1220_v4 = vpop.permute.xlu1 %1219  ;;  %v1218_v7 = vpop.permute.xlu0 %1217 }
 0x1a6   : > { %1327 = vst.msk [vmem:[#allocation2 + $0x4] sm:$0xf] %vm1325_vm4, %v1220_v4  ;;  %v1240_v12 = vpop.permute.xlu2 %1239  ;;  %v3815_v4 = vpack.c.bf16 %v1390_v57, %v1390_v57  ;;  %v1869_v57 = vld [vmem:[%s3088_s19 + $0x2d] sm:$0xff] }
 0x1a7   : > { %1326 = vst.msk [vmem:[#allocation2] sm:$0xf] %vm1325_vm4, %v1218_v7  ;;  %v3817_v7 = vpack.c.bf16 %v1389_v58, %v1389_v58  ;;  %v1868_v58 = vld [vmem:[%s3088_s19 + $0x25] sm:$0xff] }
 0x1a8   : > { %1337 = vst.msk [vmem:[#allocation2 + $0x2c] sm:$0xf] %vm1325_vm4, %v1240_v12  ;;  %v3820_v12 = vpack.c.bf16 %v1391_v2, %v1391_v2  ;;  %v1878_v2 = vld [vmem:[%s3088_s19 + $0x75] sm:$0xff] }
 0x1ab   : > { %1490 = vrot.lane.b32.xlu1 %v3707_v10, %s3040_s24  ;;  %1488 = vrot.lane.b32.xlu0 %v3709_v11, %s3040_s24 }
 0x1ac   : > { %1492 = vrot.lane.b32.xlu2 %v3712_v13, %s3040_s24 }
 0x1ad   : > { %v1226_v19 = vpop.permute.xlu1 %1225  ;;  %v1224_v20 = vpop.permute.xlu0 %1223 }
 0x1ae   : > { %1330 = vst.msk [vmem:[#allocation2 + $0x10] sm:$0xf] %vm1325_vm4, %v1226_v19  ;;  %v1246_v27 = vpop.permute.xlu2 %1245 }
 0x1af   : > { %1329 = vst.msk [vmem:[#allocation2 + $0xc] sm:$0xf] %vm1325_vm4, %v1224_v20 }
 0x1b0   : > { %1340 = vst.msk [vmem:[#allocation2 + $0x38] sm:$0xf] %vm1325_vm4, %v1246_v27  ;;  %v1429_v27 = vpack.c.bf16 %v1393_v16, %v1393_v16  ;;  %v1904_v16 = vpack.c.bf16 %v1868_v58, %v1868_v58  ;;  %v2134_v58 = vld [vmem:[%s3088_s19 + $0x8e] sm:$0xff] }
 0x1b3   : > { %1496 = vrot.lane.b32.xlu1 %v3725_v22, %s3040_s24  ;;  %1494 = vrot.lane.b32.xlu0 %v3727_v25, %s3040_s24 }
 0x1b4   : > { %1498 = vrot.lane.b32.xlu2 %v3730_v29, %s3040_s24 }
 0x1b5   : > { %v1232_v35 = vpop.permute.xlu1 %1231  ;;  %v1230_v38 = vpop.permute.xlu0 %1229 }
 0x1b6   : > { %1333 = vst.msk [vmem:[#allocation2 + $0x1c] sm:$0xf] %vm1325_vm4, %v1232_v35  ;;  %v1252_v36 = vpop.permute.xlu2 %1251  ;;  %v3836_v35 = vpack.c.bf16 %v1394_v21, %v1394_v21  ;;  %v1879_v21 = vld [vmem:[%s3088_s19 + $0x7d] sm:$0xff] }
 0x1b7   : > { %1332 = vst.msk [vmem:[#allocation2 + $0x18] sm:$0xf] %vm1325_vm4, %v1230_v38  ;;  %v1396_v38 = vld [vmem:[%s3088_s19 + $0x124] sm:$0xff] }
 0x1b8   : > { %1343 = vst.msk [vmem:[#allocation2 + $0x44] sm:$0xf] %vm1325_vm4, %v1252_v36 }
 0x1bb   : > { %1502 = vrot.lane.b32.xlu1 %v3743_v37, %s3040_s24  ;;  %1500 = vrot.lane.b32.xlu0 %v3745_v26, %s3040_s24 }
 0x1bc   : > { %1504 = vrot.lane.b32.xlu2 %v3748_v50, %s3040_s24 }
 0x1bd   : > { %v1238_v0 = vpop.permute.xlu1 %1237  ;;  %v1236_v52 = vpop.permute.xlu0 %1235 }
 0x1be   : > { %1336 = vst.msk [vmem:[#allocation2 + $0x28] sm:$0xf] %vm1325_vm4, %v1238_v0  ;;  %v1258_v14 = vpop.permute.xlu2 %1257  ;;  %v3848_v0 = vpack.c.bf16 %v1396_v38, %v1396_v38  ;;  %v2122_v38 = vld [vmem:[%s3088_s19 + $0x2e] sm:$0xff] }
 0x1bf   : > { %1335 = vst.msk [vmem:[#allocation2 + $0x24] sm:$0xf] %vm1325_vm4, %v1236_v52  ;;  %v3850_v52 = vpack.c.bf16 %v1395_v40, %v1395_v40 }
 0x1c0   : > { %1346 = vst.msk [vmem:[#allocation2 + $0x50] sm:$0xf] %vm1325_vm4, %v1258_v14  ;;  %v3853_v14 = vpack.c.bf16 %v1397_v49, %v1397_v49  ;;  %v2158_v49 = vpack.c.bf16 %v2122_v38, %v2122_v38 }
 0x1c3   : > { %1508 = vrot.lane.b32.xlu1 %v3761_v15, %s3040_s24  ;;  %1506 = vrot.lane.b32.xlu0 %v3763_v3, %s3040_s24 }
 0x1c4   : > { %1510 = vrot.lane.b32.xlu2 %v3766_v31, %s3040_s24 }
 0x1c5   : > { %v1244_v51 = vpop.permute.xlu1 %1243  ;;  %v1242_v34 = vpop.permute.xlu0 %1241 }
 0x1c6   : > { %1339 = vst.msk [vmem:[#allocation2 + $0x34] sm:$0xf] %vm1325_vm4, %v1244_v51  ;;  %v1264_v5 = vpop.permute.xlu2 %1263 }
 0x1c7   : > { %1338 = vst.msk [vmem:[#allocation2 + $0x30] sm:$0xf] %vm1325_vm4, %v1242_v34 }
 0x1c8   : > { %1349 = vst.msk [vmem:[#allocation2 + $0x5c] sm:$0xf] %vm1325_vm4, %v1264_v5 }
 0x1cb   : > { %1514 = vrot.lane.b32.xlu1 %v3779_v6, %s3040_s24  ;;  %1512 = vrot.lane.b32.xlu0 %v3781_v55, %s3040_s24 }
 0x1cc   : > { %1516 = vrot.lane.b32.xlu2 %v3784_v24, %s3040_s24 }
 0x1cd   : > { %v1250_v41 = vpop.permute.xlu1 %1249  ;;  %v1248_v42 = vpop.permute.xlu0 %1247 }
 0x1ce   : > { %1342 = vst.msk [vmem:[#allocation2 + $0x40] sm:$0xf] %vm1325_vm4, %v1250_v41  ;;  %v1270_v54 = vpop.permute.xlu2 %1269 }
 0x1cf   : > { %1341 = vst.msk [vmem:[#allocation2 + $0x3c] sm:$0xf] %vm1325_vm4, %v1248_v42  ;;  %v2142_v42 = vld [vmem:[%s3088_s19 + $0xce] sm:$0xff] }
 0x1d0   : > { %1352 = vst.msk [vmem:[#allocation2 + $0x68] sm:$0xf] %vm1325_vm4, %v1270_v54 }
 0x1d3   : > { %1520 = vrot.lane.b32.xlu1 %v3797_v46, %s3040_s24  ;;  %1518 = vrot.lane.b32.xlu0 %v3799_v53, %s3040_s24 }
 0x1d4   : > { %1522 = vrot.lane.b32.xlu2 %v3802_v56, %s3040_s24 }
 0x1d5   : > { %v1256_v61 = vpop.permute.xlu1 %1255  ;;  %v1254_v1 = vpop.permute.xlu0 %1253 }
 0x1d6   : > { %1345 = vst.msk [vmem:[#allocation2 + $0x4c] sm:$0xf] %vm1325_vm4, %v1256_v61  ;;  %v1276_v8 = vpop.permute.xlu2 %1275 }
 0x1d7   : > { %1344 = vst.msk [vmem:[#allocation2 + $0x48] sm:$0xf] %vm1325_vm4, %v1254_v1 }
 0x1d8   : > { %1355 = vst.msk [vmem:[#allocation2 + $0x74] sm:$0xf] %vm1325_vm4, %v1276_v8  ;;  %v1905_v8 = vpack.c.bf16 %v1869_v57, %v1869_v57 }
 0x1db   : > { %1526 = vrot.lane.b32.xlu1 %v3815_v4, %s3040_s24  ;;  %1524 = vrot.lane.b32.xlu0 %v3817_v7, %s3040_s24 }
 0x1dc   : > { %1528 = vrot.lane.b32.xlu2 %v3820_v12, %s3040_s24 }
 0x1dd   : > { %v1262_v19 = vpop.permute.xlu1 %1261  ;;  %v1260_v20 = vpop.permute.xlu0 %1259 }
 0x1de   : > { %1348 = vst.msk [vmem:[#allocation2 + $0x58] sm:$0xf] %vm1325_vm4, %v1262_v19  ;;  %v1282_v33 = vpop.permute.xlu2 %1281  ;;  %v1914_v19 = vpack.c.bf16 %v1878_v2, %v1878_v2 }
 0x1df   : > { %1347 = vst.msk [vmem:[#allocation2 + $0x54] sm:$0xf] %vm1325_vm4, %v1260_v20  ;;  %v2121_v20 = vld [vmem:[%s3088_s19 + $0x26] sm:$0xff] }
 0x1e0   : > { %1358 = vst.msk [vmem:[#allocation2 + $0x80] sm:$0xf] %vm1325_vm4, %v1282_v33  ;;  %v2157_v40 = vpack.c.bf16 %v2121_v20, %v2121_v20  ;;  %v1892_v20 = vld [vmem:[%s3088_s19 + $0xe5] sm:$0xff] }
 0x1e1   : > { %v1928_v38 = vpack.c.bf16 %v1892_v20, %v1892_v20  ;;  %v1895_v20 = vld [vmem:[%s3088_s19 + $0xfd] sm:$0xff] }
 0x1e3   : > { %1532 = vrot.lane.b32.xlu1 %v1429_v27, %s3040_s24  ;;  %1530 = vrot.lane.b32.xlu0 %v3833_v32, %s3040_s24 }
 0x1e4   : > { %1534 = vrot.lane.b32.xlu2 %v3836_v35, %s3040_s24 }
 0x1e5   : > { %v1268_v36 = vpop.permute.xlu1 %1267  ;;  %v1266_v39 = vpop.permute.xlu0 %1265 }
 0x1e6   : > { %1351 = vst.msk [vmem:[#allocation2 + $0x64] sm:$0xf] %vm1325_vm4, %v1268_v36  ;;  %v1288_v63 = vpop.permute.xlu2 %1287  ;;  %v1915_v36 = vpack.c.bf16 %v1879_v21, %v1879_v21 }
 0x1e7   : > { %1350 = vst.msk [vmem:[#allocation2 + $0x60] sm:$0xf] %vm1325_vm4, %v1266_v39 }
 0x1e8   : > { %1361 = vst.msk [vmem:[#allocation2 + $0x8c] sm:$0xf] %vm1325_vm4, %v1288_v63  ;;  %v2132_v63 = vld [vmem:[%s3088_s19 + $0x7e] sm:$0xff] }
 0x1eb   : > { %1538 = vrot.lane.b32.xlu1 %v3848_v0, %s3040_s24  ;;  %1536 = vrot.lane.b32.xlu0 %v3850_v52, %s3040_s24 }
 0x1ec   : > { %1540 = vrot.lane.b32.xlu2 %v3853_v14, %s3040_s24 }
 0x1ed   : > { %v1274_v18 = vpop.permute.xlu1 %1273  ;;  %v1272_v30 = vpop.permute.xlu0 %1271 }
 0x1ee   : > { %1354 = vst.msk [vmem:[#allocation2 + $0x70] sm:$0xf] %vm1325_vm4, %v1274_v18  ;;  %v1475_v51 = vpop.permute.xlu2 %1474  ;;  %v2131_v18 = vld [vmem:[%s3088_s19 + $0x76] sm:$0xff] }
 0x1ef   : > { %1353 = vst.msk [vmem:[#allocation2 + $0x6c] sm:$0xf] %vm1325_vm4, %v1272_v30 }
 0x1f0   : > { %1581 = vst.msk [vmem:[#allocation2 + $0x8] sm:$0xf] %vm1578_vm5, %v1475_v51 }
 0x1f3   : > { %1725 = vrot.lane.b32.xlu1 %v3673_v45, %s3041_s25  ;;  %1723 = vrot.lane.b32.xlu0 %v3660_v9, %s3041_s25 }
 0x1f4   : > { %1727 = vrot.lane.b32.xlu2 %v3671_v44, %s3041_s25 }
 0x1f5   : > { %v1280_v34 = vpop.permute.xlu1 %1279  ;;  %v1278_v48 = vpop.permute.xlu0 %1277 }
 0x1f6   : > { %1357 = vst.msk [vmem:[#allocation2 + $0x7c] sm:$0xf] %vm1325_vm4, %v1280_v34  ;;  %v1481_v5 = vpop.permute.xlu2 %1480  ;;  %v2168_v34 = vpack.c.bf16 %v2132_v63, %v2132_v63 }
 0x1f7   : > { %1356 = vst.msk [vmem:[#allocation2 + $0x78] sm:$0xf] %vm1325_vm4, %v1278_v48  ;;  %v2167_v48 = vpack.c.bf16 %v2131_v18, %v2131_v18 }
 0x1f8   : > { %1584 = vst.msk [vmem:[#allocation2 + $0x14] sm:$0xf] %vm1578_vm5, %v1481_v5 }
 0x1fb   : > { %1731 = vrot.lane.b32.xlu1 %v3691_v60, %s3041_s25  ;;  %1729 = vrot.lane.b32.xlu0 %v3676_v47, %s3041_s25 }
 0x1fc   : > { %1733 = vrot.lane.b32.xlu2 %v3689_v59, %s3041_s25 }
 0x1fd   : > { %v1286_v45 = vpop.permute.xlu1 %1285  ;;  %v1284_v9 = vpop.permute.xlu0 %1283 }
 0x1fe   : > { %1360 = vst.msk [vmem:[#allocation2 + $0x88] sm:$0xf] %vm1325_vm4, %v1286_v45  ;;  %v1487_v44 = vpop.permute.xlu2 %1486  ;;  %v1891_v45 = vld [vmem:[%s3088_s19 + $0xdd] sm:$0xff] }
 0x1ff   : > { %1359 = vst.msk [vmem:[#allocation2 + $0x84] sm:$0xf] %vm1325_vm4, %v1284_v9  ;;  %v1890_v9 = vld [vmem:[%s3088_s19 + $0xd5] sm:$0xff] }
 0x200   : > { %1587 = vst.msk [vmem:[#allocation2 + $0x20] sm:$0xf] %vm1578_vm5, %v1487_v44 }
 0x203   : > { %1737 = vrot.lane.b32.xlu1 %v3709_v11, %s3041_s25  ;;  %1735 = vrot.lane.b32.xlu0 %v3694_v62, %s3041_s25 }
 0x204   : > { %1739 = vrot.lane.b32.xlu2 %v3707_v10, %s3041_s25 }
 0x205   : > { %v1473_v60 = vpop.permute.xlu1 %1472  ;;  %v1471_v47 = vpop.permute.xlu0 %1470 }
 0x206   : > { %1580 = vst.msk [vmem:[#allocation2 + $0x4] sm:$0xf] %vm1578_vm5, %v1473_v60  ;;  %v1493_v59 = vpop.permute.xlu2 %1492 }
 0x207   : > { %1579 = vst.msk [vmem:[#allocation2] sm:$0xf] %vm1578_vm5, %v1471_v47  ;;  %v2143_v47 = vld [vmem:[%s3088_s19 + $0xd6] sm:$0xff] }
 0x208   : > { %1590 = vst.msk [vmem:[#allocation2 + $0x2c] sm:$0xf] %vm1578_vm5, %v1493_v59  ;;  %v1927_v59 = vpack.c.bf16 %v1891_v45, %v1891_v45  ;;  %v2146_v45 = vld [vmem:[%s3088_s19 + $0xee] sm:$0xff] }
 0x20b   : > { %1743 = vrot.lane.b32.xlu1 %v3727_v25, %s3041_s25  ;;  %1741 = vrot.lane.b32.xlu0 %v3712_v13, %s3041_s25 }
 0x20c   : > { %1745 = vrot.lane.b32.xlu2 %v3725_v22, %s3041_s25 }
 0x20d   : > { %v1479_v11 = vpop.permute.xlu1 %1478  ;;  %v1477_v62 = vpop.permute.xlu0 %1476 }
 0x20e   : > { %1583 = vst.msk [vmem:[#allocation2 + $0x10] sm:$0xf] %vm1578_vm5, %v1479_v11  ;;  %v1499_v10 = vpop.permute.xlu2 %1498  ;;  %v1926_v11 = vpack.c.bf16 %v1890_v9, %v1890_v9 }
 0x20f   : > { %1582 = vst.msk [vmem:[#allocation2 + $0xc] sm:$0xf] %vm1578_vm5, %v1477_v62 }
 0x210   : > { %1593 = vst.msk [vmem:[#allocation2 + $0x38] sm:$0xf] %vm1578_vm5, %v1499_v10  ;;  %v2179_v10 = vpack.c.bf16 %v2143_v47, %v2143_v47  ;;  %v2152_v47 = vld [vmem:[%s3088_s19 + $0x11e] sm:$0xff] }
 0x213   : > { %1749 = vrot.lane.b32.xlu1 %v3745_v26, %s3041_s25  ;;  %1747 = vrot.lane.b32.xlu0 %v3730_v29, %s3041_s25 }
 0x214   : > { %1751 = vrot.lane.b32.xlu2 %v3743_v37, %s3041_s25 }
 0x215   : > { %v1485_v25 = vpop.permute.xlu1 %1484  ;;  %v1483_v13 = vpop.permute.xlu0 %1482 }
 0x216   : > { %1586 = vst.msk [vmem:[#allocation2 + $0x1c] sm:$0xf] %vm1578_vm5, %v1485_v25  ;;  %v1505_v22 = vpop.permute.xlu2 %1504  ;;  %v1870_v25 = vld [vmem:[%s3088_s19 + $0x35] sm:$0xff] }
 0x217   : > { %1585 = vst.msk [vmem:[#allocation2 + $0x18] sm:$0xf] %vm1578_vm5, %v1483_v13 }
 0x218   : > { %1596 = vst.msk [vmem:[#allocation2 + $0x44] sm:$0xf] %vm1578_vm5, %v1505_v22 }
 0x21b   : > { %1755 = vrot.lane.b32.xlu1 %v3763_v3, %s3041_s25  ;;  %1753 = vrot.lane.b32.xlu0 %v3748_v50, %s3041_s25 }
 0x21c   : > { %1757 = vrot.lane.b32.xlu2 %v3761_v15, %s3041_s25  ;;  %v1888_v15 = vld [vmem:[%s3088_s19 + $0xc5] sm:$0xff] }
 0x21d   : > { %v1491_v29 = vpop.permute.xlu1 %1490  ;;  %v1489_v26 = vpop.permute.xlu0 %1488  ;;  %v1924_v28 = vpack.c.bf16 %v1888_v15, %v1888_v15  ;;  %v1881_v15 = vld [vmem:[%s3088_s19 + $0x8d] sm:$0xff] }
 0x21e   : > { %1589 = vst.msk [vmem:[#allocation2 + $0x28] sm:$0xf] %vm1578_vm5, %v1491_v29  ;;  %v1511_v37 = vpop.permute.xlu2 %1510  ;;  %v1871_v29 = vld [vmem:[%s3088_s19 + $0x3d] sm:$0xff] }
 0x21f   : > { %1588 = vst.msk [vmem:[#allocation2 + $0x24] sm:$0xf] %vm1578_vm5, %v1489_v26  ;;  %v1906_v26 = vpack.c.bf16 %v1870_v25, %v1870_v25  ;;  %v2188_v25 = vpack.c.bf16 %v2152_v47, %v2152_v47 }
 0x220   : > { %1599 = vst.msk [vmem:[#allocation2 + $0x50] sm:$0xf] %vm1578_vm5, %v1511_v37 }
 0x223   : > { %1761 = vrot.lane.b32.xlu1 %v3781_v55, %s3041_s25  ;;  %1759 = vrot.lane.b32.xlu0 %v3766_v31, %s3041_s25  ;;  %v2141_v31 = vld [vmem:[%s3088_s19 + $0xc6] sm:$0xff] }
 0x224   : > { %1763 = vrot.lane.b32.xlu2 %v3779_v6, %s3041_s25  ;;  %v1889_v55 = vld [vmem:[%s3088_s19 + $0xcd] sm:$0xff]  ;;  %v2177_v43 = vpack.c.bf16 %v2141_v31, %v2141_v31 }
 0x225   : > { %v1497_v50 = vpop.permute.xlu1 %1496  ;;  %v1495_v3 = vpop.permute.xlu0 %1494 }
 0x226   : > { %1592 = vst.msk [vmem:[#allocation2 + $0x34] sm:$0xf] %vm1578_vm5, %v1497_v50  ;;  %v1517_v23 = vpop.permute.xlu2 %1516 }
 0x227   : > { %1591 = vst.msk [vmem:[#allocation2 + $0x30] sm:$0xf] %vm1578_vm5, %v1495_v3  ;;  %v1907_v3 = vpack.c.bf16 %v1871_v29, %v1871_v29 }
 0x228   : > { %1602 = vst.msk [vmem:[#allocation2 + $0x5c] sm:$0xf] %vm1578_vm5, %v1517_v23  ;;  %v1880_v23 = vld [vmem:[%s3088_s19 + $0x85] sm:$0xff] }
 0x22b   : > { %1767 = vrot.lane.b32.xlu1 %v3799_v53, %s3041_s25  ;;  %1765 = vrot.lane.b32.xlu0 %v3784_v24, %s3041_s25  ;;  %v1925_v53 = vpack.c.bf16 %v1889_v55, %v1889_v55  ;;  %v2178_v24 = vpack.c.bf16 %v2142_v42, %v2142_v42  ;;  %v2123_v55 = vld [vmem:[%s3088_s19 + $0x36] sm:$0xff] }
 0x22c   : > { %2016 = vrot.lane.b32.xlu2 %v1924_v28, %s3042_s26 }
 0x22d   : > { %v1503_v6 = vpop.permute.xlu1 %1502  ;;  %v1501_v41 = vpop.permute.xlu0 %1500 }
 0x22e   : > { %1595 = vst.msk [vmem:[#allocation2 + $0x40] sm:$0xf] %vm1578_vm5, %v1503_v6  ;;  %v1523_v54 = vpop.permute.xlu2 %1522  ;;  %v1917_v6 = vpack.c.bf16 %v1881_v15, %v1881_v15 }
 0x22f   : > { %1594 = vst.msk [vmem:[#allocation2 + $0x3c] sm:$0xf] %vm1578_vm5, %v1501_v41  ;;  %v1916_v41 = vpack.c.bf16 %v1880_v23, %v1880_v23 }
 0x230   : > { %1605 = vst.msk [vmem:[#allocation2 + $0x68] sm:$0xf] %vm1578_vm5, %v1523_v54  ;;  %v2124_v54 = vld [vmem:[%s3088_s19 + $0x3e] sm:$0xff] }
 0x233   : > { %2269 = vrot.lane.b32.xlu1 %v2177_v43, %s3043_s27  ;;  %2018 = vrot.lane.b32.xlu0 %v1925_v53, %s3042_s26  ;;  %v2159_v43 = vpack.c.bf16 %v2123_v55, %v2123_v55  ;;  %v2133_v53 = vld [vmem:[%s3088_s19 + $0x86] sm:$0xff] }
 0x234   : > { %2271 = vrot.lane.b32.xlu2 %v2178_v24, %s3043_s27 }
 0x235   : > { %v1509_v61 = vpop.permute.xlu1 %1508  ;;  %v1507_v1 = vpop.permute.xlu0 %1506 }
 0x236   : > { %1598 = vst.msk [vmem:[#allocation2 + $0x4c] sm:$0xf] %vm1578_vm5, %v1509_v61  ;;  %v1529_v17 = vpop.permute.xlu2 %1528  ;;  %v2169_v61 = vpack.c.bf16 %v2133_v53, %v2133_v53 }
 0x237   : > { %1597 = vst.msk [vmem:[#allocation2 + $0x48] sm:$0xf] %vm1578_vm5, %v1507_v1  ;;  %v2160_v1 = vpack.c.bf16 %v2124_v54, %v2124_v54 }
 0x238   : > { %1608 = vst.msk [vmem:[#allocation2 + $0x74] sm:$0xf] %vm1578_vm5, %v1529_v17 }
 0x23b   : > { %1978 = vrot.lane.b32.xlu1 %v1905_v8, %s3042_s26  ;;  %1976 = vrot.lane.b32.xlu0 %v1904_v16, %s3042_s26  ;;  %v2170_v8 = vpack.c.bf16 %v2134_v58, %v2134_v58 }
 0x23c   : > { %1996 = vrot.lane.b32.xlu2 %v1914_v19, %s3042_s26 }
 0x23d   : > { %v1515_v27 = vpop.permute.xlu1 %1514  ;;  %v1513_v33 = vpop.permute.xlu0 %1512 }
 0x23e   : > { %1601 = vst.msk [vmem:[#allocation2 + $0x58] sm:$0xf] %vm1578_vm5, %v1515_v27  ;;  %v1535_v39 = vpop.permute.xlu2 %1534 }
 0x23f   : > { %1600 = vst.msk [vmem:[#allocation2 + $0x54] sm:$0xf] %vm1578_vm5, %v1513_v33  ;;  %v1893_v33 = vld [vmem:[%s3088_s19 + $0xed] sm:$0xff] }
 0x240   : > { %1611 = vst.msk [vmem:[#allocation2 + $0x80] sm:$0xf] %vm1578_vm5, %v1535_v39 }
 0x243   : > { %2229 = vrot.lane.b32.xlu1 %v2157_v40, %s3043_s27  ;;  %1998 = vrot.lane.b32.xlu0 %v1915_v36, %s3042_s26  ;;  %v1898_v36 = vld [vmem:[%s3088_s19 + $0x115] sm:$0xff] }
 0x244   : > { %2231 = vrot.lane.b32.xlu2 %v2158_v49, %s3043_s27  ;;  %v2145_v49 = vld [vmem:[%s3088_s19 + $0xe6] sm:$0xff]  ;;  %v1934_v18 = vpack.c.bf16 %v1898_v36, %v1898_v36 }
 0x245   : > { %v1521_v30 = vpop.permute.xlu1 %1520  ;;  %v1519_v51 = vpop.permute.xlu0 %1518 }
 0x246   : > { %1604 = vst.msk [vmem:[#allocation2 + $0x64] sm:$0xf] %vm1578_vm5, %v1521_v30  ;;  %v1541_v5 = vpop.permute.xlu2 %1540 }
 0x247   : > { %1603 = vst.msk [vmem:[#allocation2 + $0x60] sm:$0xf] %vm1578_vm5, %v1519_v51  ;;  %v2181_v51 = vpack.c.bf16 %v2145_v49, %v2145_v49 }
 0x248   : > { %1614 = vst.msk [vmem:[#allocation2 + $0x8c] sm:$0xf] %vm1578_vm5, %v1541_v5  ;;  %v2151_v5 = vld [vmem:[%s3088_s19 + $0x116] sm:$0xff] }
 0x24b   : > { %2251 = vrot.lane.b32.xlu1 %v2168_v34, %s3043_s27  ;;  %2249 = vrot.lane.b32.xlu0 %v2167_v48, %s3043_s27 }
 0x24c   : > { %1769 = vrot.lane.b32.xlu2 %v3797_v46, %s3041_s25  ;;  %v2144_v46 = vld [vmem:[%s3088_s19 + $0xde] sm:$0xff] }
 0x24d   : > { %v1527_v44 = vpop.permute.xlu1 %1526  ;;  %v1525_v60 = vpop.permute.xlu0 %1524  ;;  %v2180_v37 = vpack.c.bf16 %v2144_v46, %v2144_v46  ;;  %v1873_v46 = vld [vmem:[%s3088_s19 + $0x4d] sm:$0xff] }
 0x24e   : > { %1607 = vst.msk [vmem:[#allocation2 + $0x70] sm:$0xf] %vm1578_vm5, %v1527_v44  ;;  %v1728_v62 = vpop.permute.xlu2 %1727 }
 0x24f   : > { %1606 = vst.msk [vmem:[#allocation2 + $0x6c] sm:$0xf] %vm1578_vm5, %v1525_v60 }
 0x250   : > { %1834 = vst.msk [vmem:[#allocation2 + $0x8] sm:$0xf] %vm1831_vm6, %v1728_v62 }
 0x253   : > { %2022 = vrot.lane.b32.xlu1 %v1927_v59, %s3042_s26  ;;  %2020 = vrot.lane.b32.xlu0 %v1926_v11, %s3042_s26  ;;  %v2187_v59 = vpack.c.bf16 %v2151_v5, %v2151_v5  ;;  %v2182_v11 = vpack.c.bf16 %v2146_v45, %v2146_v45  ;;  %v1874_v45 = vld [vmem:[%s3088_s19 + $0x55] sm:$0xff] }
 0x254   : > { %2273 = vrot.lane.b32.xlu2 %v2179_v10, %s3043_s27  ;;  %v2967_v10 = vld [vmem:[%s4347_s1 + $0x8] sm:$0xff]  ;;  %v1910_v47 = vpack.c.bf16 %v1874_v45, %v1874_v45 }
 0x255   : > { %v1533_v13 = vpop.permute.xlu1 %1532  ;;  %v1531_v22 = vpop.permute.xlu0 %1530 }
 0x256   : > { %1610 = vst.msk [vmem:[#allocation2 + $0x7c] sm:$0xf] %vm1578_vm5, %v1533_v13  ;;  %v1734_v50 = vpop.permute.xlu2 %1733  ;;  %v1872_v13 = vld [vmem:[%s3088_s19 + $0x45] sm:$0xff] }
 0x257   : > { %1609 = vst.msk [vmem:[#allocation2 + $0x78] sm:$0xf] %vm1578_vm5, %v1531_v22  ;;  %v2966_v22 = vld [vmem:[%s4347_s1] sm:$0xff] }
 0x258   : > { %1837 = vst.msk [vmem:[#allocation2 + $0x14] sm:$0xf] %vm1831_vm6, %v1734_v50  ;;  %v1909_v50 = vpack.c.bf16 %v1873_v46, %v1873_v46  ;;  %v1885_v46 = vld [vmem:[%s3088_s19 + $0xad] sm:$0xff] }
 0x25b   : > { %1980 = vrot.lane.b32.xlu1 %v1906_v26, %s3042_s26  ;;  %2275 = vrot.lane.b32.xlu0 %v2180_v37, %s3043_s27  ;;  %v1882_v37 = vld [vmem:[%s3088_s19 + $0x95] sm:$0xff] }
 0x25c   : > { %1982 = vrot.lane.b32.xlu2 %v1907_v3, %s3042_s26  ;;  %v1908_v3 = vpack.c.bf16 %v1872_v13, %v1872_v13  ;;  %v1918_v23 = vpack.c.bf16 %v1882_v37, %v1882_v37  ;;  %v2128_v37 = vld [vmem:[%s3088_s19 + $0x5e] sm:$0xff] }
 0x25d   : > { %v1539_v28 = vpop.permute.xlu1 %1538  ;;  %v1537_v31 = vpop.permute.xlu0 %1536 }
 0x25e   : > { %1613 = vst.msk [vmem:[#allocation2 + $0x88] sm:$0xf] %vm1578_vm5, %v1539_v28  ;;  %v1740_v42 = vpop.permute.xlu2 %1739  ;;  %v2125_v28 = vld [vmem:[%s3088_s19 + $0x46] sm:$0xff] }
 0x25f   : > { %1612 = vst.msk [vmem:[#allocation2 + $0x84] sm:$0xf] %vm1578_vm5, %v1537_v31  ;;  %v1883_v31 = vld [vmem:[%s3088_s19 + $0x9d] sm:$0xff] }
 0x260   : > { %1840 = vst.msk [vmem:[#allocation2 + $0x20] sm:$0xf] %vm1831_vm6, %v1740_v42  ;;  %v2161_v42 = vpack.c.bf16 %v2125_v28, %v2125_v28  ;;  %v2164_v28 = vpack.c.bf16 %v2128_v37, %v2128_v37  ;;  %v2139_v37 = vld [vmem:[%s3088_s19 + $0xb6] sm:$0xff] }
 0x263   : > { %2002 = vrot.lane.b32.xlu1 %v1917_v6, %s3042_s26  ;;  %2000 = vrot.lane.b32.xlu0 %v1916_v41, %s3042_s26  ;;  %v2126_v41 = vld [vmem:[%s3088_s19 + $0x4e] sm:$0xff] }
 0x264   : > { %2233 = vrot.lane.b32.xlu2 %v2159_v43, %s3043_s27  ;;  %v1919_v43 = vpack.c.bf16 %v1883_v31, %v1883_v31  ;;  %v2162_v54 = vpack.c.bf16 %v2126_v41, %v2126_v41  ;;  %v2138_v41 = vld [vmem:[%s3088_s19 + $0xae] sm:$0xff] }
 0x265   : > { %v1726_v24 = vpop.permute.xlu1 %1725  ;;  %v1724_v57 = vpop.permute.xlu0 %1723 }
 0x266   : > { %1833 = vst.msk [vmem:[#allocation2 + $0x4] sm:$0xf] %vm1831_vm6, %v1726_v24  ;;  %v1746_v2 = vpop.permute.xlu2 %1745  ;;  %v2136_v24 = vld [vmem:[%s3088_s19 + $0x9e] sm:$0xff] }
 0x267   : > { %1832 = vst.msk [vmem:[#allocation2] sm:$0xf] %vm1831_vm6, %v1724_v57  ;;  %v2135_v57 = vld [vmem:[%s3088_s19 + $0x96] sm:$0xff] }
 0x268   : > { %1843 = vst.msk [vmem:[#allocation2 + $0x2c] sm:$0xf] %vm1831_vm6, %v1746_v2  ;;  %v2171_v2 = vpack.c.bf16 %v2135_v57, %v2135_v57 }
 0x26b   : > { %2253 = vrot.lane.b32.xlu1 %v2169_v61, %s3043_s27  ;;  %2235 = vrot.lane.b32.xlu0 %v2160_v1, %s3043_s27  ;;  %v2172_v1 = vpack.c.bf16 %v2136_v24, %v2136_v24  ;;  %v2174_v24 = vpack.c.bf16 %v2138_v41, %v2138_v41 }
 0x26c   : > { %2255 = vrot.lane.b32.xlu2 %v2170_v8, %s3043_s27 }
 0x26d   : > { %v1732_v16 = vpop.permute.xlu1 %1731  ;;  %v1730_v17 = vpop.permute.xlu0 %1729 }
 0x26e   : > { %1836 = vst.msk [vmem:[#allocation2 + $0x10] sm:$0xf] %vm1831_vm6, %v1732_v16  ;;  %v1752_v19 = vpop.permute.xlu2 %1751 }
 0x26f   : > { %1835 = vst.msk [vmem:[#allocation2 + $0xc] sm:$0xf] %vm1831_vm6, %v1730_v17 }
 0x270   : > { %1846 = vst.msk [vmem:[#allocation2 + $0x38] sm:$0xf] %vm1831_vm6, %v1752_v19 }
 0x273   : > { %1773 = vrot.lane.b32.xlu1 %v3817_v7, %s3041_s25  ;;  %1771 = vrot.lane.b32.xlu0 %v3802_v56, %s3041_s25  ;;  %v1929_v7 = vpack.c.bf16 %v1893_v33, %v1893_v33  ;;  %v1899_v56 = vld [vmem:[%s3088_s19 + $0x11d] sm:$0xff]  ;;  %v1900_v33 = vld [vmem:[%s3088_s19 + $0x125] sm:$0xff] }
 0x274   : > { %1783 = vrot.lane.b32.xlu2 %v3836_v35, %s3041_s25  ;;  %v1935_v63 = vpack.c.bf16 %v1899_v56, %v1899_v56  ;;  %v1901_v56 = vld [vmem:[%s3088_s19 + $0x12d] sm:$0xff] }
 0x275   : > { %v1738_v21 = vpop.permute.xlu1 %1737  ;;  %v1736_v27 = vpop.permute.xlu0 %1735 }
 0x276   : > { %1839 = vst.msk [vmem:[#allocation2 + $0x1c] sm:$0xf] %vm1831_vm6, %v1738_v21  ;;  %v1758_v40 = vpop.permute.xlu2 %1757  ;;  %v1894_v21 = vld [vmem:[%s3088_s19 + $0xf5] sm:$0xff] }
 0x277   : > { %1838 = vst.msk [vmem:[#allocation2 + $0x18] sm:$0xf] %vm1831_vm6, %v1736_v27 }
 0x278   : > { %1849 = vst.msk [vmem:[#allocation2 + $0x44] sm:$0xf] %vm1831_vm6, %v1758_v40  ;;  %v1930_v40 = vpack.c.bf16 %v1894_v21, %v1894_v21  ;;  %v1902_v21 = vld [vmem:[%s3088_s19 + $0x135] sm:$0xff] }
 0x27b   : > { %2024 = vrot.lane.b32.xlu1 %v1928_v38, %s3042_s26  ;;  %1785 = vrot.lane.b32.xlu0 %v3850_v52, %s3041_s25  ;;  %v2414_v52 = vld [vmem:[%s4347_s1 + $0x10] sm:$0x3]  ;;  %v1931_v38 = vpack.c.bf16 %v1895_v20, %v1895_v20 }
 0x27c   : > { %2026 = vrot.lane.b32.xlu2 %v1929_v7, %s3042_s26  ;;  %v2518_v34 = vunpack.c.l.b16 %v2414_v52  ;;  %v1936_v7 = vpack.c.bf16 %v1900_v33, %v1900_v33  ;;  %v2154_v52 = vld [vmem:[%s3088_s19 + $0x12e] sm:$0xff] }
 0x27d   : > { %v1744_v39 = vpop.permute.xlu1 %1743  ;;  %v1742_v35 = vpop.permute.xlu0 %1741 }
 0x27e   : > { %1842 = vst.msk [vmem:[#allocation2 + $0x28] sm:$0xf] %vm1831_vm6, %v1744_v39  ;;  %v1764_v30 = vpop.permute.xlu2 %1763  ;;  %v2521_v48 = vpack.c.b16 %v2518_v34, %v2518_v34 }
 0x27f   : > { %1841 = vst.msk [vmem:[#allocation2 + $0x24] sm:$0xf] %vm1831_vm6, %v1742_v35  ;;  %v2148_v35 = vld [vmem:[%s3088_s19 + $0xfe] sm:$0xff] }
 0x280   : > { %1852 = vst.msk [vmem:[#allocation2 + $0x50] sm:$0xf] %vm1831_vm6, %v1764_v30  ;;  %v2581_v60 = vsel %vm2579_vm7, %v2521_v48, 0  ;;  %v2184_v30 = vpack.c.bf16 %v2148_v35, %v2148_v35 }
 0x281   : > { %2969 = vmatpush.bf16.msra.mxu2 %v2581_v60  ;;  %2588 = vmatpush.bf16.msra.mxu0 %v2581_v60 }
 0x282   : > { %2968 = vmatpush.bf16.msra.mxu1 %v2581_v60  ;;  %2970 = vmatpush.bf16.msra.mxu3 %v2581_v60 }
 0x283   : > { %2038 = vrot.lane.b32.xlu1 %v1935_v63, %s3042_s26  ;;  %2036 = vrot.lane.b32.xlu0 %v1934_v18, %s3042_s26  ;;  %v1937_v63 = vpack.c.bf16 %v1901_v56, %v1901_v56 }
 0x284   : > { %2277 = vrot.lane.b32.xlu2 %v2181_v51, %s3043_s27  ;;  %v2153_v51 = vld [vmem:[%s3088_s19 + $0x126] sm:$0xff] }
 0x285   : > { %v1750_v9 = vpop.permute.xlu1 %1749  ;;  %v1748_v44 = vpop.permute.xlu0 %1747  ;;  %2972 = vmatpush.bf16.msra.mxu2 %v2967_v10  ;;  %2589 = vmatpush.bf16.msra.mxu0 %v2967_v10 }
 0x286   : > { %1845 = vst.msk [vmem:[#allocation2 + $0x34] sm:$0xf] %vm1831_vm6, %v1750_v9  ;;  %v2017_v62 = vpop.permute.xlu2 %2016  ;;  %2971 = vmatpush.bf16.msra.mxu1 %v2967_v10  ;;  %2973 = vmatpush.bf16.msra.mxu3 %v2967_v10  ;;  %v2190_v9 = vpack.c.bf16 %v2154_v52, %v2154_v52 }
 0x287   : > { %1844 = vst.msk [vmem:[#allocation2 + $0x30] sm:$0xf] %vm1831_vm6, %v1748_v44  ;;  %v2189_v44 = vpack.c.bf16 %v2153_v51, %v2153_v51 }
 0x288   : > { %2105 = vst.msk [vmem:[#allocation2 + $0x50] sm:$0xf] %vm2084_vm8, %v2017_v62 }
 0x289   : > { %2975 = vmatpush.bf16.msra.mxu2 %v2966_v22  ;;  %2590 = vmatpush.bf16.msra.mxu0 %v2966_v22 }
 0x28a   : > { %2974 = vmatpush.bf16.msra.mxu1 %v2966_v22  ;;  %2976 = vmatpush.bf16.msra.mxu3 %v2966_v22 }
 0x28b   : > { %2289 = vrot.lane.b32.xlu1 %v2187_v59, %s3043_s27  ;;  %2279 = vrot.lane.b32.xlu0 %v2182_v11, %s3043_s27  ;;  %v1884_v59 = vld [vmem:[%s3088_s19 + $0xa5] sm:$0xff]  ;;  %v1875_v11 = vld [vmem:[%s3088_s19 + $0x5d] sm:$0xff] }
 0x28c   : > { %2291 = vrot.lane.b32.xlu2 %v2188_v25, %s3043_s27  ;;  %v1920_v13 = vpack.c.bf16 %v1884_v59, %v1884_v59  ;;  %v1911_v22 = vpack.c.bf16 %v1875_v11, %v1875_v11  ;;  %v1887_v11 = vld [vmem:[%s3088_s19 + $0xbd] sm:$0xff] }
 0x28d   : > { %v1756_v29 = vpop.permute.xlu1 %1755  ;;  %v1754_v26 = vpop.permute.xlu0 %1753 }
 0x28e   : > { %1848 = vst.msk [vmem:[#allocation2 + $0x40] sm:$0xf] %vm1831_vm6, %v1756_v29  ;;  %v2272_v15 = vpop.permute.xlu2 %2271 }
 0x28f   : > { %1847 = vst.msk [vmem:[#allocation2 + $0x3c] sm:$0xf] %vm1831_vm6, %v1754_v26  ;;  %v1921_v26 = vpack.c.bf16 %v1885_v46, %v1885_v46  ;;  %v2129_v46 = vld [vmem:[%s3088_s19 + $0x66] sm:$0xff] }
 0x293   : > { %1986 = vrot.lane.b32.xlu1 %v1909_v50, %s3042_s26  ;;  %1984 = vrot.lane.b32.xlu0 %v1908_v3, %s3042_s26  ;;  %v2127_v50 = vld [vmem:[%s3088_s19 + $0x56] sm:$0xff] }
 0x294   : > { %2004 = vrot.lane.b32.xlu2 %v1918_v23, %s3042_s26  ;;  %v2137_v23 = vld [vmem:[%s3088_s19 + $0xa6] sm:$0xff]  ;;  %v2163_v31 = vpack.c.bf16 %v2127_v50, %v2127_v50  ;;  %v2130_v50 = vld [vmem:[%s3088_s19 + $0x6e] sm:$0xff] }
 0x295   : > { %v1762_v55 = vpop.permute.xlu1 %1761  ;;  %v1760_v6 = vpop.permute.xlu0 %1759 }
 0x296   : > { %1851 = vst.msk [vmem:[#allocation2 + $0x4c] sm:$0xf] %vm1831_vm6, %v1762_v55  ;;  %v1997_v53 = vpop.permute.xlu2 %1996 }
 0x297   : > { %1850 = vst.msk [vmem:[#allocation2 + $0x48] sm:$0xf] %vm1831_vm6, %v1760_v6  ;;  %v2173_v6 = vpack.c.bf16 %v2137_v23, %v2137_v23 }
 0x298   : > { %2095 = vst.msk [vmem:[#allocation2 + $0x28] sm:$0xf] %vm2084_vm8, %v1997_v53 }
 0x29b   : > { %2237 = vrot.lane.b32.xlu1 %v2161_v42, %s3043_s27  ;;  %2006 = vrot.lane.b32.xlu0 %v1919_v43, %s3042_s26 }
 0x29c   : > { %2239 = vrot.lane.b32.xlu2 %v2162_v54, %s3043_s27  ;;  %v1644_v54 = vld [vmem:[%s3088_s19 + $0x10c] sm:$0xff] }
 0x29d   : > { %v1768_v58 = vpop.permute.xlu1 %1767  ;;  %v1766_v61 = vpop.permute.xlu0 %1765 }
 0x29e   : > { %1854 = vst.msk [vmem:[#allocation2 + $0x58] sm:$0xf] %vm1831_vm6, %v1768_v58  ;;  %v2232_v8 = vpop.permute.xlu2 %2231  ;;  %v1680_v58 = vpack.c.bf16 %v1644_v54, %v1644_v54 }
 0x29f   : > { %1853 = vst.msk [vmem:[#allocation2 + $0x54] sm:$0xf] %vm1831_vm6, %v1766_v61  ;;  %v1650_v61 = vld [vmem:[%s3088_s19 + $0x13c] sm:$0xff] }
 0x2a3   : > { %2259 = vrot.lane.b32.xlu1 %v2172_v1, %s3043_s27  ;;  %2257 = vrot.lane.b32.xlu0 %v2171_v2, %s3043_s27  ;;  %v1649_v1 = vld [vmem:[%s3088_s19 + $0x134] sm:$0xff] }
 0x2a4   : > { %1775 = vrot.lane.b32.xlu2 %v3815_v4, %s3041_s25 }
 0x2a5   : > { %v2270_v16 = vpop.permute.xlu1 %2269  ;;  %v2019_v17 = vpop.permute.xlu0 %2018 }
 0x2a6   : > { %2358 = vst.msk [vmem:[#allocation2 + $0x50] sm:$0xf] %vm2337_vm9, %v2270_v16  ;;  %v1770_v19 = vpop.permute.xlu2 %1769  ;;  %v1896_v16 = vld [vmem:[%s3088_s19 + $0x105] sm:$0xff] }
 0x2a7   : > { %2106 = vst.msk [vmem:[#allocation2 + $0x54] sm:$0xf] %vm2084_vm8, %v2019_v17  ;;  %v1686_v17 = vpack.c.bf16 %v1650_v61, %v1650_v61 }
 0x2a8   : > { %2359 = vst.msk [vmem:[#allocation2 + $0x54] sm:$0xf] %vm2337_vm9, %v2272_v15 }
 0x2a9   : > { %1855 = vst.msk [vmem:[#allocation2 + $0x5c] sm:$0xf] %vm1831_vm6, %v1770_v19  ;;  %v1685_v19 = vpack.c.bf16 %v1649_v1, %v1649_v1 }
 0x2ab   : > { %1787 = vrot.lane.b32.xlu1 %v3848_v0, %s3041_s25  ;;  %1777 = vrot.lane.b32.xlu0 %v3820_v12, %s3041_s25 }
 0x2ac   : > { %1789 = vrot.lane.b32.xlu2 %v3853_v14, %s3041_s25  ;;  %v2147_v14 = vld [vmem:[%s3088_s19 + $0xf6] sm:$0xff] }
 0x2ad   : > { %v1979_v27 = vpop.permute.xlu1 %1978  ;;  %v1977_v4 = vpop.permute.xlu0 %1976  ;;  %v2183_v49 = vpack.c.bf16 %v2147_v14, %v2147_v14 }
 0x2ae   : > { %2086 = vst.msk [vmem:[#allocation2 + $0x4] sm:$0xf] %vm2084_vm8, %v1979_v27  ;;  %v2274_v12 = vpop.permute.xlu2 %2273  ;;  %v1897_v27 = vld [vmem:[%s3088_s19 + $0x10d] sm:$0xff] }
 0x2af   : > { %2085 = vst.msk [vmem:[#allocation2] sm:$0xf] %vm2084_vm8, %v1977_v4  ;;  %v2958_v0 = vld [vmem:[#allocation2 + $0x50] sm:$0xff] }
 0x2b0   : > { %2339 = vst.msk [vmem:[#allocation2 + $0x4] sm:$0xf] %vm2337_vm9, %v2232_v8  ;;  %2938 = vmatmul.msk.bf16.vlgmr.msra.gmra.mxu2 %vm2524_vm10, %v2958_v0 }
 0x2b3   : > { %2030 = vrot.lane.b32.xlu1 %v1931_v38, %s3042_s26  ;;  %2028 = vrot.lane.b32.xlu0 %v1930_v40, %s3042_s26  ;;  %v1903_v40 = vld [vmem:[%s3088_s19 + $0x13d] sm:$0xff] }
 0x2b4   : > { %2040 = vrot.lane.b32.xlu2 %v1936_v7, %s3042_s26  ;;  %v1933_v7 = vpack.c.bf16 %v1897_v27, %v1897_v27  ;;  %v1939_v56 = vpack.c.bf16 %v1903_v40, %v1903_v40 }
 0x2b5   : > { %v2230_v36 = vpop.permute.xlu1 %2229  ;;  %v1999_v39 = vpop.permute.xlu0 %1998 }
 0x2b6   : > { %2338 = vst.msk [vmem:[#allocation2] sm:$0xf] %vm2337_vm9, %v2230_v36  ;;  %v1983_v18 = vpop.permute.xlu2 %1982  ;;  %v2150_v36 = vld [vmem:[%s3088_s19 + $0x10e] sm:$0xff] }
 0x2b7   : > { %2096 = vst.msk [vmem:[#allocation2 + $0x2c] sm:$0xf] %vm2084_vm8, %v1999_v39  ;;  %v2149_v39 = vld [vmem:[%s3088_s19 + $0x106] sm:$0xff] }
 0x2b8   : > { %2088 = vst.msk [vmem:[#allocation2 + $0xc] sm:$0xf] %vm2084_vm8, %v1983_v18  ;;  %v2186_v18 = vpack.c.bf16 %v2150_v36, %v2150_v36 }
 0x2bb   : > { %2281 = vrot.lane.b32.xlu1 %v2183_v49, %s3043_s27  ;;  %2042 = vrot.lane.b32.xlu0 %v1937_v63, %s3042_s26  ;;  %v2155_v63 = vld [vmem:[%s3088_s19 + $0x136] sm:$0xff] }
 0x2bc   : > { %2283 = vrot.lane.b32.xlu2 %v2184_v30, %s3043_s27  ;;  %v2185_v30 = vpack.c.bf16 %v2149_v39, %v2149_v39  ;;  %v2191_v51 = vpack.c.bf16 %v2155_v63, %v2155_v63 }
 0x2bd   : > { %v2252_v34 = vpop.permute.xlu1 %2251  ;;  %v2250_v48 = vpop.permute.xlu0 %2249  ;;  %v2948_v5 = vld [vmem:[#allocation2] sm:$0xff] }
 0x2be   : > { %2349 = vst.msk [vmem:[#allocation2 + $0x2c] sm:$0xf] %vm2337_vm9, %v2252_v34  ;;  %2928 = vmatmul.msk.bf16.vlgmr.msra.gmra.mxu0 %vm2524_vm10, %v2948_v5  ;;  %v2234_v60 = vpop.permute.xlu2 %2233  ;;  %v1876_v34 = vld [vmem:[%s3088_s19 + $0x65] sm:$0xff] }
 0x2bf   : > { %2348 = vst.msk [vmem:[#allocation2 + $0x28] sm:$0xf] %vm2337_vm9, %v2250_v48  ;;  %v2156_v48 = vld [vmem:[%s3088_s19 + $0x13e] sm:$0xff] }
 0x2c3   : > { %2295 = vrot.lane.b32.xlu1 %v2190_v9, %s3043_s27  ;;  %2293 = vrot.lane.b32.xlu0 %v2189_v44, %s3043_s27  ;;  %v1877_v9 = vld [vmem:[%s3088_s19 + $0x6d] sm:$0xff]  ;;  %v1912_v44 = vpack.c.bf16 %v1876_v34, %v1876_v34 }
 0x2c4   : > { %1988 = vrot.lane.b32.xlu2 %v1910_v47, %s3042_s26  ;;  %v1913_v59 = vpack.c.bf16 %v1877_v9, %v1877_v9 }
 0x2c5   : > { %v2023_v62 = vpop.permute.xlu1 %2022  ;;  %v2021_v10 = vpop.permute.xlu0 %2020 }
 0x2c6   : > { %2108 = vst.msk [vmem:[#allocation2 + $0x5c] sm:$0xf] %vm2084_vm8, %v2023_v62  ;;  %v2953_v25 = vld [vmem:[#allocation2 + $0x28] sm:$0xff]  ;;  %v2256_v29 = vpop.permute.xlu2 %2255  ;;  %v1886_v62 = vld [vmem:[%s3088_s19 + $0xb5] sm:$0xff] }
 0x2c7   : > { %2107 = vst.msk [vmem:[#allocation2 + $0x58] sm:$0xf] %vm2084_vm8, %v2021_v10  ;;  %2933 = vmatmul.msk.bf16.vlgmr.msra.gmra.mxu1 %vm2524_vm10, %v2953_v25 }
 0x2c8   : > { %2360 = vst.msk [vmem:[#allocation2 + $0x58] sm:$0xf] %vm2337_vm9, %v2274_v12  ;;  %v1938_v12 = vpack.c.bf16 %v1902_v21, %v1902_v21 }
 0x2cb   : > { %2008 = vrot.lane.b32.xlu1 %v1920_v13, %s3042_s26  ;;  %1990 = vrot.lane.b32.xlu0 %v1911_v22, %s3042_s26  ;;  %v1923_v13 = vpack.c.bf16 %v1887_v11, %v1887_v11  ;;  %v1922_v22 = vpack.c.bf16 %v1886_v62, %v1886_v62 }
 0x2cc   : > { %2010 = vrot.lane.b32.xlu2 %v1921_v26, %s3042_s26  ;;  %v2165_v26 = vpack.c.bf16 %v2129_v46, %v2129_v46 }
 0x2cd   : > { %v1981_v3 = vpop.permute.xlu1 %1980  ;;  %v2276_v15 = vpop.permute.xlu0 %2275 }
 0x2ce   : > { %2087 = vst.msk [vmem:[#allocation2 + $0x8] sm:$0xf] %vm2084_vm8, %v1981_v3  ;;  %v1784_v55 = vpop.permute.xlu2 %1783 }
 0x2cf   : > { %2361 = vst.msk [vmem:[#allocation2 + $0x5c] sm:$0xf] %vm2337_vm9, %v2276_v15 }
 0x2d0   : > { %2340 = vst.msk [vmem:[#allocation2 + $0x8] sm:$0xf] %vm2337_vm9, %v2234_v60  ;;  %v2192_v60 = vpack.c.bf16 %v2156_v48, %v2156_v48 }
 0x2d1   : > { %1862 = vst.msk [vmem:[#allocation2 + $0x78] sm:$0xf] %vm1831_vm6, %v1784_v55  ;;  %v2175_v55 = vpack.c.bf16 %v2139_v37, %v2139_v37 }
 0x2d3   : > { %2243 = vrot.lane.b32.xlu1 %v2164_v28, %s3043_s27  ;;  %2241 = vrot.lane.b32.xlu0 %v2163_v31, %s3043_s27  ;;  %v2140_v31 = vld [vmem:[%s3088_s19 + $0xbe] sm:$0xff] }
 0x2d4   : > { %2261 = vrot.lane.b32.xlu2 %v2173_v6, %s3043_s27  ;;  %v2166_v6 = vpack.c.bf16 %v2130_v50, %v2130_v50 }
 0x2d5   : > { %v2003_v42 = vpop.permute.xlu1 %2002  ;;  %v2001_v43 = vpop.permute.xlu0 %2000 }
 0x2d6   : > { %2098 = vst.msk [vmem:[#allocation2 + $0x34] sm:$0xf] %vm2084_vm8, %v2003_v42  ;;  %v2959_v53 = vld [vmem:[#allocation2 + $0x58] sm:$0xff]  ;;  %v2027_v57 = vpop.permute.xlu2 %2026  ;;  %v2176_v42 = vpack.c.bf16 %v2140_v31, %v2140_v31 }
 0x2d7   : > { %2097 = vst.msk [vmem:[#allocation2 + $0x30] sm:$0xf] %vm2084_vm8, %v2001_v43  ;;  %2939 = vmatmul.msk.bf16.gmra.mxu2 %vm2524_vm10, %v2959_v53 }
 0x2d8   : > { %2351 = vst.msk [vmem:[#allocation2 + $0x34] sm:$0xf] %vm2337_vm9, %v2256_v29 }
 0x2db   : > { %1779 = vrot.lane.b32.xlu1 %v3833_v32, %s3041_s25  ;;  %2263 = vrot.lane.b32.xlu0 %v2174_v24, %s3043_s27  ;;  %v1932_v32 = vpack.c.bf16 %v1896_v16, %v1896_v16 }
 0x2dc   : > { %1781 = vrot.lane.b32.xlu2 %v1680_v58, %s3041_s25 }
 0x2dd   : > { %v2254_v2 = vpop.permute.xlu1 %2253  ;;  %v2236_v8 = vpop.permute.xlu0 %2235 }
 0x2de   : > { %2350 = vst.msk [vmem:[#allocation2 + $0x30] sm:$0xf] %vm2337_vm9, %v2254_v2  ;;  %v2278_v20 = vpop.permute.xlu2 %2277 }
 0x2df   : > { %2341 = vst.msk [vmem:[#allocation2 + $0xc] sm:$0xf] %vm2337_vm9, %v2236_v8 }
 0x2e3   : > { %1793 = vrot.lane.b32.xlu1 %v1686_v17, %s3041_s25  ;;  %1791 = vrot.lane.b32.xlu0 %v1685_v19, %s3041_s25 }
 0x2e4   : > { %2032 = vrot.lane.b32.xlu2 %v1932_v32, %s3042_s26 }
 0x2e5   : > { %v1774_v4 = vpop.permute.xlu1 %1773  ;;  %v1772_v33 = vpop.permute.xlu0 %1771  ;;  %v2954_v0 = vld [vmem:[#allocation2 + $0x30] sm:$0xff] }
 0x2e6   : > { %1857 = vst.msk [vmem:[#allocation2 + $0x64] sm:$0xf] %vm1831_vm6, %v1774_v4  ;;  %v2949_v38 = vld [vmem:[#allocation2 + $0x8] sm:$0xff]  ;;  %2934 = vmatmul.msk.bf16.gmra.mxu1 %vm2524_vm10, %v2954_v0  ;;  %v2292_v14 = vpop.permute.xlu2 %2291  ;;  %v4222_v4 = vld [vmem:[%s4348_s2] ss:$0 sm:$0xff] }
 0x2e7   : > { %1856 = vst.msk [vmem:[#allocation2 + $0x60] sm:$0xf] %vm1831_vm6, %v1772_v33  ;;  %2929 = vmatmul.msk.bf16.gmra.mxu0 %vm2524_vm10, %v2949_v38 }
 0x2e8   : > { %2110 = vst.msk [vmem:[#allocation2 + $0x64] sm:$0xf] %vm2084_vm8, %v2027_v57 }
 0x2eb   : > { %2044 = vrot.lane.b32.xlu1 %v1938_v12, %s3042_s26  ;;  %2034 = vrot.lane.b32.xlu0 %v1933_v7, %s3042_s26 }
 0x2ec   : > { %2046 = vrot.lane.b32.xlu2 %v1939_v56, %s3042_s26 }
 0x2ed   : > { %v2025_v35 = vpop.permute.xlu1 %2024  ;;  %v1786_v49 = vpop.permute.xlu0 %1785 }
 0x2ee   : > { %2109 = vst.msk [vmem:[#allocation2 + $0x60] sm:$0xf] %vm2084_vm8, %v2025_v35  ;;  %v2005_v52 = vpop.permute.xlu2 %2004 }
 0x2ef   : > { %1863 = vst.msk [vmem:[#allocation2 + $0x7c] sm:$0xf] %vm1831_vm6, %v1786_v49 }
 0x2f0   : > { %2362 = vst.msk [vmem:[#allocation2 + $0x60] sm:$0xf] %vm2337_vm9, %v2278_v20 }
 0x2f1   : > { %2099 = vst.msk [vmem:[#allocation2 + $0x38] sm:$0xf] %vm2084_vm8, %v2005_v52 }
 0x2f3   : > { %2287 = vrot.lane.b32.xlu1 %v2186_v18, %s3043_s27  ;;  %2285 = vrot.lane.b32.xlu0 %v2185_v30, %s3043_s27 }
 0x2f4   : > { %2297 = vrot.lane.b32.xlu2 %v2191_v51, %s3043_s27 }
 0x2f5   : > { %v2039_v5 = vpop.permute.xlu1 %2038  ;;  %v2037_v45 = vpop.permute.xlu0 %2036 }
 0x2f6   : > { %2116 = vst.msk [vmem:[#allocation2 + $0x7c] sm:$0xf] %vm2084_vm8, %v2039_v5  ;;  %v2240_v47 = vpop.permute.xlu2 %2239 }
 0x2f7   : > { %2115 = vst.msk [vmem:[#allocation2 + $0x78] sm:$0xf] %vm2084_vm8, %v2037_v45 }
 0x2f8   : > { %2369 = vst.msk [vmem:[#allocation2 + $0x7c] sm:$0xf] %vm2337_vm9, %v2292_v14 }
 0x2fb   : > { %1992 = vrot.lane.b32.xlu1 %v1912_v44, %s3042_s26  ;;  %2299 = vrot.lane.b32.xlu0 %v2192_v60, %s3043_s27 }
 0x2fc   : > { %1994 = vrot.lane.b32.xlu2 %v1913_v59, %s3042_s26 }
 0x2fd   : > { %v2290_v10 = vpop.permute.xlu1 %2289  ;;  %v2280_v25 = vpop.permute.xlu0 %2279 }
 0x2fe   : > { %2368 = vst.msk [vmem:[#allocation2 + $0x78] sm:$0xf] %vm2337_vm9, %v2290_v10  ;;  %v1776_v29 = vpop.permute.xlu2 %1775 }
 0x2ff   : > { %2363 = vst.msk [vmem:[#allocation2 + $0x64] sm:$0xf] %vm2337_vm9, %v2280_v25 }
 0x300   : > { %1858 = vst.msk [vmem:[#allocation2 + $0x68] sm:$0xf] %vm1831_vm6, %v1776_v29 }
 0x303   : > { %2014 = vrot.lane.b32.xlu1 %v1923_v13, %s3042_s26  ;;  %2012 = vrot.lane.b32.xlu0 %v1922_v22, %s3042_s26 }
 0x304   : > { %2245 = vrot.lane.b32.xlu2 %v2165_v26, %s3043_s27 }
 0x305   : > { %v1987_v3 = vpop.permute.xlu1 %1986  ;;  %v1985_v15 = vpop.permute.xlu0 %1984  ;;  %v2963_v23 = vld [vmem:[#allocation2 + $0x78] sm:$0xff] }
 0x306   : > { %2090 = vst.msk [vmem:[#allocation2 + $0x14] sm:$0xf] %vm2084_vm8, %v1987_v3  ;;  %v2960_v28 = vld [vmem:[#allocation2 + $0x60] sm:$0xff]  ;;  %2943 = vmatmul.msk.bf16.vlgmr.msra.gmra.mxu3 %vm2524_vm10, %v2963_v23  ;;  %v1790_v41 = vpop.permute.xlu2 %1789 }
 0x307   : > { %2089 = vst.msk [vmem:[#allocation2 + $0x10] sm:$0xf] %vm2084_vm8, %v1985_v15  ;;  %2940 = vmatmul.msk.bf16.gmra.mxu2 %vm2524_vm10, %v2960_v28 }
 0x308   : > { %2343 = vst.msk [vmem:[#allocation2 + $0x14] sm:$0xf] %vm2337_vm9, %v2240_v47 }
 0x309   : > { %1865 = vst.msk [vmem:[#allocation2 + $0x84] sm:$0xf] %vm1831_vm6, %v1790_v41 }
 0x30b   : > { %2265 = vrot.lane.b32.xlu1 %v2175_v55, %s3043_s27  ;;  %2247 = vrot.lane.b32.xlu0 %v2166_v6, %s3043_s27 }
 0x30c   : > { %2267 = vrot.lane.b32.xlu2 %v2176_v42, %s3043_s27 }
 0x30d   : > { %v2238_v43 = vpop.permute.xlu1 %2237  ;;  %v2007_v53 = vpop.permute.xlu0 %2006 }
 0x30e   : > { %2342 = vst.msk [vmem:[#allocation2 + $0x10] sm:$0xf] %vm2337_vm9, %v2238_v43  ;;  %v2041_v54 = vpop.permute.xlu2 %2040 }
 0x30f   : > { %2100 = vst.msk [vmem:[#allocation2 + $0x3c] sm:$0xf] %vm2084_vm8, %v2007_v53 }
 0x315   : > { %v2260_v24 = vpop.permute.xlu1 %2259  ;;  %v2258_v57 = vpop.permute.xlu0 %2257  ;;  %v2950_v58 = vld [vmem:[#allocation2 + $0x10] sm:$0xff] }
 0x316   : > { %2353 = vst.msk [vmem:[#allocation2 + $0x3c] sm:$0xf] %vm2337_vm9, %v2260_v24  ;;  %2930 = vmatmul.msk.bf16.gmra.mxu0 %vm2524_vm10, %v2950_v58  ;;  %v2284_v61 = vpop.permute.xlu2 %2283 }
 0x317   : > { %2352 = vst.msk [vmem:[#allocation2 + $0x38] sm:$0xf] %vm2337_vm9, %v2258_v57 }
 0x31d   : > { %v1788_v1 = vpop.permute.xlu1 %1787  ;;  %v1778_v2 = vpop.permute.xlu0 %1777 }
 0x31e   : > { %1864 = vst.msk [vmem:[#allocation2 + $0x80] sm:$0xf] %vm1831_vm6, %v1788_v1  ;;  %v2955_v8 = vld [vmem:[#allocation2 + $0x38] sm:$0xff]  ;;  %v1989_v16 = vpop.permute.xlu2 %1988 }
 0x31f   : > { %1859 = vst.msk [vmem:[#allocation2 + $0x6c] sm:$0xf] %vm1831_vm6, %v1778_v2  ;;  %2935 = vmatmul.msk.bf16.gmra.mxu1 %vm2524_vm10, %v2955_v8 }
 0x320   : > { %2117 = vst.msk [vmem:[#allocation2 + $0x80] sm:$0xf] %vm2084_vm8, %v2041_v54 }
 0x321   : > { %2091 = vst.msk [vmem:[#allocation2 + $0x18] sm:$0xf] %vm2084_vm8, %v1989_v16 }
 0x325   : > { %v2031_v17 = vpop.permute.xlu1 %2030  ;;  %v2029_v19 = vpop.permute.xlu0 %2028 }
 0x326   : > { %2112 = vst.msk [vmem:[#allocation2 + $0x6c] sm:$0xf] %vm2084_vm8, %v2031_v17  ;;  %v2011_v20 = vpop.permute.xlu2 %2010 }
 0x327   : > { %2111 = vst.msk [vmem:[#allocation2 + $0x68] sm:$0xf] %vm2084_vm8, %v2029_v19 }
 0x328   : > { %2365 = vst.msk [vmem:[#allocation2 + $0x6c] sm:$0xf] %vm2337_vm9, %v2284_v61 }
 0x329   : > { %2102 = vst.msk [vmem:[#allocation2 + $0x44] sm:$0xf] %vm2084_vm8, %v2011_v20 }
 0x32d   : > { %v2282_v32 = vpop.permute.xlu1 %2281  ;;  %v2043_v21 = vpop.permute.xlu0 %2042 }
 0x32e   : > { %2364 = vst.msk [vmem:[#allocation2 + $0x68] sm:$0xf] %vm2337_vm9, %v2282_v32  ;;  %v2262_v27 = vpop.permute.xlu2 %2261 }
 0x32f   : > { %2118 = vst.msk [vmem:[#allocation2 + $0x84] sm:$0xf] %vm2084_vm8, %v2043_v21 }
 0x333   : > { %v2642_v33 = vpop.f32.mrf.mxu2 }
 0x334   : > { %v2643_v0 = vadd.f32 %v4222_v4, %v2642_v33 }
 0x335   : > { %v2296_v38 = vpop.permute.xlu1 %2295  ;;  %v2294_v40 = vpop.permute.xlu0 %2293  ;;  %v2961_v12 = vld [vmem:[#allocation2 + $0x68] sm:$0xff] }
 0x336   : > { %2371 = vst.msk [vmem:[#allocation2 + $0x84] sm:$0xf] %vm2337_vm9, %v2296_v38  ;;  %2941 = vmatmul.msk.bf16.gmra.mxu2 %vm2524_vm10, %v2961_v12  ;;  %v1782_v7 = vpop.permute.xlu2 %1781 }
 0x337   : > { %2702 = vst [vmem:[%s4227_s16 + $0xa0] sm:$0xff] %v2643_v0 }
 0x338   : > { %2370 = vst.msk [vmem:[#allocation2 + $0x80] sm:$0xf] %vm2337_vm9, %v2294_v40 }
 0x339   : > { %1861 = vst.msk [vmem:[#allocation2 + $0x74] sm:$0xf] %vm1831_vm6, %v1782_v7 }
 0x33b   : > { %v2644_v14 = vpop.f32.mrf.mxu2  ;;  %v2592_v56 = vpop.f32.mrf.mxu0 }
 0x33c   : > { %v2645_v36 = vadd.f32 %v4222_v4, %v2644_v14  ;;  %v2593_v49 = vadd.f32 %v4222_v4, %v2592_v56 }
 0x33d   : > { %v2009_v39 = vpop.permute.xlu1 %2008  ;;  %v1991_v35 = vpop.permute.xlu0 %1990 }
 0x33e   : > { %2101 = vst.msk [vmem:[#allocation2 + $0x40] sm:$0xf] %vm2084_vm8, %v2009_v39  ;;  %v2033_v18 = vpop.permute.xlu2 %2032 }
 0x33f   : > { %2703 = vst [vmem:[%s4227_s16 + $0xa8] sm:$0xff] %v2645_v36  ;;  %v2964_v63 = vld [vmem:[#allocation2 + $0x80] sm:$0xff] }
 0x340   : > { %2092 = vst.msk [vmem:[#allocation2 + $0x1c] sm:$0xf] %vm2084_vm8, %v1991_v35  ;;  %2944 = vmatmul.msk.bf16.gmra.mxu3 %vm2524_vm10, %v2964_v63 }
 0x341   : > { %2682 = vst [vmem:[%s4227_s16] sm:$0xff] %v2593_v49 }
 0x342   : > { %2354 = vst.msk [vmem:[#allocation2 + $0x40] sm:$0xf] %vm2337_vm9, %v2262_v27 }
 0x343   : > { %v2594_v30 = vpop.f32.mrf.mxu0 }
 0x344   : > { %v2595_v34 = vadd.f32 %v4222_v4, %v2594_v30  ;;  %v2617_v48 = vpop.f32.mrf.mxu1 }
 0x345   : > { %v2244_v52 = vpop.permute.xlu1 %2243  ;;  %v2242_v51 = vpop.permute.xlu0 %2241  ;;  %v2618_v5 = vadd.f32 %v4222_v4, %v2617_v48 }
 0x346   : > { %2345 = vst.msk [vmem:[#allocation2 + $0x1c] sm:$0xf] %vm2337_vm9, %v2244_v52  ;;  %v2047_v45 = vpop.permute.xlu2 %2046 }
 0x347   : > { %2344 = vst.msk [vmem:[#allocation2 + $0x18] sm:$0xf] %vm2337_vm9, %v2242_v51 }
 0x348   : > { %2683 = vst [vmem:[%s4227_s16 + $0x8] sm:$0xff] %v2595_v34 }
 0x349   : > { %2692 = vst [vmem:[%s4227_s16 + $0x50] sm:$0xff] %v2618_v5 }
 0x34c   : > { %v2619_v60 = vpop.f32.mrf.mxu1 }
 0x34d   : > { %v1780_v9 = vpop.permute.xlu1 %1779  ;;  %v2264_v44 = vpop.permute.xlu0 %2263  ;;  %v2620_v59 = vadd.f32 %v4222_v4, %v2619_v60 }
 0x34e   : > { %1860 = vst.msk [vmem:[#allocation2 + $0x70] sm:$0xf] %vm1831_vm6, %v1780_v9  ;;  %v2951_v47 = vld [vmem:[#allocation2 + $0x18] sm:$0xff]  ;;  %v2298_v11 = vpop.permute.xlu2 %2297 }
 0x34f   : > { %2355 = vst.msk [vmem:[#allocation2 + $0x44] sm:$0xf] %vm2337_vm9, %v2264_v44  ;;  %2931 = vmatmul.msk.bf16.gmra.mxu0 %vm2524_vm10, %v2951_v47 }
 0x350   : > { %2113 = vst.msk [vmem:[#allocation2 + $0x70] sm:$0xf] %vm2084_vm8, %v2033_v18 }
 0x351   : > { %2693 = vst [vmem:[%s4227_s16 + $0x58] sm:$0xff] %v2620_v59 }
 0x355   : > { %v1794_v62 = vpop.permute.xlu1 %1793  ;;  %v1792_v10 = vpop.permute.xlu0 %1791 }
 0x356   : > { %1867 = vst.msk [vmem:[#allocation2 + $0x8c] sm:$0xf] %vm1831_vm6, %v1794_v62  ;;  %v2956_v25 = vld [vmem:[#allocation2 + $0x40] sm:$0xff]  ;;  %v1995_v46 = vpop.permute.xlu2 %1994 }
 0x357   : > { %1866 = vst.msk [vmem:[#allocation2 + $0x88] sm:$0xf] %vm1831_vm6, %v1792_v10  ;;  %2936 = vmatmul.msk.bf16.gmra.mxu1 %vm2524_vm10, %v2956_v25 }
 0x358   : > { %2120 = vst.msk [vmem:[#allocation2 + $0x8c] sm:$0xf] %vm2084_vm8, %v2047_v45 }
 0x359   : > { %2094 = vst.msk [vmem:[#allocation2 + $0x24] sm:$0xf] %vm2084_vm8, %v1995_v46 }
 0x35a   : > { %v2647_v13 = vpop.f32.mrf.mxu2 }
 0x35b   : > { %v2648_v22 = vadd.f32 %v4222_v4, %v2647_v13 }
 0x35d   : > { %v2045_v29 = vpop.permute.xlu1 %2044  ;;  %v2035_v26 = vpop.permute.xlu0 %2034  ;;  %2704 = vst [vmem:[%s4227_s16 + $0xb0] sm:$0xff] %v2648_v22 }
 0x35e   : > { %2119 = vst.msk [vmem:[#allocation2 + $0x88] sm:$0xf] %vm2084_vm8, %v2045_v29  ;;  %v2246_v6 = vpop.permute.xlu2 %2245 }
 0x35f   : > { %2114 = vst.msk [vmem:[#allocation2 + $0x74] sm:$0xf] %vm2084_vm8, %v2035_v26 }
 0x360   : > { %2372 = vst.msk [vmem:[#allocation2 + $0x88] sm:$0xf] %vm2337_vm9, %v2298_v11 }
 0x362   : > { %v2649_v37 = vpop.f32.mrf.mxu2 }
 0x363   : > { %v2650_v50 = vadd.f32 %v4222_v4, %v2649_v37  ;;  %v2622_v3 = vpop.f32.mrf.mxu1 }
 0x364   : > { %v2597_v28 = vpop.f32.mrf.mxu0  ;;  %v2623_v31 = vadd.f32 %v4222_v4, %v2622_v3 }
 0x365   : > { %v2288_v15 = vpop.permute.xlu1 %2287  ;;  %v2286_v23 = vpop.permute.xlu0 %2285  ;;  %2705 = vst [vmem:[%s4227_s16 + $0xb8] sm:$0xff] %v2650_v50  ;;  %v2598_v55 = vadd.f32 %v4222_v4, %v2597_v28 }
 0x366   : > { %2367 = vst.msk [vmem:[#allocation2 + $0x74] sm:$0xf] %vm2337_vm9, %v2288_v15  ;;  %v2268_v58 = vpop.permute.xlu2 %2267 }
 0x367   : > { %2366 = vst.msk [vmem:[#allocation2 + $0x70] sm:$0xf] %vm2337_vm9, %v2286_v23 }
 0x368   : > { %2684 = vst [vmem:[%s4227_s16 + $0x10] sm:$0xff] %v2598_v55 }
 0x369   : > { %2694 = vst [vmem:[%s4227_s16 + $0x60] sm:$0xff] %v2623_v31 }
 0x36b   : > { %v2624_v41 = vpop.f32.mrf.mxu1 }
 0x36c   : > { %v2625_v53 = vadd.f32 %v4222_v4, %v2624_v41  ;;  %v2599_v54 = vpop.f32.mrf.mxu0 }
 0x36d   : > { %v1993_v42 = vpop.permute.xlu1 %1992  ;;  %v2300_v43 = vpop.permute.xlu0 %2299  ;;  %v2600_v24 = vadd.f32 %v4222_v4, %v2599_v54 }
 0x36e   : > { %2093 = vst.msk [vmem:[#allocation2 + $0x20] sm:$0xf] %vm2084_vm8, %v1993_v42  ;;  %v2962_v57 = vld [vmem:[#allocation2 + $0x70] sm:$0xff] }
 0x36f   : > { %2373 = vst.msk [vmem:[#allocation2 + $0x8c] sm:$0xf] %vm2337_vm9, %v2300_v43  ;;  %2942 = vmatmul.msk.bf16.gmra.mxu2 %vm2524_vm10, %v2962_v57 }
 0x370   : > { %2695 = vst [vmem:[%s4227_s16 + $0x68] sm:$0xff] %v2625_v53 }
 0x371   : > { %2685 = vst [vmem:[%s4227_s16 + $0x18] sm:$0xff] %v2600_v24 }
 0x372   : > { %2346 = vst.msk [vmem:[#allocation2 + $0x20] sm:$0xf] %vm2337_vm9, %v2246_v6 }
 0x375   : > { %v2015_v61 = vpop.permute.xlu1 %2014  ;;  %v2013_v1 = vpop.permute.xlu0 %2012 }
 0x376   : > { %2104 = vst.msk [vmem:[#allocation2 + $0x4c] sm:$0xf] %vm2084_vm8, %v2015_v61  ;;  %v2965_v2 = vld [vmem:[#allocation2 + $0x88] sm:$0xff] }
 0x377   : > { %2103 = vst.msk [vmem:[#allocation2 + $0x48] sm:$0xf] %vm2084_vm8, %v2013_v1  ;;  %2945 = vmatmul.msk.bf16.gmra.mxu3 %vm2524_vm10, %v2965_v2 }
 0x378   : > { %2357 = vst.msk [vmem:[#allocation2 + $0x4c] sm:$0xf] %vm2337_vm9, %v2268_v58 }
 0x37d   : > { %v2266_v8 = vpop.permute.xlu1 %2265  ;;  %v2248_v16 = vpop.permute.xlu0 %2247 }
 0x37e   : > { %2356 = vst.msk [vmem:[#allocation2 + $0x48] sm:$0xf] %vm2337_vm9, %v2266_v8 }
 0x37f   : > { %2347 = vst.msk [vmem:[#allocation2 + $0x24] sm:$0xf] %vm2337_vm9, %v2248_v16 }
 0x385   : > { %v2957_v17 = vld [vmem:[#allocation2 + $0x48] sm:$0xff] }
 0x386   : > { %v2952_v19 = vld [vmem:[#allocation2 + $0x20] sm:$0xff]  ;;  %2937 = vmatmul.msk.bf16.gmra.mxu1 %vm2524_vm10, %v2957_v17 }
 0x387   : > { %2932 = vmatmul.msk.bf16.gmra.mxu0 %vm2524_vm10, %v2952_v19 }
 0x389   : > { %v2667_v20 = vpop.f32.mrf.mxu3 }
 0x38a   : > { %v2652_v32 = vpop.f32.mrf.mxu2  ;;  %v2668_v21 = vadd.f32 %v4222_v4, %v2667_v20 }
 0x38b   : > { %v2653_v27 = vadd.f32 %v4222_v4, %v2652_v32 }
 0x38c   : > { %2712 = vst [vmem:[%s4227_s16 + $0xf0] sm:$0xff] %v2668_v21 }
 0x38d   : > { %2706 = vst [vmem:[%s4227_s16 + $0xc0] sm:$0xff] %v2653_v27 }
 0x391   : > { %v2669_v33 = vpop.f32.mrf.mxu3 }
 0x392   : > { %v2654_v0 = vpop.f32.mrf.mxu2  ;;  %v2670_v38 = vadd.f32 %v4222_v4, %v2669_v33 }
 0x393   : > { %v2655_v40 = vadd.f32 %v4222_v4, %v2654_v0  ;;  %v2602_v12 = vpop.f32.mrf.mxu0 }
 0x394   : > { %2713 = vst [vmem:[%s4227_s16 + $0xf8] sm:$0xff] %v2670_v38  ;;  %v2603_v7 = vadd.f32 %v4222_v4, %v2602_v12 }
 0x395   : > { %2707 = vst [vmem:[%s4227_s16 + $0xc8] sm:$0xff] %v2655_v40 }
 0x396   : > { %2686 = vst [vmem:[%s4227_s16 + $0x20] sm:$0xff] %v2603_v7 }
 0x39b   : > { %v2604_v14 = vpop.f32.mrf.mxu0 }
 0x39c   : > { %v2605_v56 = vadd.f32 %v4222_v4, %v2604_v14  ;;  %v2627_v36 = vpop.f32.mrf.mxu1 }
 0x39d   : > { %v2628_v39 = vadd.f32 %v4222_v4, %v2627_v36 }
 0x39e   : > { %2687 = vst [vmem:[%s4227_s16 + $0x28] sm:$0xff] %v2605_v56 }
 0x39f   : > { %2696 = vst [vmem:[%s4227_s16 + $0x70] sm:$0xff] %v2628_v39 }
 0x3a4   : > { %v2629_v35 = vpop.f32.mrf.mxu1 }
 0x3a5   : > { %v2630_v49 = vadd.f32 %v4222_v4, %v2629_v35 }
 0x3a7   : > { %2697 = vst [vmem:[%s4227_s16 + $0x78] sm:$0xff] %v2630_v49 }
 0x3b9   : > { %v2657_v63 = vpop.f32.mrf.mxu2 }
 0x3ba   : > { %v2658_v18 = vadd.f32 %v4222_v4, %v2657_v63 }
 0x3bc   : > { %2708 = vst [vmem:[%s4227_s16 + $0xd0] sm:$0xff] %v2658_v18 }
 0x3c1   : > { %v2659_v30 = vpop.f32.mrf.mxu2 }
 0x3c2   : > { %v2660_v52 = vadd.f32 %v4222_v4, %v2659_v30 }
 0x3c3   : > { %v2672_v51 = vpop.f32.mrf.mxu3 }
 0x3c4   : > { %2709 = vst [vmem:[%s4227_s16 + $0xd8] sm:$0xff] %v2660_v52  ;;  %v2673_v34 = vadd.f32 %v4222_v4, %v2672_v51 }
 0x3c6   : > { %2714 = vst [vmem:[%s4227_s16 + $0x100] sm:$0xff] %v2673_v34 }
 0x3cb   : > { %v2674_v48 = vpop.f32.mrf.mxu3 }
 0x3cc   : > { %v2675_v5 = vadd.f32 %v4222_v4, %v2674_v48  ;;  %v2607_v45 = vpop.f32.mrf.mxu0 }
 0x3cd   : > { %v2608_v9 = vadd.f32 %v4222_v4, %v2607_v45 }
 0x3ce   : > { %2715 = vst [vmem:[%s4227_s16 + $0x108] sm:$0xff] %v2675_v5 }
 0x3cf   : > { %2688 = vst [vmem:[%s4227_s16 + $0x30] sm:$0xff] %v2608_v9 }
 0x3d4   : > { %v2609_v44 = vpop.f32.mrf.mxu0  ;;  %v2632_v60 = vpop.f32.mrf.mxu1 }
 0x3d5   : > { %v2610_v47 = vadd.f32 %v4222_v4, %v2609_v44  ;;  %v2633_v59 = vadd.f32 %v4222_v4, %v2632_v60 }
 0x3d7   : > { %2689 = vst [vmem:[%s4227_s16 + $0x38] sm:$0xff] %v2610_v47 }
 0x3d8   : > { %2698 = vst [vmem:[%s4227_s16 + $0x80] sm:$0xff] %v2633_v59 }
 0x3dc   : > { %v2634_v11 = vpop.f32.mrf.mxu1 }
 0x3dd   : > { %v2635_v62 = vadd.f32 %v4222_v4, %v2634_v11 }
 0x3df   : > { %2699 = vst [vmem:[%s4227_s16 + $0x88] sm:$0xff] %v2635_v62 }
 0x3f2   : > { %v2662_v10 = vpop.f32.mrf.mxu2 }
 0x3f3   : > { %v2663_v25 = vadd.f32 %v4222_v4, %v2662_v10 }
 0x3f5   : > { %2710 = vst [vmem:[%s4227_s16 + $0xe0] sm:$0xff] %v2663_v25 }
 0x3fa   : > { %v2677_v46 = vpop.f32.mrf.mxu3  ;;  %v2664_v13 = vpop.f32.mrf.mxu2 }
 0x3fb   : > { %v2678_v22 = vadd.f32 %v4222_v4, %v2677_v46  ;;  %v2665_v29 = vadd.f32 %v4222_v4, %v2664_v13 }
 0x3fd   : > { %2716 = vst [vmem:[%s4227_s16 + $0x110] sm:$0xff] %v2678_v22 }
 0x3fe   : > { %2711 = vst [vmem:[%s4227_s16 + $0xe8] sm:$0xff] %v2665_v29 }
 0x402   : > { %v2679_v26 = vpop.f32.mrf.mxu3 }
 0x403   : > { %v2680_v37 = vadd.f32 %v4222_v4, %v2679_v26  ;;  %v2637_v50 = vpop.f32.mrf.mxu1 }
 0x404   : > { %v2612_v3 = vpop.f32.mrf.mxu0  ;;  %v2638_v15 = vadd.f32 %v4222_v4, %v2637_v50 }
 0x405   : > { %2717 = vst [vmem:[%s4227_s16 + $0x118] sm:$0xff] %v2680_v37  ;;  %v2613_v23 = vadd.f32 %v4222_v4, %v2612_v3 }
 0x406   : > { %2700 = vst [vmem:[%s4227_s16 + $0x90] sm:$0xff] %v2638_v15 }
 0x407   : > { %2690 = vst [vmem:[%s4227_s16 + $0x40] sm:$0xff] %v2613_v23 }
 0x40b   : > { %v2639_v28 = vpop.f32.mrf.mxu1 }
 0x40c   : > { %v2614_v31 = vpop.f32.mrf.mxu0  ;;  %v2640_v55 = vadd.f32 %v4222_v4, %v2639_v28 }
 0x40d   : > { %v2615_v6 = vadd.f32 %v4222_v4, %v2614_v31 }
 0x40e   : > { %2701 = vst [vmem:[%s4227_s16 + $0x98] sm:$0xff] %v2640_v55 }
 0x40f   : > { %2691 = vst [vmem:[%s4227_s16 + $0x48] sm:$0xff] %v2615_v6 }
 0x410 PF: > { %s13_s14 = sadd.s32 1, %s3034_s14   ;;  %s4350_s12 = smov %s3030_s13 }
 0x411   : > { %p10_p5 = scmp.ge.s32.totalorder %s13_s14, 4   ;;  %s4351_s13 = smov %s4353_s15 }
 0x413   :  { %12 = sbr.rel (!%p10_p5) target bundleno = 2 (0x2), region = 68 }

</bundles_post_ra>
